<compile_context>
chip_gen: v7x
topology: tpu7x:2x2x1
jax: 0.10.0
libtpu: 0.0.40
codegen_flags: <defaults>
</compile_context>

<pallas_src>
import math
import functools

import jax
import jax.numpy as jnp
from jax import lax
from jax.experimental import pallas as pl
from jax.experimental.pallas import tpu as pltpu

EPS = 1e-5  # matches the custom LayerNorm in the reference implementation


def _layernorm(x, scale, shift):
    # var with unbiased=False, keepdim, like the reference LayerNorm.
    mean = jnp.mean(x, axis=-1, keepdims=True)
    var = jnp.mean((x - mean) ** 2, axis=-1, keepdims=True)
    return scale * (x - mean) * lax.rsqrt(var + EPS) + shift


def _gelu_tanh(x):
    # tanh-approximation GeLU (the custom GeLU class used alongside this block).
    c = math.sqrt(2.0 / math.pi)
    x3 = x * x * x
    return 0.5 * x * (1.0 + jnp.tanh(c * (x + 0.044715 * x3)))


def transformer_block_kernel(
    # inputs
    x_ref,                               # (TQ, D)  f32   current query tile
    ln1_s_ref, ln1_b_ref,                # (1, D)   f32
    wq_ref, wk_ref, wv_ref,              # (D, D)   bf16  unsplit projection weights
    wo_ref, bo_ref,                      # (D, D)   bf16, (1, D) f32
    ln2_s_ref, ln2_b_ref,                # (1, D)   f32
    w1_ref, b1_ref,                      # (D, 4D)  bf16, (1, 4D) f32
    w2_ref, b2_ref,                      # (4D, D)  bf16, (1, D)  f32
    # output
    o_ref,                               # (TQ, D)
    # scratch
    kcache_ref, vcache_ref,              # (H, T, hd) bf16  persistent K/V cache
    qhm_ref,                             # (H, TQ, hd) bf16 head-major scaled q
    ctx_ref,                             # (TQ, D) bf16     normalized context slab
    m_ref, l_ref, acc_ref,               # (HC, TQ, 1/1/hd) f32 online-softmax state
    *, num_heads, head_chunk,
):
    H, HC = num_heads, head_chunk
    TQ, D = o_ref.shape
    hd = D // H
    qt = pl.program_id(1)                 # q-tile index (innermost, sequential)
    row0 = pl.multiple_of(qt * TQ, TQ)    # first sequence row of this tile

    # ---- LayerNorm1 + fused Q/K/V projections for THIS tile (computed once) ----
    x_q = x_ref[...]                                             # (TQ, D) f32
    h1 = _layernorm(x_q, ln1_s_ref[...], ln1_b_ref[...]).astype(jnp.bfloat16)
    scale = 1.0 / math.sqrt(hd)                                  # folded into q
    q_b = (jnp.dot(h1, wq_ref[...], preferred_element_type=jnp.float32)
           * scale).astype(jnp.bfloat16)
    k_b = jnp.dot(h1, wk_ref[...],
                  preferred_element_type=jnp.float32).astype(jnp.bfloat16)
    v_b = jnp.dot(h1, wv_ref[...],
                  preferred_element_type=jnp.float32).astype(jnp.bfloat16)

    # head-major scatter: q into scratch, K/V appended to the persistent cache
    for hi in range(H):                                          # static loop
        lanes = slice(hi * hd, (hi + 1) * hd)
        qhm_ref[hi] = q_b[:, lanes]
        kcache_ref[hi, pl.ds(row0, TQ), :] = k_b[:, lanes]
        vcache_ref[hi, pl.ds(row0, TQ), :] = v_b[:, lanes]

    # ---- causal flash attention over cached KV tiles 0..qt, head-chunked ----
    row_ids = lax.broadcasted_iota(jnp.int32, (TQ, TQ), 0)
    col_ids = lax.broadcasted_iota(jnp.int32, (TQ, TQ), 1)
    diag_mask = col_ids <= row_ids                               # in-tile causal mask

    for c in range(H // HC):
        h0 = c * HC
        q_c = qhm_ref[pl.ds(h0, HC), :, :]                       # (HC, TQ, hd) bf16

        m_ref[...] = jnp.full(m_ref.shape, -jnp.inf, jnp.float32)
        l_ref[...] = jnp.zeros(l_ref.shape, jnp.float32)
        acc_ref[...] = jnp.zeros(acc_ref.shape, jnp.float32)

        def attend(k_c, v_c, masked):
            s = jnp.einsum('hqd,hkd->hqk', q_c, k_c,
                           preferred_element_type=jnp.float32)   # (HC, TQ, TQ) f32
            if masked:                                           # only the diagonal tile
                s = jnp.where(diag_mask, s, -jnp.inf)
            m_prev = m_ref[...]
            m_new = jnp.maximum(m_prev, s.max(axis=-1, keepdims=True))
            alpha = jnp.exp(m_prev - m_new)
            p = jnp.exp(s - m_new).astype(jnp.bfloat16)          # softmax numerator
            # same bf16 p feeds both the denominator and the PV matmul (consistent)
            l_ref[...] = alpha * l_ref[...] + jnp.sum(
                p.astype(jnp.float32), axis=-1, keepdims=True)
            acc_ref[...] = alpha * acc_ref[...] + jnp.einsum(
                'hqk,hkd->hqd', p, v_c, preferred_element_type=jnp.float32)
            m_ref[...] = m_new

        # off-diagonal KV tiles (strictly below the diagonal): no masking work;
        # tiles above the diagonal are never visited (causal tile skipping).
        @pl.loop(0, qt)
        def _(kv):
            kv0 = pl.multiple_of(kv * TQ, TQ)
            attend(kcache_ref[pl.ds(h0, HC), pl.ds(kv0, TQ), :],
                   vcache_ref[pl.ds(h0, HC), pl.ds(kv0, TQ), :], masked=False)

        # diagonal tile: this tile's own K/V with the in-tile causal mask
        attend(kcache_ref[pl.ds(h0, HC), pl.ds(row0, TQ), :],
               vcache_ref[pl.ds(h0, HC), pl.ds(row0, TQ), :], masked=True)

        # normalize and write this chunk's lanes of the (TQ, D) context slab.
        # NOTE: approximate reciprocal (EUP) -- inference-grade normalization.
        ctx_c = acc_ref[...] * pl.reciprocal(l_ref[...], approx=True)
        for i in range(HC):
            ctx_ref[:, (h0 + i) * hd:(h0 + i + 1) * hd] = ctx_c[i].astype(jnp.bfloat16)

    # ---- attention epilogue: single lane-dense (TQ,D)x(D,D) output projection ----
    attn = jnp.dot(ctx_ref[...], wo_ref[...],
                   preferred_element_type=jnp.float32) + bo_ref[...]

    # dropout1 == identity
    x2 = x_q + attn                                              # residual 1 (f32)

    # ---- LayerNorm2 + FeedForward ----
    h2 = _layernorm(x2, ln2_s_ref[...], ln2_b_ref[...]).astype(jnp.bfloat16)
    ff = jnp.dot(h2, w1_ref[...], preferred_element_type=jnp.float32) + b1_ref[...]
    ff = _gelu_tanh(ff).astype(jnp.bfloat16)                     # GeLU in f32, bf16 for MXU
    ff = jnp.dot(ff, w2_ref[...], preferred_element_type=jnp.float32) + b2_ref[...]

    # dropout2 == identity
    o_ref[...] = (x2 + ff).astype(o_ref.dtype)


def _pick_head_chunk(num_heads, tq):
    # largest divisor of num_heads whose f32 score block (HC, TQ, TQ) stays <= ~128 KiB
    budget = 128 * 1024
    best = 1
    for c in range(1, num_heads + 1):
        if num_heads % c == 0 and c * tq * tq * 4 <= budget:
            best = c
    return best


def transformer_block(x, params, num_heads):
    B, T, D = x.shape
    hd = D // num_heads
    hidden = params["w1"].shape[-1]
    bf16 = jnp.bfloat16

    # query/KV tile size along the sequence
    if T <= 128:
        TQ = T
    elif T % 128 == 0:
        TQ = 128
    else:
        TQ = T  # TODO(synk): pad ragged T to a multiple of 128 instead of one big tile
    n_qt = T // TQ
    HC = _pick_head_chunk(num_heads, TQ)

    # bf16 matmul operands (f32 MXU accumulation); LN params / biases stay f32
    wq = params["wq"].astype(bf16)
    wk = params["wk"].astype(bf16)
    wv = params["wv"].astype(bf16)
    wo = params["wo"].astype(bf16)
    w1 = params["w1"].astype(bf16)
    w2 = params["w2"].astype(bf16)

    # grid: batch outer ("parallel"), q-tile inner ("arbitrary"/sequential) so the
    # persistent VMEM K/V cache is filled in order and x is never re-fetched.
    grid = (B, n_qt)

    # rough VMEM budget: double-buffered tiles + single-buffered weights + KV cache
    est = 2 * 2 * TQ * D * 4                              # x / out tiles (f32, 2 bufs each)
    est += (4 * D * D + 2 * D * hidden) * 2               # resident bf16 weights
    est += 2 * num_heads * T * hd * 2                     # persistent K/V cache (bf16)
    est += num_heads * TQ * hd * 2 + TQ * D * 2           # q head-major + ctx slab
    est += HC * TQ * (hd + 2) * 4                         # acc / m / l
    vmem_limit = int(min(56 * 2**20, max(32 * 2**20, 2 * est)))  # safe on v5e/v6e/v7x

    def build(weight_pipeline_mode):
        def rep(shape):
            nd = len(shape)
            if weight_pipeline_mode is None:
                return pl.BlockSpec(shape, lambda b, q: (0,) * nd)
            return pl.BlockSpec(shape, lambda b, q: (0,) * nd,
                                pipeline_mode=weight_pipeline_mode)

        in_specs = [
            pl.BlockSpec((None, TQ, D), lambda b, q: (b, q, 0)),  # x: one q tile per step
            rep((1, D)), rep((1, D)),                             # ln1 scale / shift
            rep((D, D)), rep((D, D)), rep((D, D)),                # Wq / Wk / Wv
            rep((D, D)), rep((1, D)),                             # Wo, bo
            rep((1, D)), rep((1, D)),                             # ln2 scale / shift
            rep((D, hidden)), rep((1, hidden)),                   # W1, b1
            rep((hidden, D)), rep((1, D)),                        # W2, b2
        ]
        out_spec = pl.BlockSpec((None, TQ, D), lambda b, q: (b, q, 0))

        kernel = functools.partial(transformer_block_kernel,
                                   num_heads=num_heads, head_chunk=HC)
        return pl.pallas_call(
            kernel,
            out_shape=jax.ShapeDtypeStruct((B, T, D), x.dtype),
            grid_spec=pltpu.PrefetchScalarGridSpec(
                num_scalar_prefetch=0,
                grid=grid,
                in_specs=in_specs,
                out_specs=out_spec,
                scratch_shapes=[
                    pltpu.VMEM((num_heads, T, hd), bf16),         # K cache (persistent)
                    pltpu.VMEM((num_heads, T, hd), bf16),         # V cache (persistent)
                    pltpu.VMEM((num_heads, TQ, hd), bf16),        # q (head-major, scaled)
                    pltpu.VMEM((TQ, D), bf16),                    # normalized context slab
                    pltpu.VMEM((HC, TQ, 1), jnp.float32),         # m (running max)
                    pltpu.VMEM((HC, TQ, 1), jnp.float32),         # l (running sum)
                    pltpu.VMEM((HC, TQ, hd), jnp.float32),        # acc
                ],
            ),
            compiler_params=pltpu.CompilerParams(
                dimension_semantics=("parallel", "arbitrary"),
                vmem_limit_bytes=vmem_limit,
            ),
        )(
            x,
            params["ln1_s"], params["ln1_b"],
            wq, wk, wv, wo, params["bo"],
            params["ln2_s"], params["ln2_b"],
            w1, params["b1"], w2, params["b2"],
        )

    try:
        # single-buffer the grid-invariant weight blocks (halves their VMEM footprint);
        # indices never change, so single buffering cannot introduce staleness.
        return build(pl.Buffered(1))
    except Exception:  # pragma: no cover - jax versions without BlockSpec.pipeline_mode
        return build(None)


def reference_block(x, p, num_heads):
    # pure-JAX f32 reference with the original (unsplit) weights
    B, T, D = x.shape
    hd = D // num_heads
    h = _layernorm(x, p["ln1_s"][0], p["ln1_b"][0])
    q = h @ p["wq"]
    k = h @ p["wk"]
    v = h @ p["wv"]
    q = q.reshape(B, T, num_heads, hd).transpose(0, 2, 1, 3)
    k = k.reshape(B, T, num_heads, hd).transpose(0, 2, 1, 3)
    v = v.reshape(B, T, num_heads, hd).transpose(0, 2, 1, 3)
    s = jnp.einsum("bhqd,bhkd->bhqk", q, k) / math.sqrt(hd)
    causal = jnp.tril(jnp.ones((T, T), dtype=bool))
    s = jnp.where(causal, s, -jnp.inf)
    p_attn = jax.nn.softmax(s, axis=-1)
    ctx = jnp.einsum("bhqk,bhkd->bhqd", p_attn, v)
    ctx = ctx.transpose(0, 2, 1, 3).reshape(B, T, D)
    attn_out = ctx @ p["wo"] + p["bo"][0]
    x2 = x + attn_out
    h2 = _layernorm(x2, p["ln2_s"][0], p["ln2_b"][0])
    ff = _gelu_tanh(h2 @ p["w1"] + p["b1"][0]) @ p["w2"] + p["b2"][0]
    return x2 + ff


if __name__ == "__main__":
    # config: emb_dim=32, context_length=8, n_heads=4, drop_rate=0.0, qkv_bias=False
    B, T, D, H = 2, 8, 32, 4
    hidden = 4 * D

    key = jax.random.PRNGKey(0)
    keys = jax.random.split(key, 8)
    x = jax.random.normal(keys[0], (B, T, D), dtype=jnp.float32)

    params = {
        "ln1_s": jnp.ones((1, D), jnp.float32),
        "ln1_b": jnp.zeros((1, D), jnp.float32),
        "wq": 0.05 * jax.random.normal(keys[1], (D, D), jnp.float32),
        "wk": 0.05 * jax.random.normal(keys[2], (D, D), jnp.float32),
        "wv": 0.05 * jax.random.normal(keys[3], (D, D), jnp.float32),
        "wo": 0.05 * jax.random.normal(keys[4], (D, D), jnp.float32),
        "bo": jnp.zeros((1, D), jnp.float32),
        "ln2_s": jnp.ones((1, D), jnp.float32),
        "ln2_b": jnp.zeros((1, D), jnp.float32),
        "w1": 0.05 * jax.random.normal(keys[5], (D, hidden), jnp.float32),
        "b1": 0.01 * jax.random.normal(keys[6], (1, hidden), jnp.float32),
        "w2": 0.05 * jax.random.normal(keys[7], (hidden, D), jnp.float32),
        "b2": jnp.zeros((1, D), jnp.float32),
    }

    out = transformer_block(x, params, num_heads=H)
    out = jax.block_until_ready(out)

    ref = reference_block(x, params, num_heads=H)
    assert out.shape == (B, T, D)
    # bf16 matmul operands + bf16 softmax numerator + approx reciprocal => relaxed tolerance
    assert jnp.allclose(out, ref, atol=2e-2, rtol=2e-2), "mismatch vs pure-JAX reference"

    print("KERNEL_OK")
</pallas_src>

<mosaic_0001>
module attributes {stable_mosaic.version = 11 : i64} {
  func.func @transformer_block_kernel(%arg0: i32, %arg1: i32, %arg2: memref<1x8x32xf32, #tpu.memory_space<vmem>>, %arg3: memref<1x32xf32, #tpu.memory_space<vmem>>, %arg4: memref<1x32xf32, #tpu.memory_space<vmem>>, %arg5: memref<32x32xbf16, #tpu.memory_space<vmem>>, %arg6: memref<32x32xbf16, #tpu.memory_space<vmem>>, %arg7: memref<32x32xbf16, #tpu.memory_space<vmem>>, %arg8: memref<32x32xbf16, #tpu.memory_space<vmem>>, %arg9: memref<1x32xf32, #tpu.memory_space<vmem>>, %arg10: memref<1x32xf32, #tpu.memory_space<vmem>>, %arg11: memref<1x32xf32, #tpu.memory_space<vmem>>, %arg12: memref<32x128xbf16, #tpu.memory_space<vmem>>, %arg13: memref<1x128xf32, #tpu.memory_space<vmem>>, %arg14: memref<128x32xbf16, #tpu.memory_space<vmem>>, %arg15: memref<1x32xf32, #tpu.memory_space<vmem>>, %arg16: memref<1x8x32xf32, #tpu.memory_space<vmem>>, %arg17: memref<4x8x8xbf16, #tpu.memory_space<vmem>>, %arg18: memref<4x8x8xbf16, #tpu.memory_space<vmem>>, %arg19: memref<4x8x8xbf16, #tpu.memory_space<vmem>>, %arg20: memref<8x32xbf16, #tpu.memory_space<vmem>>, %arg21: memref<4x8x1xf32, #tpu.memory_space<vmem>>, %arg22: memref<4x8x1xf32, #tpu.memory_space<vmem>>, %arg23: memref<4x8x8xf32, #tpu.memory_space<vmem>>) attributes {dimension_semantics = [#tpu.dimension_semantics<parallel>, #tpu.dimension_semantics<arbitrary>], iteration_bounds = array<i64: 2, 1>, scalar_prefetch = 0 : i64, scratch_operands = 7 : i64, tpu.core_type = #tpu.core_type<tc>, window_params = [{transform_indices = @transform_0, window_bounds = array<i64: 1, 8, 32>}, {pipeline_mode = #tpu.pipeline_mode<synchronous>, transform_indices = @transform_1, window_bounds = array<i64: 1, 32>}, {pipeline_mode = #tpu.pipeline_mode<synchronous>, transform_indices = @transform_2, window_bounds = array<i64: 1, 32>}, {pipeline_mode = #tpu.pipeline_mode<synchronous>, transform_indices = @transform_3, window_bounds = array<i64: 32, 32>}, {pipeline_mode = #tpu.pipeline_mode<synchronous>, transform_indices = @transform_4, window_bounds = array<i64: 32, 32>}, {pipeline_mode = #tpu.pipeline_mode<synchronous>, transform_indices = @transform_5, window_bounds = array<i64: 32, 32>}, {pipeline_mode = #tpu.pipeline_mode<synchronous>, transform_indices = @transform_6, window_bounds = array<i64: 32, 32>}, {pipeline_mode = #tpu.pipeline_mode<synchronous>, transform_indices = @transform_7, window_bounds = array<i64: 1, 32>}, {pipeline_mode = #tpu.pipeline_mode<synchronous>, transform_indices = @transform_8, window_bounds = array<i64: 1, 32>}, {pipeline_mode = #tpu.pipeline_mode<synchronous>, transform_indices = @transform_9, window_bounds = array<i64: 1, 32>}, {pipeline_mode = #tpu.pipeline_mode<synchronous>, transform_indices = @transform_10, window_bounds = array<i64: 32, 128>}, {pipeline_mode = #tpu.pipeline_mode<synchronous>, transform_indices = @transform_11, window_bounds = array<i64: 1, 128>}, {pipeline_mode = #tpu.pipeline_mode<synchronous>, transform_indices = @transform_12, window_bounds = array<i64: 128, 32>}, {pipeline_mode = #tpu.pipeline_mode<synchronous>, transform_indices = @transform_13, window_bounds = array<i64: 1, 32>}, {transform_indices = @transform_14, window_bounds = array<i64: 1, 8, 32>}]} {
    %c8_i32 = arith.constant 8 : i32
    %0 = arith.muli %arg1, %c8_i32 : i32
    %1 = tpu.assume_multiple %0, 8 : i32
    %c0 = arith.constant 0 : index
    %c0_0 = arith.constant 0 : index
    %c0_1 = arith.constant 0 : index
    %2 = vector.load %arg2[%c0, %c0_0, %c0_1] : memref<1x8x32xf32, #tpu.memory_space<vmem>>, vector<1x8x32xf32>
    %3 = vector.shape_cast %2 : vector<1x8x32xf32> to vector<8x32xf32>
    %c0_2 = arith.constant 0 : index
    %c0_3 = arith.constant 0 : index
    %4 = vector.load %arg3[%c0_2, %c0_3] : memref<1x32xf32, #tpu.memory_space<vmem>>, vector<1x32xf32>
    %c0_4 = arith.constant 0 : index
    %c0_5 = arith.constant 0 : index
    %5 = vector.load %arg4[%c0_4, %c0_5] : memref<1x32xf32, #tpu.memory_space<vmem>>, vector<1x32xf32>
    %cst = arith.constant dense<0.000000e+00> : vector<8xf32>
    %6 = vector.multi_reduction <add>, %3, %cst [1] : vector<8x32xf32> to vector<8xf32>
    %7 = vector.shape_cast %6 : vector<8xf32> to vector<8x1xf32>
    %cst_6 = arith.constant 3.200000e+01 : f32
    %8 = vector.broadcast %cst_6 : f32 to vector<8x1xf32>
    %9 = arith.divf %7, %8 : vector<8x1xf32>
    %10 = vector.broadcast %9 : vector<8x1xf32> to vector<8x32xf32>
    %11 = arith.subf %3, %10 : vector<8x32xf32>
    %12 = arith.mulf %11, %11 : vector<8x32xf32>
    %cst_7 = arith.constant dense<0.000000e+00> : vector<8xf32>
    %13 = vector.multi_reduction <add>, %12, %cst_7 [1] : vector<8x32xf32> to vector<8xf32>
    %14 = vector.shape_cast %13 : vector<8xf32> to vector<8x1xf32>
    %cst_8 = arith.constant 3.200000e+01 : f32
    %15 = vector.broadcast %cst_8 : f32 to vector<8x1xf32>
    %16 = arith.divf %14, %15 : vector<8x1xf32>
    %17 = vector.broadcast %9 : vector<8x1xf32> to vector<8x32xf32>
    %18 = arith.subf %3, %17 : vector<8x32xf32>
    %19 = vector.broadcast %4 : vector<1x32xf32> to vector<8x32xf32>
    %20 = arith.mulf %19, %18 : vector<8x32xf32>
    %cst_9 = arith.constant 9.99999974E-6 : f32
    %21 = vector.broadcast %cst_9 : f32 to vector<8x1xf32>
    %22 = arith.addf %16, %21 : vector<8x1xf32>
    %23 = math.rsqrt %22 : vector<8x1xf32>
    %24 = vector.broadcast %23 : vector<8x1xf32> to vector<8x32xf32>
    %25 = arith.mulf %20, %24 : vector<8x32xf32>
    %26 = vector.broadcast %5 : vector<1x32xf32> to vector<8x32xf32>
    %27 = arith.addf %25, %26 : vector<8x32xf32>
    %28 = arith.truncf %27 : vector<8x32xf32> to vector<8x32xbf16>
    %c0_10 = arith.constant 0 : index
    %c0_11 = arith.constant 0 : index
    %29 = vector.load %arg5[%c0_10, %c0_11] : memref<32x32xbf16, #tpu.memory_space<vmem>>, vector<32x32xbf16>
    %cst_12 = arith.constant dense<0.000000e+00> : vector<8x32xf32>
    %30 = tpu.matmul %28, %29, %cst_12 {dimension_numbers = #tpu.dot_dimension_numbers<[1], [0], [0], [1], [0, 0, 1, 1], [], []>} : vector<8x32xbf16>, vector<32x32xbf16>, vector<8x32xf32> -> vector<8x32xf32>
    %cst_13 = arith.constant 0.353553385 : f32
    %31 = vector.broadcast %cst_13 : f32 to vector<8x32xf32>
    %32 = arith.mulf %30, %31 : vector<8x32xf32>
    %33 = arith.truncf %32 : vector<8x32xf32> to vector<8x32xbf16>
    %c0_14 = arith.constant 0 : index
    %c0_15 = arith.constant 0 : index
    %34 = vector.load %arg6[%c0_14, %c0_15] : memref<32x32xbf16, #tpu.memory_space<vmem>>, vector<32x32xbf16>
    %cst_16 = arith.constant dense<0.000000e+00> : vector<8x32xf32>
    %35 = tpu.matmul %28, %34, %cst_16 {dimension_numbers = #tpu.dot_dimension_numbers<[1], [0], [0], [1], [0, 0, 1, 1], [], []>} : vector<8x32xbf16>, vector<32x32xbf16>, vector<8x32xf32> -> vector<8x32xf32>
    %36 = arith.truncf %35 : vector<8x32xf32> to vector<8x32xbf16>
    %c0_17 = arith.constant 0 : index
    %c0_18 = arith.constant 0 : index
    %37 = vector.load %arg7[%c0_17, %c0_18] : memref<32x32xbf16, #tpu.memory_space<vmem>>, vector<32x32xbf16>
    %cst_19 = arith.constant dense<0.000000e+00> : vector<8x32xf32>
    %38 = tpu.matmul %28, %37, %cst_19 {dimension_numbers = #tpu.dot_dimension_numbers<[1], [0], [0], [1], [0, 0, 1, 1], [], []>} : vector<8x32xbf16>, vector<32x32xbf16>, vector<8x32xf32> -> vector<8x32xf32>
    %39 = arith.truncf %38 : vector<8x32xf32> to vector<8x32xbf16>
    %40 = vector.extract_strided_slice %33 {offsets = [0, 0], sizes = [8, 8], strides = [1, 1]} : vector<8x32xbf16> to vector<8x8xbf16>
    %c0_20 = arith.constant 0 : index
    %c0_21 = arith.constant 0 : index
    %c0_22 = arith.constant 0 : index
    %41 = vector.load %arg19[%c0_20, %c0_21, %c0_22] : memref<4x8x8xbf16, #tpu.memory_space<vmem>>, vector<1x8x8xbf16>
    %42 = vector.shape_cast %41 : vector<1x8x8xbf16> to vector<8x8xbf16>
    %43 = vector.shape_cast %40 : vector<8x8xbf16> to vector<1x8x8xbf16>
    tpu.vector_store %arg19[%c0_20, %c0_21, %c0_22], %43 {strides = array<i32>} : memref<4x8x8xbf16, #tpu.memory_space<vmem>>, vector<1x8x8xbf16>,
    %44 = vector.extract_strided_slice %36 {offsets = [0, 0], sizes = [8, 8], strides = [1, 1]} : vector<8x32xbf16> to vector<8x8xbf16>
    %c0_23 = arith.constant 0 : index
    %45 = arith.index_cast %1 : i32 to index
    %c0_24 = arith.constant 0 : index
    %46 = vector.load %arg17[%c0_23, %45, %c0_24] : memref<4x8x8xbf16, #tpu.memory_space<vmem>>, vector<1x8x8xbf16>
    %47 = vector.shape_cast %46 : vector<1x8x8xbf16> to vector<8x8xbf16>
    %48 = vector.shape_cast %44 : vector<8x8xbf16> to vector<1x8x8xbf16>
    tpu.vector_store %arg17[%c0_23, %45, %c0_24], %48 {strides = array<i32>} : memref<4x8x8xbf16, #tpu.memory_space<vmem>>, vector<1x8x8xbf16>,
    %49 = vector.extract_strided_slice %39 {offsets = [0, 0], sizes = [8, 8], strides = [1, 1]} : vector<8x32xbf16> to vector<8x8xbf16>
    %c0_25 = arith.constant 0 : index
    %50 = arith.index_cast %1 : i32 to index
    %c0_26 = arith.constant 0 : index
    %51 = vector.load %arg18[%c0_25, %50, %c0_26] : memref<4x8x8xbf16, #tpu.memory_space<vmem>>, vector<1x8x8xbf16>
    %52 = vector.shape_cast %51 : vector<1x8x8xbf16> to vector<8x8xbf16>
    %53 = vector.shape_cast %49 : vector<8x8xbf16> to vector<1x8x8xbf16>
    tpu.vector_store %arg18[%c0_25, %50, %c0_26], %53 {strides = array<i32>} : memref<4x8x8xbf16, #tpu.memory_space<vmem>>, vector<1x8x8xbf16>,
    %54 = vector.extract_strided_slice %33 {offsets = [0, 8], sizes = [8, 8], strides = [1, 1]} : vector<8x32xbf16> to vector<8x8xbf16>
    %c1 = arith.constant 1 : index
    %c0_27 = arith.constant 0 : index
    %c0_28 = arith.constant 0 : index
    %55 = vector.load %arg19[%c1, %c0_27, %c0_28] : memref<4x8x8xbf16, #tpu.memory_space<vmem>>, vector<1x8x8xbf16>
    %56 = vector.shape_cast %55 : vector<1x8x8xbf16> to vector<8x8xbf16>
    %57 = vector.shape_cast %54 : vector<8x8xbf16> to vector<1x8x8xbf16>
    tpu.vector_store %arg19[%c1, %c0_27, %c0_28], %57 {strides = array<i32>} : memref<4x8x8xbf16, #tpu.memory_space<vmem>>, vector<1x8x8xbf16>,
    %58 = vector.extract_strided_slice %36 {offsets = [0, 8], sizes = [8, 8], strides = [1, 1]} : vector<8x32xbf16> to vector<8x8xbf16>
    %c1_29 = arith.constant 1 : index
    %59 = arith.index_cast %1 : i32 to index
    %c0_30 = arith.constant 0 : index
    %60 = vector.load %arg17[%c1_29, %59, %c0_30] : memref<4x8x8xbf16, #tpu.memory_space<vmem>>, vector<1x8x8xbf16>
    %61 = vector.shape_cast %60 : vector<1x8x8xbf16> to vector<8x8xbf16>
    %62 = vector.shape_cast %58 : vector<8x8xbf16> to vector<1x8x8xbf16>
    tpu.vector_store %arg17[%c1_29, %59, %c0_30], %62 {strides = array<i32>} : memref<4x8x8xbf16, #tpu.memory_space<vmem>>, vector<1x8x8xbf16>,
    %63 = vector.extract_strided_slice %39 {offsets = [0, 8], sizes = [8, 8], strides = [1, 1]} : vector<8x32xbf16> to vector<8x8xbf16>
    %c1_31 = arith.constant 1 : index
    %64 = arith.index_cast %1 : i32 to index
    %c0_32 = arith.constant 0 : index
    %65 = vector.load %arg18[%c1_31, %64, %c0_32] : memref<4x8x8xbf16, #tpu.memory_space<vmem>>, vector<1x8x8xbf16>
    %66 = vector.shape_cast %65 : vector<1x8x8xbf16> to vector<8x8xbf16>
    %67 = vector.shape_cast %63 : vector<8x8xbf16> to vector<1x8x8xbf16>
    tpu.vector_store %arg18[%c1_31, %64, %c0_32], %67 {strides = array<i32>} : memref<4x8x8xbf16, #tpu.memory_space<vmem>>, vector<1x8x8xbf16>,
    %68 = vector.extract_strided_slice %33 {offsets = [0, 16], sizes = [8, 8], strides = [1, 1]} : vector<8x32xbf16> to vector<8x8xbf16>
    %c2 = arith.constant 2 : index
    %c0_33 = arith.constant 0 : index
    %c0_34 = arith.constant 0 : index
    %69 = vector.load %arg19[%c2, %c0_33, %c0_34] : memref<4x8x8xbf16, #tpu.memory_space<vmem>>, vector<1x8x8xbf16>
    %70 = vector.shape_cast %69 : vector<1x8x8xbf16> to vector<8x8xbf16>
    %71 = vector.shape_cast %68 : vector<8x8xbf16> to vector<1x8x8xbf16>
    tpu.vector_store %arg19[%c2, %c0_33, %c0_34], %71 {strides = array<i32>} : memref<4x8x8xbf16, #tpu.memory_space<vmem>>, vector<1x8x8xbf16>,
    %72 = vector.extract_strided_slice %36 {offsets = [0, 16], sizes = [8, 8], strides = [1, 1]} : vector<8x32xbf16> to vector<8x8xbf16>
    %c2_35 = arith.constant 2 : index
    %73 = arith.index_cast %1 : i32 to index
    %c0_36 = arith.constant 0 : index
    %74 = vector.load %arg17[%c2_35, %73, %c0_36] : memref<4x8x8xbf16, #tpu.memory_space<vmem>>, vector<1x8x8xbf16>
    %75 = vector.shape_cast %74 : vector<1x8x8xbf16> to vector<8x8xbf16>
    %76 = vector.shape_cast %72 : vector<8x8xbf16> to vector<1x8x8xbf16>
    tpu.vector_store %arg17[%c2_35, %73, %c0_36], %76 {strides = array<i32>} : memref<4x8x8xbf16, #tpu.memory_space<vmem>>, vector<1x8x8xbf16>,
    %77 = vector.extract_strided_slice %39 {offsets = [0, 16], sizes = [8, 8], strides = [1, 1]} : vector<8x32xbf16> to vector<8x8xbf16>
    %c2_37 = arith.constant 2 : index
    %78 = arith.index_cast %1 : i32 to index
    %c0_38 = arith.constant 0 : index
    %79 = vector.load %arg18[%c2_37, %78, %c0_38] : memref<4x8x8xbf16, #tpu.memory_space<vmem>>, vector<1x8x8xbf16>
    %80 = vector.shape_cast %79 : vector<1x8x8xbf16> to vector<8x8xbf16>
    %81 = vector.shape_cast %77 : vector<8x8xbf16> to vector<1x8x8xbf16>
    tpu.vector_store %arg18[%c2_37, %78, %c0_38], %81 {strides = array<i32>} : memref<4x8x8xbf16, #tpu.memory_space<vmem>>, vector<1x8x8xbf16>,
    %82 = vector.extract_strided_slice %33 {offsets = [0, 24], sizes = [8, 8], strides = [1, 1]} : vector<8x32xbf16> to vector<8x8xbf16>
    %c3 = arith.constant 3 : index
    %c0_39 = arith.constant 0 : index
    %c0_40 = arith.constant 0 : index
    %83 = vector.load %arg19[%c3, %c0_39, %c0_40] : memref<4x8x8xbf16, #tpu.memory_space<vmem>>, vector<1x8x8xbf16>
    %84 = vector.shape_cast %83 : vector<1x8x8xbf16> to vector<8x8xbf16>
    %85 = vector.shape_cast %82 : vector<8x8xbf16> to vector<1x8x8xbf16>
    tpu.vector_store %arg19[%c3, %c0_39, %c0_40], %85 {strides = array<i32>} : memref<4x8x8xbf16, #tpu.memory_space<vmem>>, vector<1x8x8xbf16>,
    %86 = vector.extract_strided_slice %36 {offsets = [0, 24], sizes = [8, 8], strides = [1, 1]} : vector<8x32xbf16> to vector<8x8xbf16>
    %c3_41 = arith.constant 3 : index
    %87 = arith.index_cast %1 : i32 to index
    %c0_42 = arith.constant 0 : index
    %88 = vector.load %arg17[%c3_41, %87, %c0_42] : memref<4x8x8xbf16, #tpu.memory_space<vmem>>, vector<1x8x8xbf16>
    %89 = vector.shape_cast %88 : vector<1x8x8xbf16> to vector<8x8xbf16>
    %90 = vector.shape_cast %86 : vector<8x8xbf16> to vector<1x8x8xbf16>
    tpu.vector_store %arg17[%c3_41, %87, %c0_42], %90 {strides = array<i32>} : memref<4x8x8xbf16, #tpu.memory_space<vmem>>, vector<1x8x8xbf16>,
    %91 = vector.extract_strided_slice %39 {offsets = [0, 24], sizes = [8, 8], strides = [1, 1]} : vector<8x32xbf16> to vector<8x8xbf16>
    %c3_43 = arith.constant 3 : index
    %92 = arith.index_cast %1 : i32 to index
    %c0_44 = arith.constant 0 : index
    %93 = vector.load %arg18[%c3_43, %92, %c0_44] : memref<4x8x8xbf16, #tpu.memory_space<vmem>>, vector<1x8x8xbf16>
    %94 = vector.shape_cast %93 : vector<1x8x8xbf16> to vector<8x8xbf16>
    %95 = vector.shape_cast %91 : vector<8x8xbf16> to vector<1x8x8xbf16>
    tpu.vector_store %arg18[%c3_43, %92, %c0_44], %95 {strides = array<i32>} : memref<4x8x8xbf16, #tpu.memory_space<vmem>>, vector<1x8x8xbf16>,
    %96 = tpu.iota {dimensions = array<i32: 0>} : vector<8x8xi32>
    %97 = tpu.iota {dimensions = array<i32: 1>} : vector<8x8xi32>
    %98 = arith.cmpi sle, %97, %96 : vector<8x8xi32>
    %c0_45 = arith.constant 0 : index
    %c0_46 = arith.constant 0 : index
    %c0_47 = arith.constant 0 : index
    %99 = vector.load %arg19[%c0_45, %c0_46, %c0_47] : memref<4x8x8xbf16, #tpu.memory_space<vmem>>, vector<4x8x8xbf16>
    %cst_48 = arith.constant 0xFF800000 : f32
    %100 = vector.broadcast %cst_48 : f32 to vector<4x8x1xf32>
    %c0_49 = arith.constant 0 : index
    %c0_50 = arith.constant 0 : index
    %c0_51 = arith.constant 0 : index
    %101 = vector.load %arg21[%c0_49, %c0_50, %c0_51] : memref<4x8x1xf32, #tpu.memory_space<vmem>>, vector<4x8x1xf32>
    tpu.vector_store %arg21[%c0_49, %c0_50, %c0_51], %100 {strides = array<i32>} : memref<4x8x1xf32, #tpu.memory_space<vmem>>, vector<4x8x1xf32>,
    %cst_52 = arith.constant 0.000000e+00 : f32
    %102 = vector.broadcast %cst_52 : f32 to vector<4x8x1xf32>
    %c0_53 = arith.constant 0 : index
    %c0_54 = arith.constant 0 : index
    %c0_55 = arith.constant 0 : index
    %103 = vector.load %arg22[%c0_53, %c0_54, %c0_55] : memref<4x8x1xf32, #tpu.memory_space<vmem>>, vector<4x8x1xf32>
    tpu.vector_store %arg22[%c0_53, %c0_54, %c0_55], %102 {strides = array<i32>} : memref<4x8x1xf32, #tpu.memory_space<vmem>>, vector<4x8x1xf32>,
    %cst_56 = arith.constant 0.000000e+00 : f32
    %104 = vector.broadcast %cst_56 : f32 to vector<4x8x8xf32>
    %c0_57 = arith.constant 0 : index
    %c0_58 = arith.constant 0 : index
    %c0_59 = arith.constant 0 : index
    %105 = vector.load %arg23[%c0_57, %c0_58, %c0_59] : memref<4x8x8xf32, #tpu.memory_space<vmem>>, vector<4x8x8xf32>
    tpu.vector_store %arg23[%c0_57, %c0_58, %c0_59], %104 {strides = array<i32>} : memref<4x8x8xf32, #tpu.memory_space<vmem>>, vector<4x8x8xf32>,
    %c0_i32 = arith.constant 0 : i32
    %106 = arith.subi %arg1, %c0_i32 : i32
    %c1_i32 = arith.constant 1 : i32
    %c1_i32_60 = arith.constant 1 : i32
    %107 = arith.subi %c1_i32, %c1_i32_60 : i32
    %108 = arith.addi %106, %107 : i32
    %c1_i32_61 = arith.constant 1 : i32
    %109 = arith.divsi %108, %c1_i32_61 : i32
    %c1_i32_62 = arith.constant 1 : i32
    %c0_i32_63 = arith.constant 0 : i32
    %c0_i32_64 = arith.constant 0 : i32
    %110 = arith.subi %109, %c0_i32_64 : i32
    %111 = arith.addi %c0_i32_64, %110 : i32
    %c1_i32_65 = arith.constant 1 : i32
    scf.for %arg24 = %c0_i32_64 to %111 step %c1_i32_65  : i32 {
      %226 = arith.muli %arg24, %c1_i32_62 : i32
      %227 = arith.addi %c0_i32_63, %226 : i32
      %c8_i32_137 = arith.constant 8 : i32
      %228 = arith.muli %227, %c8_i32_137 : i32
      %229 = tpu.assume_multiple %228, 8 : i32
      %c0_138 = arith.constant 0 : index
      %230 = arith.index_cast %229 : i32 to index
      %c0_139 = arith.constant 0 : index
      %231 = vector.load %arg17[%c0_138, %230, %c0_139] : memref<4x8x8xbf16, #tpu.memory_space<vmem>>, vector<4x8x8xbf16>
      %c0_140 = arith.constant 0 : index
      %232 = arith.index_cast %229 : i32 to index
      %c0_141 = arith.constant 0 : index
      %233 = vector.load %arg18[%c0_140, %232, %c0_141] : memref<4x8x8xbf16, #tpu.memory_space<vmem>>, vector<4x8x8xbf16>
      "tpu.trace_start"() <{level = 10 : i32, message = "hqd,hkd->hqk"}> : () -> ()
      %cst_142 = arith.constant dense<0.000000e+00> : vector<4x8x8xf32>
      %234 = tpu.matmul %99, %231, %cst_142 {dimension_numbers = #tpu.dot_dimension_numbers<[2], [2], [1], [1], [0, 0, 0, 1, 1, 1], [0], [0]>} : vector<4x8x8xbf16>, vector<4x8x8xbf16>, vector<4x8x8xf32> -> vector<4x8x8xf32>
      "tpu.trace_stop"() : () -> ()
      %c0_143 = arith.constant 0 : index
      %c0_144 = arith.constant 0 : index
      %c0_145 = arith.constant 0 : index
      %235 = vector.load %arg21[%c0_143, %c0_144, %c0_145] : memref<4x8x1xf32, #tpu.memory_space<vmem>>, vector<4x8x1xf32>
      %cst_146 = arith.constant dense<0xFF800000> : vector<4x8xf32>
      %236 = vector.multi_reduction <maximumf>, %234, %cst_146 [2] : vector<4x8x8xf32> to vector<4x8xf32>
      %237 = vector.shape_cast %236 : vector<4x8xf32> to vector<4x8x1xf32>
      %238 = arith.maximumf %235, %237 : vector<4x8x1xf32>
      %239 = arith.subf %235, %238 : vector<4x8x1xf32>
      %240 = math.exp %239 : vector<4x8x1xf32>
      %241 = vector.broadcast %238 : vector<4x8x1xf32> to vector<4x8x8xf32>
      %242 = arith.subf %234, %241 : vector<4x8x8xf32>
      %243 = math.exp %242 : vector<4x8x8xf32>
      %244 = arith.truncf %243 : vector<4x8x8xf32> to vector<4x8x8xbf16>
      %c0_147 = arith.constant 0 : index
      %c0_148 = arith.constant 0 : index
      %c0_149 = arith.constant 0 : index
      %245 = vector.load %arg22[%c0_147, %c0_148, %c0_149] : memref<4x8x1xf32, #tpu.memory_space<vmem>>, vector<4x8x1xf32>
      %246 = arith.mulf %240, %245 : vector<4x8x1xf32>
      %247 = arith.extf %244 : vector<4x8x8xbf16> to vector<4x8x8xf32>
      %cst_150 = arith.constant dense<0.000000e+00> : vector<4x8xf32>
      %248 = vector.multi_reduction <add>, %247, %cst_150 [2] : vector<4x8x8xf32> to vector<4x8xf32>
      %249 = vector.shape_cast %248 : vector<4x8xf32> to vector<4x8x1xf32>
      %250 = arith.addf %246, %249 : vector<4x8x1xf32>
      %c0_151 = arith.constant 0 : index
      %c0_152 = arith.constant 0 : index
      %c0_153 = arith.constant 0 : index
      %251 = vector.load %arg22[%c0_151, %c0_152, %c0_153] : memref<4x8x1xf32, #tpu.memory_space<vmem>>, vector<4x8x1xf32>
      tpu.vector_store %arg22[%c0_151, %c0_152, %c0_153], %250 {strides = array<i32>} : memref<4x8x1xf32, #tpu.memory_space<vmem>>, vector<4x8x1xf32>,
      %c0_154 = arith.constant 0 : index
      %c0_155 = arith.constant 0 : index
      %c0_156 = arith.constant 0 : index
      %252 = vector.load %arg23[%c0_154, %c0_155, %c0_156] : memref<4x8x8xf32, #tpu.memory_space<vmem>>, vector<4x8x8xf32>
      %253 = vector.broadcast %240 : vector<4x8x1xf32> to vector<4x8x8xf32>
      %254 = arith.mulf %253, %252 : vector<4x8x8xf32>
      "tpu.trace_start"() <{level = 10 : i32, message = "hqk,hkd->hqd"}> : () -> ()
      %cst_157 = arith.constant dense<0.000000e+00> : vector<4x8x8xf32>
      %255 = tpu.matmul %244, %233, %cst_157 {dimension_numbers = #tpu.dot_dimension_numbers<[2], [1], [1], [2], [0, 0, 0, 1, 1, 2], [0], [0]>} : vector<4x8x8xbf16>, vector<4x8x8xbf16>, vector<4x8x8xf32> -> vector<4x8x8xf32>
      "tpu.trace_stop"() : () -> ()
      %256 = arith.addf %254, %255 : vector<4x8x8xf32>
      %c0_158 = arith.constant 0 : index
      %c0_159 = arith.constant 0 : index
      %c0_160 = arith.constant 0 : index
      %257 = vector.load %arg23[%c0_158, %c0_159, %c0_160] : memref<4x8x8xf32, #tpu.memory_space<vmem>>, vector<4x8x8xf32>
      tpu.vector_store %arg23[%c0_158, %c0_159, %c0_160], %256 {strides = array<i32>} : memref<4x8x8xf32, #tpu.memory_space<vmem>>, vector<4x8x8xf32>,
      %c0_161 = arith.constant 0 : index
      %c0_162 = arith.constant 0 : index
      %c0_163 = arith.constant 0 : index
      %258 = vector.load %arg21[%c0_161, %c0_162, %c0_163] : memref<4x8x1xf32, #tpu.memory_space<vmem>>, vector<4x8x1xf32>
      tpu.vector_store %arg21[%c0_161, %c0_162, %c0_163], %238 {strides = array<i32>} : memref<4x8x1xf32, #tpu.memory_space<vmem>>, vector<4x8x1xf32>,
    }
    %c0_66 = arith.constant 0 : index
    %112 = arith.index_cast %1 : i32 to index
    %c0_67 = arith.constant 0 : index
    %113 = vector.load %arg17[%c0_66, %112, %c0_67] : memref<4x8x8xbf16, #tpu.memory_space<vmem>>, vector<4x8x8xbf16>
    %c0_68 = arith.constant 0 : index
    %114 = arith.index_cast %1 : i32 to index
    %c0_69 = arith.constant 0 : index
    %115 = vector.load %arg18[%c0_68, %114, %c0_69] : memref<4x8x8xbf16, #tpu.memory_space<vmem>>, vector<4x8x8xbf16>
    "tpu.trace_start"() <{level = 10 : i32, message = "hqd,hkd->hqk"}> : () -> ()
    %cst_70 = arith.constant dense<0.000000e+00> : vector<4x8x8xf32>
    %116 = tpu.matmul %99, %113, %cst_70 {dimension_numbers = #tpu.dot_dimension_numbers<[2], [2], [1], [1], [0, 0, 0, 1, 1, 1], [0], [0]>} : vector<4x8x8xbf16>, vector<4x8x8xbf16>, vector<4x8x8xf32> -> vector<4x8x8xf32>
    %cst_71 = arith.constant 0xFF800000 : f32
    "tpu.trace_stop"() : () -> ()
    %117 = vector.shape_cast %98 : vector<8x8xi1> to vector<1x8x8xi1>
    %118 = vector.broadcast %117 : vector<1x8x8xi1> to vector<4x8x8xi1>
    %119 = vector.broadcast %cst_71 : f32 to vector<4x8x8xf32>
    %120 = arith.select %118, %116, %119 : vector<4x8x8xi1>, vector<4x8x8xf32>
    %c0_72 = arith.constant 0 : index
    %c0_73 = arith.constant 0 : index
    %c0_74 = arith.constant 0 : index
    %121 = vector.load %arg21[%c0_72, %c0_73, %c0_74] : memref<4x8x1xf32, #tpu.memory_space<vmem>>, vector<4x8x1xf32>
    %cst_75 = arith.constant dense<0xFF800000> : vector<4x8xf32>
    %122 = vector.multi_reduction <maximumf>, %120, %cst_75 [2] : vector<4x8x8xf32> to vector<4x8xf32>
    %123 = vector.shape_cast %122 : vector<4x8xf32> to vector<4x8x1xf32>
    %124 = arith.maximumf %121, %123 : vector<4x8x1xf32>
    %125 = arith.subf %121, %124 : vector<4x8x1xf32>
    %126 = math.exp %125 : vector<4x8x1xf32>
    %127 = vector.broadcast %124 : vector<4x8x1xf32> to vector<4x8x8xf32>
    %128 = arith.subf %120, %127 : vector<4x8x8xf32>
    %129 = math.exp %128 : vector<4x8x8xf32>
    %130 = arith.truncf %129 : vector<4x8x8xf32> to vector<4x8x8xbf16>
    %c0_76 = arith.constant 0 : index
    %c0_77 = arith.constant 0 : index
    %c0_78 = arith.constant 0 : index
    %131 = vector.load %arg22[%c0_76, %c0_77, %c0_78] : memref<4x8x1xf32, #tpu.memory_space<vmem>>, vector<4x8x1xf32>
    %132 = arith.mulf %126, %131 : vector<4x8x1xf32>
    %133 = arith.extf %130 : vector<4x8x8xbf16> to vector<4x8x8xf32>
    %cst_79 = arith.constant dense<0.000000e+00> : vector<4x8xf32>
    %134 = vector.multi_reduction <add>, %133, %cst_79 [2] : vector<4x8x8xf32> to vector<4x8xf32>
    %135 = vector.shape_cast %134 : vector<4x8xf32> to vector<4x8x1xf32>
    %136 = arith.addf %132, %135 : vector<4x8x1xf32>
    %c0_80 = arith.constant 0 : index
    %c0_81 = arith.constant 0 : index
    %c0_82 = arith.constant 0 : index
    %137 = vector.load %arg22[%c0_80, %c0_81, %c0_82] : memref<4x8x1xf32, #tpu.memory_space<vmem>>, vector<4x8x1xf32>
    tpu.vector_store %arg22[%c0_80, %c0_81, %c0_82], %136 {strides = array<i32>} : memref<4x8x1xf32, #tpu.memory_space<vmem>>, vector<4x8x1xf32>,
    %c0_83 = arith.constant 0 : index
    %c0_84 = arith.constant 0 : index
    %c0_85 = arith.constant 0 : index
    %138 = vector.load %arg23[%c0_83, %c0_84, %c0_85] : memref<4x8x8xf32, #tpu.memory_space<vmem>>, vector<4x8x8xf32>
    %139 = vector.broadcast %126 : vector<4x8x1xf32> to vector<4x8x8xf32>
    %140 = arith.mulf %139, %138 : vector<4x8x8xf32>
    "tpu.trace_start"() <{level = 10 : i32, message = "hqk,hkd->hqd"}> : () -> ()
    %cst_86 = arith.constant dense<0.000000e+00> : vector<4x8x8xf32>
    %141 = tpu.matmul %130, %115, %cst_86 {dimension_numbers = #tpu.dot_dimension_numbers<[2], [1], [1], [2], [0, 0, 0, 1, 1, 2], [0], [0]>} : vector<4x8x8xbf16>, vector<4x8x8xbf16>, vector<4x8x8xf32> -> vector<4x8x8xf32>
    "tpu.trace_stop"() : () -> ()
    %142 = arith.addf %140, %141 : vector<4x8x8xf32>
    %c0_87 = arith.constant 0 : index
    %c0_88 = arith.constant 0 : index
    %c0_89 = arith.constant 0 : index
    %143 = vector.load %arg23[%c0_87, %c0_88, %c0_89] : memref<4x8x8xf32, #tpu.memory_space<vmem>>, vector<4x8x8xf32>
    tpu.vector_store %arg23[%c0_87, %c0_88, %c0_89], %142 {strides = array<i32>} : memref<4x8x8xf32, #tpu.memory_space<vmem>>, vector<4x8x8xf32>,
    %c0_90 = arith.constant 0 : index
    %c0_91 = arith.constant 0 : index
    %c0_92 = arith.constant 0 : index
    %144 = vector.load %arg21[%c0_90, %c0_91, %c0_92] : memref<4x8x1xf32, #tpu.memory_space<vmem>>, vector<4x8x1xf32>
    tpu.vector_store %arg21[%c0_90, %c0_91, %c0_92], %124 {strides = array<i32>} : memref<4x8x1xf32, #tpu.memory_space<vmem>>, vector<4x8x1xf32>,
    %c0_93 = arith.constant 0 : index
    %c0_94 = arith.constant 0 : index
    %c0_95 = arith.constant 0 : index
    %145 = vector.load %arg23[%c0_93, %c0_94, %c0_95] : memref<4x8x8xf32, #tpu.memory_space<vmem>>, vector<4x8x8xf32>
    %c0_96 = arith.constant 0 : index
    %c0_97 = arith.constant 0 : index
    %c0_98 = arith.constant 0 : index
    %146 = vector.load %arg22[%c0_96, %c0_97, %c0_98] : memref<4x8x1xf32, #tpu.memory_space<vmem>>, vector<4x8x1xf32>
    %147 = tpu.reciprocal %146 {approx = true} : vector<4x8x1xf32> -> vector<4x8x1xf32>
    %148 = vector.broadcast %147 : vector<4x8x1xf32> to vector<4x8x8xf32>
    %149 = arith.mulf %145, %148 : vector<4x8x8xf32>
    %150 = vector.extract_strided_slice %149 {offsets = [0, 0, 0], sizes = [1, 8, 8], strides = [1, 1, 1]} : vector<4x8x8xf32> to vector<1x8x8xf32>
    %151 = vector.shape_cast %150 : vector<1x8x8xf32> to vector<8x8xf32>
    %152 = arith.truncf %151 : vector<8x8xf32> to vector<8x8xbf16>
    %c0_99 = arith.constant 0 : index
    %c0_100 = arith.constant 0 : index
    %153 = vector.load %arg20[%c0_99, %c0_100] : memref<8x32xbf16, #tpu.memory_space<vmem>>, vector<8x8xbf16>
    tpu.vector_store %arg20[%c0_99, %c0_100], %152 {strides = array<i32>} : memref<8x32xbf16, #tpu.memory_space<vmem>>, vector<8x8xbf16>,
    %154 = vector.extract_strided_slice %149 {offsets = [1, 0, 0], sizes = [1, 8, 8], strides = [1, 1, 1]} : vector<4x8x8xf32> to vector<1x8x8xf32>
    %155 = vector.shape_cast %154 : vector<1x8x8xf32> to vector<8x8xf32>
    %156 = arith.truncf %155 : vector<8x8xf32> to vector<8x8xbf16>
    %c0_101 = arith.constant 0 : index
    %c8 = arith.constant 8 : index
    %157 = vector.load %arg20[%c0_101, %c8] : memref<8x32xbf16, #tpu.memory_space<vmem>>, vector<8x8xbf16>
    tpu.vector_store %arg20[%c0_101, %c8], %156 {strides = array<i32>} : memref<8x32xbf16, #tpu.memory_space<vmem>>, vector<8x8xbf16>,
    %158 = vector.extract_strided_slice %149 {offsets = [2, 0, 0], sizes = [1, 8, 8], strides = [1, 1, 1]} : vector<4x8x8xf32> to vector<1x8x8xf32>
    %159 = vector.shape_cast %158 : vector<1x8x8xf32> to vector<8x8xf32>
    %160 = arith.truncf %159 : vector<8x8xf32> to vector<8x8xbf16>
    %c0_102 = arith.constant 0 : index
    %c16 = arith.constant 16 : index
    %161 = vector.load %arg20[%c0_102, %c16] : memref<8x32xbf16, #tpu.memory_space<vmem>>, vector<8x8xbf16>
    tpu.vector_store %arg20[%c0_102, %c16], %160 {strides = array<i32>} : memref<8x32xbf16, #tpu.memory_space<vmem>>, vector<8x8xbf16>,
    %162 = vector.extract_strided_slice %149 {offsets = [3, 0, 0], sizes = [1, 8, 8], strides = [1, 1, 1]} : vector<4x8x8xf32> to vector<1x8x8xf32>
    %163 = vector.shape_cast %162 : vector<1x8x8xf32> to vector<8x8xf32>
    %164 = arith.truncf %163 : vector<8x8xf32> to vector<8x8xbf16>
    %c0_103 = arith.constant 0 : index
    %c24 = arith.constant 24 : index
    %165 = vector.load %arg20[%c0_103, %c24] : memref<8x32xbf16, #tpu.memory_space<vmem>>, vector<8x8xbf16>
    tpu.vector_store %arg20[%c0_103, %c24], %164 {strides = array<i32>} : memref<8x32xbf16, #tpu.memory_space<vmem>>, vector<8x8xbf16>,
    %c0_104 = arith.constant 0 : index
    %c0_105 = arith.constant 0 : index
    %166 = vector.load %arg20[%c0_104, %c0_105] : memref<8x32xbf16, #tpu.memory_space<vmem>>, vector<8x32xbf16>
    %c0_106 = arith.constant 0 : index
    %c0_107 = arith.constant 0 : index
    %167 = vector.load %arg8[%c0_106, %c0_107] : memref<32x32xbf16, #tpu.memory_space<vmem>>, vector<32x32xbf16>
    %cst_108 = arith.constant dense<0.000000e+00> : vector<8x32xf32>
    %168 = tpu.matmul %166, %167, %cst_108 {dimension_numbers = #tpu.dot_dimension_numbers<[1], [0], [0], [1], [0, 0, 1, 1], [], []>} : vector<8x32xbf16>, vector<32x32xbf16>, vector<8x32xf32> -> vector<8x32xf32>
    %c0_109 = arith.constant 0 : index
    %c0_110 = arith.constant 0 : index
    %169 = vector.load %arg9[%c0_109, %c0_110] : memref<1x32xf32, #tpu.memory_space<vmem>>, vector<1x32xf32>
    %170 = vector.broadcast %169 : vector<1x32xf32> to vector<8x32xf32>
    %171 = arith.addf %168, %170 : vector<8x32xf32>
    %172 = arith.addf %3, %171 : vector<8x32xf32>
    %c0_111 = arith.constant 0 : index
    %c0_112 = arith.constant 0 : index
    %173 = vector.load %arg10[%c0_111, %c0_112] : memref<1x32xf32, #tpu.memory_space<vmem>>, vector<1x32xf32>
    %c0_113 = arith.constant 0 : index
    %c0_114 = arith.constant 0 : index
    %174 = vector.load %arg11[%c0_113, %c0_114] : memref<1x32xf32, #tpu.memory_space<vmem>>, vector<1x32xf32>
    %cst_115 = arith.constant dense<0.000000e+00> : vector<8xf32>
    %175 = vector.multi_reduction <add>, %172, %cst_115 [1] : vector<8x32xf32> to vector<8xf32>
    %176 = vector.shape_cast %175 : vector<8xf32> to vector<8x1xf32>
    %cst_116 = arith.constant 3.200000e+01 : f32
    %177 = vector.broadcast %cst_116 : f32 to vector<8x1xf32>
    %178 = arith.divf %176, %177 : vector<8x1xf32>
    %179 = vector.broadcast %178 : vector<8x1xf32> to vector<8x32xf32>
    %180 = arith.subf %172, %179 : vector<8x32xf32>
    %181 = arith.mulf %180, %180 : vector<8x32xf32>
    %cst_117 = arith.constant dense<0.000000e+00> : vector<8xf32>
    %182 = vector.multi_reduction <add>, %181, %cst_117 [1] : vector<8x32xf32> to vector<8xf32>
    %183 = vector.shape_cast %182 : vector<8xf32> to vector<8x1xf32>
    %cst_118 = arith.constant 3.200000e+01 : f32
    %184 = vector.broadcast %cst_118 : f32 to vector<8x1xf32>
    %185 = arith.divf %183, %184 : vector<8x1xf32>
    %186 = vector.broadcast %178 : vector<8x1xf32> to vector<8x32xf32>
    %187 = arith.subf %172, %186 : vector<8x32xf32>
    %188 = vector.broadcast %173 : vector<1x32xf32> to vector<8x32xf32>
    %189 = arith.mulf %188, %187 : vector<8x32xf32>
    %cst_119 = arith.constant 9.99999974E-6 : f32
    %190 = vector.broadcast %cst_119 : f32 to vector<8x1xf32>
    %191 = arith.addf %185, %190 : vector<8x1xf32>
    %192 = math.rsqrt %191 : vector<8x1xf32>
    %193 = vector.broadcast %192 : vector<8x1xf32> to vector<8x32xf32>
    %194 = arith.mulf %189, %193 : vector<8x32xf32>
    %195 = vector.broadcast %174 : vector<1x32xf32> to vector<8x32xf32>
    %196 = arith.addf %194, %195 : vector<8x32xf32>
    %197 = arith.truncf %196 : vector<8x32xf32> to vector<8x32xbf16>
    %c0_120 = arith.constant 0 : index
    %c0_121 = arith.constant 0 : index
    %198 = vector.load %arg12[%c0_120, %c0_121] : memref<32x128xbf16, #tpu.memory_space<vmem>>, vector<32x128xbf16>
    %cst_122 = arith.constant dense<0.000000e+00> : vector<8x128xf32>
    %199 = tpu.matmul %197, %198, %cst_122 {dimension_numbers = #tpu.dot_dimension_numbers<[1], [0], [0], [1], [0, 0, 1, 1], [], []>} : vector<8x32xbf16>, vector<32x128xbf16>, vector<8x128xf32> -> vector<8x128xf32>
    %c0_123 = arith.constant 0 : index
    %c0_124 = arith.constant 0 : index
    %200 = vector.load %arg13[%c0_123, %c0_124] : memref<1x128xf32, #tpu.memory_space<vmem>>, vector<1x128xf32>
    %201 = vector.broadcast %200 : vector<1x128xf32> to vector<8x128xf32>
    %202 = arith.addf %199, %201 : vector<8x128xf32>
    %203 = arith.mulf %202, %202 : vector<8x128xf32>
    %204 = arith.mulf %203, %202 : vector<8x128xf32>
    %cst_125 = arith.constant 5.000000e-01 : f32
    %205 = vector.broadcast %cst_125 : f32 to vector<8x128xf32>
    %206 = arith.mulf %205, %202 : vector<8x128xf32>
    %cst_126 = arith.constant 4.471500e-02 : f32
    %207 = vector.broadcast %cst_126 : f32 to vector<8x128xf32>
    %208 = arith.mulf %207, %204 : vector<8x128xf32>
    %209 = arith.addf %202, %208 : vector<8x128xf32>
    %cst_127 = arith.constant 0.797884583 : f32
    %210 = vector.broadcast %cst_127 : f32 to vector<8x128xf32>
    %211 = arith.mulf %210, %209 : vector<8x128xf32>
    %212 = math.tanh %211 : vector<8x128xf32>
    %cst_128 = arith.constant 1.000000e+00 : f32
    %213 = vector.broadcast %cst_128 : f32 to vector<8x128xf32>
    %214 = arith.addf %213, %212 : vector<8x128xf32>
    %215 = arith.mulf %206, %214 : vector<8x128xf32>
    %216 = arith.truncf %215 : vector<8x128xf32> to vector<8x128xbf16>
    %c0_129 = arith.constant 0 : index
    %c0_130 = arith.constant 0 : index
    %217 = vector.load %arg14[%c0_129, %c0_130] : memref<128x32xbf16, #tpu.memory_space<vmem>>, vector<128x32xbf16>
    %cst_131 = arith.constant dense<0.000000e+00> : vector<8x32xf32>
    %218 = tpu.matmul %216, %217, %cst_131 {dimension_numbers = #tpu.dot_dimension_numbers<[1], [0], [0], [1], [0, 0, 1, 1], [], []>} : vector<8x128xbf16>, vector<128x32xbf16>, vector<8x32xf32> -> vector<8x32xf32>
    %c0_132 = arith.constant 0 : index
    %c0_133 = arith.constant 0 : index
    %219 = vector.load %arg15[%c0_132, %c0_133] : memref<1x32xf32, #tpu.memory_space<vmem>>, vector<1x32xf32>
    %220 = vector.broadcast %219 : vector<1x32xf32> to vector<8x32xf32>
    %221 = arith.addf %218, %220 : vector<8x32xf32>
    %222 = arith.addf %172, %221 : vector<8x32xf32>
    %c0_134 = arith.constant 0 : index
    %c0_135 = arith.constant 0 : index
    %c0_136 = arith.constant 0 : index
    %223 = vector.load %arg16[%c0_134, %c0_135, %c0_136] : memref<1x8x32xf32, #tpu.memory_space<vmem>>, vector<1x8x32xf32>
    %224 = vector.shape_cast %223 : vector<1x8x32xf32> to vector<8x32xf32>
    %225 = vector.shape_cast %222 : vector<8x32xf32> to vector<1x8x32xf32>
    tpu.vector_store %arg16[%c0_134, %c0_135, %c0_136], %225 {strides = array<i32>} : memref<1x8x32xf32, #tpu.memory_space<vmem>>, vector<1x8x32xf32>,
    return
  }
  func.func @transform_0(%arg0: i32, %arg1: i32) -> (i32, i32, i32) {
    %c0_i32 = arith.constant 0 : i32
    %c0_i32_0 = arith.constant 0 : i32
    return %arg0, %arg1, %c0_i32 : i32, i32, i32
  }
  func.func @transform_1(%arg0: i32, %arg1: i32) -> (i32, i32) {
    %c0_i32 = arith.constant 0 : i32
    %c0_i32_0 = arith.constant 0 : i32
    %c0_i32_1 = arith.constant 0 : i32
    return %c0_i32, %c0_i32_0 : i32, i32
  }
  func.func @transform_2(%arg0: i32, %arg1: i32) -> (i32, i32) {
    %c0_i32 = arith.constant 0 : i32
    %c0_i32_0 = arith.constant 0 : i32
    %c0_i32_1 = arith.constant 0 : i32
    return %c0_i32, %c0_i32_0 : i32, i32
  }
  func.func @transform_3(%arg0: i32, %arg1: i32) -> (i32, i32) {
    %c0_i32 = arith.constant 0 : i32
    %c0_i32_0 = arith.constant 0 : i32
    %c0_i32_1 = arith.constant 0 : i32
    return %c0_i32, %c0_i32_0 : i32, i32
  }
  func.func @transform_4(%arg0: i32, %arg1: i32) -> (i32, i32) {
    %c0_i32 = arith.constant 0 : i32
    %c0_i32_0 = arith.constant 0 : i32
    %c0_i32_1 = arith.constant 0 : i32
    return %c0_i32, %c0_i32_0 : i32, i32
  }
  func.func @transform_5(%arg0: i32, %arg1: i32) -> (i32, i32) {
    %c0_i32 = arith.constant 0 : i32
    %c0_i32_0 = arith.constant 0 : i32
    %c0_i32_1 = arith.constant 0 : i32
    return %c0_i32, %c0_i32_0 : i32, i32
  }
  func.func @transform_6(%arg0: i32, %arg1: i32) -> (i32, i32) {
    %c0_i32 = arith.constant 0 : i32
    %c0_i32_0 = arith.constant 0 : i32
    %c0_i32_1 = arith.constant 0 : i32
    return %c0_i32, %c0_i32_0 : i32, i32
  }
  func.func @transform_7(%arg0: i32, %arg1: i32) -> (i32, i32) {
    %c0_i32 = arith.constant 0 : i32
    %c0_i32_0 = arith.constant 0 : i32
    %c0_i32_1 = arith.constant 0 : i32
    return %c0_i32, %c0_i32_0 : i32, i32
  }
  func.func @transform_8(%arg0: i32, %arg1: i32) -> (i32, i32) {
    %c0_i32 = arith.constant 0 : i32
    %c0_i32_0 = arith.constant 0 : i32
    %c0_i32_1 = arith.constant 0 : i32
    return %c0_i32, %c0_i32_0 : i32, i32
  }
  func.func @transform_9(%arg0: i32, %arg1: i32) -> (i32, i32) {
    %c0_i32 = arith.constant 0 : i32
    %c0_i32_0 = arith.constant 0 : i32
    %c0_i32_1 = arith.constant 0 : i32
    return %c0_i32, %c0_i32_0 : i32, i32
  }
  func.func @transform_10(%arg0: i32, %arg1: i32) -> (i32, i32) {
    %c0_i32 = arith.constant 0 : i32
    %c0_i32_0 = arith.constant 0 : i32
    %c0_i32_1 = arith.constant 0 : i32
    return %c0_i32, %c0_i32_0 : i32, i32
  }
  func.func @transform_11(%arg0: i32, %arg1: i32) -> (i32, i32) {
    %c0_i32 = arith.constant 0 : i32
    %c0_i32_0 = arith.constant 0 : i32
    %c0_i32_1 = arith.constant 0 : i32
    return %c0_i32, %c0_i32_0 : i32, i32
  }
  func.func @transform_12(%arg0: i32, %arg1: i32) -> (i32, i32) {
    %c0_i32 = arith.constant 0 : i32
    %c0_i32_0 = arith.constant 0 : i32
    %c0_i32_1 = arith.constant 0 : i32
    return %c0_i32, %c0_i32_0 : i32, i32
  }
  func.func @transform_13(%arg0: i32, %arg1: i32) -> (i32, i32) {
    %c0_i32 = arith.constant 0 : i32
    %c0_i32_0 = arith.constant 0 : i32
    %c0_i32_1 = arith.constant 0 : i32
    return %c0_i32, %c0_i32_0 : i32, i32
  }
  func.func @transform_14(%arg0: i32, %arg1: i32) -> (i32, i32, i32) {
    %c0_i32 = arith.constant 0 : i32
    %c0_i32_0 = arith.constant 0 : i32
    return %arg0, %arg1, %c0_i32 : i32, i32, i32
  }
}

module attributes {stable_mosaic.version = 11 : i64} {
  func.func @transformer_block_kernel(%arg0: i32, %arg1: i32, %arg2: memref<1x8x32xf32, #tpu.memory_space<vmem>>, %arg3: memref<1x32xf32, #tpu.memory_space<vmem>>, %arg4: memref<1x32xf32, #tpu.memory_space<vmem>>, %arg5: memref<32x32xbf16, #tpu.memory_space<vmem>>, %arg6: memref<32x32xbf16, #tpu.memory_space<vmem>>, %arg7: memref<32x32xbf16, #tpu.memory_space<vmem>>, %arg8: memref<32x32xbf16, #tpu.memory_space<vmem>>, %arg9: memref<1x32xf32, #tpu.memory_space<vmem>>, %arg10: memref<1x32xf32, #tpu.memory_space<vmem>>, %arg11: memref<1x32xf32, #tpu.memory_space<vmem>>, %arg12: memref<32x128xbf16, #tpu.memory_space<vmem>>, %arg13: memref<1x128xf32, #tpu.memory_space<vmem>>, %arg14: memref<128x32xbf16, #tpu.memory_space<vmem>>, %arg15: memref<1x32xf32, #tpu.memory_space<vmem>>, %arg16: memref<1x8x32xf32, #tpu.memory_space<vmem>>, %arg17: memref<4x8x8xbf16, #tpu.memory_space<vmem>>, %arg18: memref<4x8x8xbf16, #tpu.memory_space<vmem>>, %arg19: memref<4x8x8xbf16, #tpu.memory_space<vmem>>, %arg20: memref<8x32xbf16, #tpu.memory_space<vmem>>, %arg21: memref<4x8x1xf32, #tpu.memory_space<vmem>>, %arg22: memref<4x8x1xf32, #tpu.memory_space<vmem>>, %arg23: memref<4x8x8xf32, #tpu.memory_space<vmem>>) attributes {dimension_semantics = [#tpu.dimension_semantics<parallel>, #tpu.dimension_semantics<arbitrary>], iteration_bounds = array<i64: 2, 1>, scalar_prefetch = 0 : i64, scratch_operands = 7 : i64, tpu.core_type = #tpu.core_type<tc>, window_params = [{transform_indices = @transform_0, window_bounds = array<i64: 1, 8, 32>}, {pipeline_mode = #tpu.pipeline_mode<synchronous>, transform_indices = @transform_1, window_bounds = array<i64: 1, 32>}, {pipeline_mode = #tpu.pipeline_mode<synchronous>, transform_indices = @transform_2, window_bounds = array<i64: 1, 32>}, {pipeline_mode = #tpu.pipeline_mode<synchronous>, transform_indices = @transform_3, window_bounds = array<i64: 32, 32>}, {pipeline_mode = #tpu.pipeline_mode<synchronous>, transform_indices = @transform_4, window_bounds = array<i64: 32, 32>}, {pipeline_mode = #tpu.pipeline_mode<synchronous>, transform_indices = @transform_5, window_bounds = array<i64: 32, 32>}, {pipeline_mode = #tpu.pipeline_mode<synchronous>, transform_indices = @transform_6, window_bounds = array<i64: 32, 32>}, {pipeline_mode = #tpu.pipeline_mode<synchronous>, transform_indices = @transform_7, window_bounds = array<i64: 1, 32>}, {pipeline_mode = #tpu.pipeline_mode<synchronous>, transform_indices = @transform_8, window_bounds = array<i64: 1, 32>}, {pipeline_mode = #tpu.pipeline_mode<synchronous>, transform_indices = @transform_9, window_bounds = array<i64: 1, 32>}, {pipeline_mode = #tpu.pipeline_mode<synchronous>, transform_indices = @transform_10, window_bounds = array<i64: 32, 128>}, {pipeline_mode = #tpu.pipeline_mode<synchronous>, transform_indices = @transform_11, window_bounds = array<i64: 1, 128>}, {pipeline_mode = #tpu.pipeline_mode<synchronous>, transform_indices = @transform_12, window_bounds = array<i64: 128, 32>}, {pipeline_mode = #tpu.pipeline_mode<synchronous>, transform_indices = @transform_13, window_bounds = array<i64: 1, 32>}, {transform_indices = @transform_14, window_bounds = array<i64: 1, 8, 32>}]} {
    %c8_i32 = arith.constant 8 : i32
    %0 = arith.muli %arg1, %c8_i32 : i32
    %1 = tpu.assume_multiple %0, 8 : i32
    %c0 = arith.constant 0 : index
    %c0_0 = arith.constant 0 : index
    %c0_1 = arith.constant 0 : index
    %2 = vector.load %arg2[%c0, %c0_0, %c0_1] : memref<1x8x32xf32, #tpu.memory_space<vmem>>, vector<1x8x32xf32>
    %3 = vector.shape_cast %2 : vector<1x8x32xf32> to vector<8x32xf32>
    %c0_2 = arith.constant 0 : index
    %c0_3 = arith.constant 0 : index
    %4 = vector.load %arg3[%c0_2, %c0_3] : memref<1x32xf32, #tpu.memory_space<vmem>>, vector<1x32xf32>
    %c0_4 = arith.constant 0 : index
    %c0_5 = arith.constant 0 : index
    %5 = vector.load %arg4[%c0_4, %c0_5] : memref<1x32xf32, #tpu.memory_space<vmem>>, vector<1x32xf32>
    %cst = arith.constant dense<0.000000e+00> : vector<8xf32>
    %6 = vector.multi_reduction <add>, %3, %cst [1] : vector<8x32xf32> to vector<8xf32>
    %7 = vector.shape_cast %6 : vector<8xf32> to vector<8x1xf32>
    %cst_6 = arith.constant 3.200000e+01 : f32
    %8 = vector.broadcast %cst_6 : f32 to vector<8x1xf32>
    %9 = arith.divf %7, %8 : vector<8x1xf32>
    %10 = vector.broadcast %9 : vector<8x1xf32> to vector<8x32xf32>
    %11 = arith.subf %3, %10 : vector<8x32xf32>
    %12 = arith.mulf %11, %11 : vector<8x32xf32>
    %cst_7 = arith.constant dense<0.000000e+00> : vector<8xf32>
    %13 = vector.multi_reduction <add>, %12, %cst_7 [1] : vector<8x32xf32> to vector<8xf32>
    %14 = vector.shape_cast %13 : vector<8xf32> to vector<8x1xf32>
    %cst_8 = arith.constant 3.200000e+01 : f32
    %15 = vector.broadcast %cst_8 : f32 to vector<8x1xf32>
    %16 = arith.divf %14, %15 : vector<8x1xf32>
    %17 = vector.broadcast %9 : vector<8x1xf32> to vector<8x32xf32>
    %18 = arith.subf %3, %17 : vector<8x32xf32>
    %19 = vector.broadcast %4 : vector<1x32xf32> to vector<8x32xf32>
    %20 = arith.mulf %19, %18 : vector<8x32xf32>
    %cst_9 = arith.constant 9.99999974E-6 : f32
    %21 = vector.broadcast %cst_9 : f32 to vector<8x1xf32>
    %22 = arith.addf %16, %21 : vector<8x1xf32>
    %23 = math.rsqrt %22 : vector<8x1xf32>
    %24 = vector.broadcast %23 : vector<8x1xf32> to vector<8x32xf32>
    %25 = arith.mulf %20, %24 : vector<8x32xf32>
    %26 = vector.broadcast %5 : vector<1x32xf32> to vector<8x32xf32>
    %27 = arith.addf %25, %26 : vector<8x32xf32>
    %28 = arith.truncf %27 : vector<8x32xf32> to vector<8x32xbf16>
    %c0_10 = arith.constant 0 : index
    %c0_11 = arith.constant 0 : index
    %29 = vector.load %arg5[%c0_10, %c0_11] : memref<32x32xbf16, #tpu.memory_space<vmem>>, vector<32x32xbf16>
    %cst_12 = arith.constant dense<0.000000e+00> : vector<8x32xf32>
    %30 = tpu.matmul %28, %29, %cst_12 {dimension_numbers = #tpu.dot_dimension_numbers<[1], [0], [0], [1], [0, 0, 1, 1], [], []>} : vector<8x32xbf16>, vector<32x32xbf16>, vector<8x32xf32> -> vector<8x32xf32>
    %cst_13 = arith.constant 0.353553385 : f32
    %31 = vector.broadcast %cst_13 : f32 to vector<8x32xf32>
    %32 = arith.mulf %30, %31 : vector<8x32xf32>
    %33 = arith.truncf %32 : vector<8x32xf32> to vector<8x32xbf16>
    %c0_14 = arith.constant 0 : index
    %c0_15 = arith.constant 0 : index
    %34 = vector.load %arg6[%c0_14, %c0_15] : memref<32x32xbf16, #tpu.memory_space<vmem>>, vector<32x32xbf16>
    %cst_16 = arith.constant dense<0.000000e+00> : vector<8x32xf32>
    %35 = tpu.matmul %28, %34, %cst_16 {dimension_numbers = #tpu.dot_dimension_numbers<[1], [0], [0], [1], [0, 0, 1, 1], [], []>} : vector<8x32xbf16>, vector<32x32xbf16>, vector<8x32xf32> -> vector<8x32xf32>
    %36 = arith.truncf %35 : vector<8x32xf32> to vector<8x32xbf16>
    %c0_17 = arith.constant 0 : index
    %c0_18 = arith.constant 0 : index
    %37 = vector.load %arg7[%c0_17, %c0_18] : memref<32x32xbf16, #tpu.memory_space<vmem>>, vector<32x32xbf16>
    %cst_19 = arith.constant dense<0.000000e+00> : vector<8x32xf32>
    %38 = tpu.matmul %28, %37, %cst_19 {dimension_numbers = #tpu.dot_dimension_numbers<[1], [0], [0], [1], [0, 0, 1, 1], [], []>} : vector<8x32xbf16>, vector<32x32xbf16>, vector<8x32xf32> -> vector<8x32xf32>
    %39 = arith.truncf %38 : vector<8x32xf32> to vector<8x32xbf16>
    %40 = vector.extract_strided_slice %33 {offsets = [0, 0], sizes = [8, 8], strides = [1, 1]} : vector<8x32xbf16> to vector<8x8xbf16>
    %c0_20 = arith.constant 0 : index
    %c0_21 = arith.constant 0 : index
    %c0_22 = arith.constant 0 : index
    %41 = vector.load %arg19[%c0_20, %c0_21, %c0_22] : memref<4x8x8xbf16, #tpu.memory_space<vmem>>, vector<1x8x8xbf16>
    %42 = vector.shape_cast %41 : vector<1x8x8xbf16> to vector<8x8xbf16>
    %43 = vector.shape_cast %40 : vector<8x8xbf16> to vector<1x8x8xbf16>
    tpu.vector_store %arg19[%c0_20, %c0_21, %c0_22], %43 {strides = array<i32>} : memref<4x8x8xbf16, #tpu.memory_space<vmem>>, vector<1x8x8xbf16>,
    %44 = vector.extract_strided_slice %36 {offsets = [0, 0], sizes = [8, 8], strides = [1, 1]} : vector<8x32xbf16> to vector<8x8xbf16>
    %c0_23 = arith.constant 0 : index
    %45 = arith.index_cast %1 : i32 to index
    %c0_24 = arith.constant 0 : index
    %46 = vector.load %arg17[%c0_23, %45, %c0_24] : memref<4x8x8xbf16, #tpu.memory_space<vmem>>, vector<1x8x8xbf16>
    %47 = vector.shape_cast %46 : vector<1x8x8xbf16> to vector<8x8xbf16>
    %48 = vector.shape_cast %44 : vector<8x8xbf16> to vector<1x8x8xbf16>
    tpu.vector_store %arg17[%c0_23, %45, %c0_24], %48 {strides = array<i32>} : memref<4x8x8xbf16, #tpu.memory_space<vmem>>, vector<1x8x8xbf16>,
    %49 = vector.extract_strided_slice %39 {offsets = [0, 0], sizes = [8, 8], strides = [1, 1]} : vector<8x32xbf16> to vector<8x8xbf16>
    %c0_25 = arith.constant 0 : index
    %50 = arith.index_cast %1 : i32 to index
    %c0_26 = arith.constant 0 : index
    %51 = vector.load %arg18[%c0_25, %50, %c0_26] : memref<4x8x8xbf16, #tpu.memory_space<vmem>>, vector<1x8x8xbf16>
    %52 = vector.shape_cast %51 : vector<1x8x8xbf16> to vector<8x8xbf16>
    %53 = vector.shape_cast %49 : vector<8x8xbf16> to vector<1x8x8xbf16>
    tpu.vector_store %arg18[%c0_25, %50, %c0_26], %53 {strides = array<i32>} : memref<4x8x8xbf16, #tpu.memory_space<vmem>>, vector<1x8x8xbf16>,
    %54 = vector.extract_strided_slice %33 {offsets = [0, 8], sizes = [8, 8], strides = [1, 1]} : vector<8x32xbf16> to vector<8x8xbf16>
    %c1 = arith.constant 1 : index
    %c0_27 = arith.constant 0 : index
    %c0_28 = arith.constant 0 : index
    %55 = vector.load %arg19[%c1, %c0_27, %c0_28] : memref<4x8x8xbf16, #tpu.memory_space<vmem>>, vector<1x8x8xbf16>
    %56 = vector.shape_cast %55 : vector<1x8x8xbf16> to vector<8x8xbf16>
    %57 = vector.shape_cast %54 : vector<8x8xbf16> to vector<1x8x8xbf16>
    tpu.vector_store %arg19[%c1, %c0_27, %c0_28], %57 {strides = array<i32>} : memref<4x8x8xbf16, #tpu.memory_space<vmem>>, vector<1x8x8xbf16>,
    %58 = vector.extract_strided_slice %36 {offsets = [0, 8], sizes = [8, 8], strides = [1, 1]} : vector<8x32xbf16> to vector<8x8xbf16>
    %c1_29 = arith.constant 1 : index
    %59 = arith.index_cast %1 : i32 to index
    %c0_30 = arith.constant 0 : index
    %60 = vector.load %arg17[%c1_29, %59, %c0_30] : memref<4x8x8xbf16, #tpu.memory_space<vmem>>, vector<1x8x8xbf16>
    %61 = vector.shape_cast %60 : vector<1x8x8xbf16> to vector<8x8xbf16>
    %62 = vector.shape_cast %58 : vector<8x8xbf16> to vector<1x8x8xbf16>
    tpu.vector_store %arg17[%c1_29, %59, %c0_30], %62 {strides = array<i32>} : memref<4x8x8xbf16, #tpu.memory_space<vmem>>, vector<1x8x8xbf16>,
    %63 = vector.extract_strided_slice %39 {offsets = [0, 8], sizes = [8, 8], strides = [1, 1]} : vector<8x32xbf16> to vector<8x8xbf16>
    %c1_31 = arith.constant 1 : index
    %64 = arith.index_cast %1 : i32 to index
    %c0_32 = arith.constant 0 : index
    %65 = vector.load %arg18[%c1_31, %64, %c0_32] : memref<4x8x8xbf16, #tpu.memory_space<vmem>>, vector<1x8x8xbf16>
    %66 = vector.shape_cast %65 : vector<1x8x8xbf16> to vector<8x8xbf16>
    %67 = vector.shape_cast %63 : vector<8x8xbf16> to vector<1x8x8xbf16>
    tpu.vector_store %arg18[%c1_31, %64, %c0_32], %67 {strides = array<i32>} : memref<4x8x8xbf16, #tpu.memory_space<vmem>>, vector<1x8x8xbf16>,
    %68 = vector.extract_strided_slice %33 {offsets = [0, 16], sizes = [8, 8], strides = [1, 1]} : vector<8x32xbf16> to vector<8x8xbf16>
    %c2 = arith.constant 2 : index
    %c0_33 = arith.constant 0 : index
    %c0_34 = arith.constant 0 : index
    %69 = vector.load %arg19[%c2, %c0_33, %c0_34] : memref<4x8x8xbf16, #tpu.memory_space<vmem>>, vector<1x8x8xbf16>
    %70 = vector.shape_cast %69 : vector<1x8x8xbf16> to vector<8x8xbf16>
    %71 = vector.shape_cast %68 : vector<8x8xbf16> to vector<1x8x8xbf16>
    tpu.vector_store %arg19[%c2, %c0_33, %c0_34], %71 {strides = array<i32>} : memref<4x8x8xbf16, #tpu.memory_space<vmem>>, vector<1x8x8xbf16>,
    %72 = vector.extract_strided_slice %36 {offsets = [0, 16], sizes = [8, 8], strides = [1, 1]} : vector<8x32xbf16> to vector<8x8xbf16>
    %c2_35 = arith.constant 2 : index
    %73 = arith.index_cast %1 : i32 to index
    %c0_36 = arith.constant 0 : index
    %74 = vector.load %arg17[%c2_35, %73, %c0_36] : memref<4x8x8xbf16, #tpu.memory_space<vmem>>, vector<1x8x8xbf16>
    %75 = vector.shape_cast %74 : vector<1x8x8xbf16> to vector<8x8xbf16>
    %76 = vector.shape_cast %72 : vector<8x8xbf16> to vector<1x8x8xbf16>
    tpu.vector_store %arg17[%c2_35, %73, %c0_36], %76 {strides = array<i32>} : memref<4x8x8xbf16, #tpu.memory_space<vmem>>, vector<1x8x8xbf16>,
    %77 = vector.extract_strided_slice %39 {offsets = [0, 16], sizes = [8, 8], strides = [1, 1]} : vector<8x32xbf16> to vector<8x8xbf16>
    %c2_37 = arith.constant 2 : index
    %78 = arith.index_cast %1 : i32 to index
    %c0_38 = arith.constant 0 : index
    %79 = vector.load %arg18[%c2_37, %78, %c0_38] : memref<4x8x8xbf16, #tpu.memory_space<vmem>>, vector<1x8x8xbf16>
    %80 = vector.shape_cast %79 : vector<1x8x8xbf16> to vector<8x8xbf16>
    %81 = vector.shape_cast %77 : vector<8x8xbf16> to vector<1x8x8xbf16>
    tpu.vector_store %arg18[%c2_37, %78, %c0_38], %81 {strides = array<i32>} : memref<4x8x8xbf16, #tpu.memory_space<vmem>>, vector<1x8x8xbf16>,
    %82 = vector.extract_strided_slice %33 {offsets = [0, 24], sizes = [8, 8], strides = [1, 1]} : vector<8x32xbf16> to vector<8x8xbf16>
    %c3 = arith.constant 3 : index
    %c0_39 = arith.constant 0 : index
    %c0_40 = arith.constant 0 : index
    %83 = vector.load %arg19[%c3, %c0_39, %c0_40] : memref<4x8x8xbf16, #tpu.memory_space<vmem>>, vector<1x8x8xbf16>
    %84 = vector.shape_cast %83 : vector<1x8x8xbf16> to vector<8x8xbf16>
    %85 = vector.shape_cast %82 : vector<8x8xbf16> to vector<1x8x8xbf16>
    tpu.vector_store %arg19[%c3, %c0_39, %c0_40], %85 {strides = array<i32>} : memref<4x8x8xbf16, #tpu.memory_space<vmem>>, vector<1x8x8xbf16>,
    %86 = vector.extract_strided_slice %36 {offsets = [0, 24], sizes = [8, 8], strides = [1, 1]} : vector<8x32xbf16> to vector<8x8xbf16>
    %c3_41 = arith.constant 3 : index
    %87 = arith.index_cast %1 : i32 to index
    %c0_42 = arith.constant 0 : index
    %88 = vector.load %arg17[%c3_41, %87, %c0_42] : memref<4x8x8xbf16, #tpu.memory_space<vmem>>, vector<1x8x8xbf16>
    %89 = vector.shape_cast %88 : vector<1x8x8xbf16> to vector<8x8xbf16>
    %90 = vector.shape_cast %86 : vector<8x8xbf16> to vector<1x8x8xbf16>
    tpu.vector_store %arg17[%c3_41, %87, %c0_42], %90 {strides = array<i32>} : memref<4x8x8xbf16, #tpu.memory_space<vmem>>, vector<1x8x8xbf16>,
    %91 = vector.extract_strided_slice %39 {offsets = [0, 24], sizes = [8, 8], strides = [1, 1]} : vector<8x32xbf16> to vector<8x8xbf16>
    %c3_43 = arith.constant 3 : index
    %92 = arith.index_cast %1 : i32 to index
    %c0_44 = arith.constant 0 : index
    %93 = vector.load %arg18[%c3_43, %92, %c0_44] : memref<4x8x8xbf16, #tpu.memory_space<vmem>>, vector<1x8x8xbf16>
    %94 = vector.shape_cast %93 : vector<1x8x8xbf16> to vector<8x8xbf16>
    %95 = vector.shape_cast %91 : vector<8x8xbf16> to vector<1x8x8xbf16>
    tpu.vector_store %arg18[%c3_43, %92, %c0_44], %95 {strides = array<i32>} : memref<4x8x8xbf16, #tpu.memory_space<vmem>>, vector<1x8x8xbf16>,
    %96 = tpu.iota {dimensions = array<i32: 0>} : vector<8x8xi32>
    %97 = tpu.iota {dimensions = array<i32: 1>} : vector<8x8xi32>
    %98 = arith.cmpi sle, %97, %96 : vector<8x8xi32>
    %c0_45 = arith.constant 0 : index
    %c0_46 = arith.constant 0 : index
    %c0_47 = arith.constant 0 : index
    %99 = vector.load %arg19[%c0_45, %c0_46, %c0_47] : memref<4x8x8xbf16, #tpu.memory_space<vmem>>, vector<4x8x8xbf16>
    %cst_48 = arith.constant 0xFF800000 : f32
    %100 = vector.broadcast %cst_48 : f32 to vector<4x8x1xf32>
    %c0_49 = arith.constant 0 : index
    %c0_50 = arith.constant 0 : index
    %c0_51 = arith.constant 0 : index
    %101 = vector.load %arg21[%c0_49, %c0_50, %c0_51] : memref<4x8x1xf32, #tpu.memory_space<vmem>>, vector<4x8x1xf32>
    tpu.vector_store %arg21[%c0_49, %c0_50, %c0_51], %100 {strides = array<i32>} : memref<4x8x1xf32, #tpu.memory_space<vmem>>, vector<4x8x1xf32>,
    %cst_52 = arith.constant 0.000000e+00 : f32
    %102 = vector.broadcast %cst_52 : f32 to vector<4x8x1xf32>
    %c0_53 = arith.constant 0 : index
    %c0_54 = arith.constant 0 : index
    %c0_55 = arith.constant 0 : index
    %103 = vector.load %arg22[%c0_53, %c0_54, %c0_55] : memref<4x8x1xf32, #tpu.memory_space<vmem>>, vector<4x8x1xf32>
    tpu.vector_store %arg22[%c0_53, %c0_54, %c0_55], %102 {strides = array<i32>} : memref<4x8x1xf32, #tpu.memory_space<vmem>>, vector<4x8x1xf32>,
    %cst_56 = arith.constant 0.000000e+00 : f32
    %104 = vector.broadcast %cst_56 : f32 to vector<4x8x8xf32>
    %c0_57 = arith.constant 0 : index
    %c0_58 = arith.constant 0 : index
    %c0_59 = arith.constant 0 : index
    %105 = vector.load %arg23[%c0_57, %c0_58, %c0_59] : memref<4x8x8xf32, #tpu.memory_space<vmem>>, vector<4x8x8xf32>
    tpu.vector_store %arg23[%c0_57, %c0_58, %c0_59], %104 {strides = array<i32>} : memref<4x8x8xf32, #tpu.memory_space<vmem>>, vector<4x8x8xf32>,
    %c0_i32 = arith.constant 0 : i32
    %106 = arith.subi %arg1, %c0_i32 : i32
    %c1_i32 = arith.constant 1 : i32
    %c1_i32_60 = arith.constant 1 : i32
    %107 = arith.subi %c1_i32, %c1_i32_60 : i32
    %108 = arith.addi %106, %107 : i32
    %c1_i32_61 = arith.constant 1 : i32
    %109 = arith.divsi %108, %c1_i32_61 : i32
    %c1_i32_62 = arith.constant 1 : i32
    %c0_i32_63 = arith.constant 0 : i32
    %c0_i32_64 = arith.constant 0 : i32
    %110 = arith.subi %109, %c0_i32_64 : i32
    %111 = arith.addi %c0_i32_64, %110 : i32
    %c1_i32_65 = arith.constant 1 : i32
    scf.for %arg24 = %c0_i32_64 to %111 step %c1_i32_65  : i32 {
      %226 = arith.muli %arg24, %c1_i32_62 : i32
      %227 = arith.addi %c0_i32_63, %226 : i32
      %c8_i32_137 = arith.constant 8 : i32
      %228 = arith.muli %227, %c8_i32_137 : i32
      %229 = tpu.assume_multiple %228, 8 : i32
      %c0_138 = arith.constant 0 : index
      %230 = arith.index_cast %229 : i32 to index
      %c0_139 = arith.constant 0 : index
      %231 = vector.load %arg17[%c0_138, %230, %c0_139] : memref<4x8x8xbf16, #tpu.memory_space<vmem>>, vector<4x8x8xbf16>
      %c0_140 = arith.constant 0 : index
      %232 = arith.index_cast %229 : i32 to index
      %c0_141 = arith.constant 0 : index
      %233 = vector.load %arg18[%c0_140, %232, %c0_141] : memref<4x8x8xbf16, #tpu.memory_space<vmem>>, vector<4x8x8xbf16>
      "tpu.trace_start"() <{level = 10 : i32, message = "hqd,hkd->hqk"}> : () -> ()
      %cst_142 = arith.constant dense<0.000000e+00> : vector<4x8x8xf32>
      %234 = tpu.matmul %99, %231, %cst_142 {dimension_numbers = #tpu.dot_dimension_numbers<[2], [2], [1], [1], [0, 0, 0, 1, 1, 1], [0], [0]>} : vector<4x8x8xbf16>, vector<4x8x8xbf16>, vector<4x8x8xf32> -> vector<4x8x8xf32>
      "tpu.trace_stop"() : () -> ()
      %c0_143 = arith.constant 0 : index
      %c0_144 = arith.constant 0 : index
      %c0_145 = arith.constant 0 : index
      %235 = vector.load %arg21[%c0_143, %c0_144, %c0_145] : memref<4x8x1xf32, #tpu.memory_space<vmem>>, vector<4x8x1xf32>
      %cst_146 = arith.constant dense<0xFF800000> : vector<4x8xf32>
      %236 = vector.multi_reduction <maximumf>, %234, %cst_146 [2] : vector<4x8x8xf32> to vector<4x8xf32>
      %237 = vector.shape_cast %236 : vector<4x8xf32> to vector<4x8x1xf32>
      %238 = arith.maximumf %235, %237 : vector<4x8x1xf32>
      %239 = arith.subf %235, %238 : vector<4x8x1xf32>
      %240 = math.exp %239 : vector<4x8x1xf32>
      %241 = vector.broadcast %238 : vector<4x8x1xf32> to vector<4x8x8xf32>
      %242 = arith.subf %234, %241 : vector<4x8x8xf32>
      %243 = math.exp %242 : vector<4x8x8xf32>
      %244 = arith.truncf %243 : vector<4x8x8xf32> to vector<4x8x8xbf16>
      %c0_147 = arith.constant 0 : index
      %c0_148 = arith.constant 0 : index
      %c0_149 = arith.constant 0 : index
      %245 = vector.load %arg22[%c0_147, %c0_148, %c0_149] : memref<4x8x1xf32, #tpu.memory_space<vmem>>, vector<4x8x1xf32>
      %246 = arith.mulf %240, %245 : vector<4x8x1xf32>
      %247 = arith.extf %244 : vector<4x8x8xbf16> to vector<4x8x8xf32>
      %cst_150 = arith.constant dense<0.000000e+00> : vector<4x8xf32>
      %248 = vector.multi_reduction <add>, %247, %cst_150 [2] : vector<4x8x8xf32> to vector<4x8xf32>
      %249 = vector.shape_cast %248 : vector<4x8xf32> to vector<4x8x1xf32>
      %250 = arith.addf %246, %249 : vector<4x8x1xf32>
      %c0_151 = arith.constant 0 : index
      %c0_152 = arith.constant 0 : index
      %c0_153 = arith.constant 0 : index
      %251 = vector.load %arg22[%c0_151, %c0_152, %c0_153] : memref<4x8x1xf32, #tpu.memory_space<vmem>>, vector<4x8x1xf32>
      tpu.vector_store %arg22[%c0_151, %c0_152, %c0_153], %250 {strides = array<i32>} : memref<4x8x1xf32, #tpu.memory_space<vmem>>, vector<4x8x1xf32>,
      %c0_154 = arith.constant 0 : index
      %c0_155 = arith.constant 0 : index
      %c0_156 = arith.constant 0 : index
      %252 = vector.load %arg23[%c0_154, %c0_155, %c0_156] : memref<4x8x8xf32, #tpu.memory_space<vmem>>, vector<4x8x8xf32>
      %253 = vector.broadcast %240 : vector<4x8x1xf32> to vector<4x8x8xf32>
      %254 = arith.mulf %253, %252 : vector<4x8x8xf32>
      "tpu.trace_start"() <{level = 10 : i32, message = "hqk,hkd->hqd"}> : () -> ()
      %cst_157 = arith.constant dense<0.000000e+00> : vector<4x8x8xf32>
      %255 = tpu.matmul %244, %233, %cst_157 {dimension_numbers = #tpu.dot_dimension_numbers<[2], [1], [1], [2], [0, 0, 0, 1, 1, 2], [0], [0]>} : vector<4x8x8xbf16>, vector<4x8x8xbf16>, vector<4x8x8xf32> -> vector<4x8x8xf32>
      "tpu.trace_stop"() : () -> ()
      %256 = arith.addf %254, %255 : vector<4x8x8xf32>
      %c0_158 = arith.constant 0 : index
      %c0_159 = arith.constant 0 : index
      %c0_160 = arith.constant 0 : index
      %257 = vector.load %arg23[%c0_158, %c0_159, %c0_160] : memref<4x8x8xf32, #tpu.memory_space<vmem>>, vector<4x8x8xf32>
      tpu.vector_store %arg23[%c0_158, %c0_159, %c0_160], %256 {strides = array<i32>} : memref<4x8x8xf32, #tpu.memory_space<vmem>>, vector<4x8x8xf32>,
      %c0_161 = arith.constant 0 : index
      %c0_162 = arith.constant 0 : index
      %c0_163 = arith.constant 0 : index
      %258 = vector.load %arg21[%c0_161, %c0_162, %c0_163] : memref<4x8x1xf32, #tpu.memory_space<vmem>>, vector<4x8x1xf32>
      tpu.vector_store %arg21[%c0_161, %c0_162, %c0_163], %238 {strides = array<i32>} : memref<4x8x1xf32, #tpu.memory_space<vmem>>, vector<4x8x1xf32>,
    }
    %c0_66 = arith.constant 0 : index
    %112 = arith.index_cast %1 : i32 to index
    %c0_67 = arith.constant 0 : index
    %113 = vector.load %arg17[%c0_66, %112, %c0_67] : memref<4x8x8xbf16, #tpu.memory_space<vmem>>, vector<4x8x8xbf16>
    %c0_68 = arith.constant 0 : index
    %114 = arith.index_cast %1 : i32 to index
    %c0_69 = arith.constant 0 : index
    %115 = vector.load %arg18[%c0_68, %114, %c0_69] : memref<4x8x8xbf16, #tpu.memory_space<vmem>>, vector<4x8x8xbf16>
    "tpu.trace_start"() <{level = 10 : i32, message = "hqd,hkd->hqk"}> : () -> ()
    %cst_70 = arith.constant dense<0.000000e+00> : vector<4x8x8xf32>
    %116 = tpu.matmul %99, %113, %cst_70 {dimension_numbers = #tpu.dot_dimension_numbers<[2], [2], [1], [1], [0, 0, 0, 1, 1, 1], [0], [0]>} : vector<4x8x8xbf16>, vector<4x8x8xbf16>, vector<4x8x8xf32> -> vector<4x8x8xf32>
    %cst_71 = arith.constant 0xFF800000 : f32
    "tpu.trace_stop"() : () -> ()
    %117 = vector.shape_cast %98 : vector<8x8xi1> to vector<1x8x8xi1>
    %118 = vector.broadcast %117 : vector<1x8x8xi1> to vector<4x8x8xi1>
    %119 = vector.broadcast %cst_71 : f32 to vector<4x8x8xf32>
    %120 = arith.select %118, %116, %119 : vector<4x8x8xi1>, vector<4x8x8xf32>
    %c0_72 = arith.constant 0 : index
    %c0_73 = arith.constant 0 : index
    %c0_74 = arith.constant 0 : index
    %121 = vector.load %arg21[%c0_72, %c0_73, %c0_74] : memref<4x8x1xf32, #tpu.memory_space<vmem>>, vector<4x8x1xf32>
    %cst_75 = arith.constant dense<0xFF800000> : vector<4x8xf32>
    %122 = vector.multi_reduction <maximumf>, %120, %cst_75 [2] : vector<4x8x8xf32> to vector<4x8xf32>
    %123 = vector.shape_cast %122 : vector<4x8xf32> to vector<4x8x1xf32>
    %124 = arith.maximumf %121, %123 : vector<4x8x1xf32>
    %125 = arith.subf %121, %124 : vector<4x8x1xf32>
    %126 = math.exp %125 : vector<4x8x1xf32>
    %127 = vector.broadcast %124 : vector<4x8x1xf32> to vector<4x8x8xf32>
    %128 = arith.subf %120, %127 : vector<4x8x8xf32>
    %129 = math.exp %128 : vector<4x8x8xf32>
    %130 = arith.truncf %129 : vector<4x8x8xf32> to vector<4x8x8xbf16>
    %c0_76 = arith.constant 0 : index
    %c0_77 = arith.constant 0 : index
    %c0_78 = arith.constant 0 : index
    %131 = vector.load %arg22[%c0_76, %c0_77, %c0_78] : memref<4x8x1xf32, #tpu.memory_space<vmem>>, vector<4x8x1xf32>
    %132 = arith.mulf %126, %131 : vector<4x8x1xf32>
    %133 = arith.extf %130 : vector<4x8x8xbf16> to vector<4x8x8xf32>
    %cst_79 = arith.constant dense<0.000000e+00> : vector<4x8xf32>
    %134 = vector.multi_reduction <add>, %133, %cst_79 [2] : vector<4x8x8xf32> to vector<4x8xf32>
    %135 = vector.shape_cast %134 : vector<4x8xf32> to vector<4x8x1xf32>
    %136 = arith.addf %132, %135 : vector<4x8x1xf32>
    %c0_80 = arith.constant 0 : index
    %c0_81 = arith.constant 0 : index
    %c0_82 = arith.constant 0 : index
    %137 = vector.load %arg22[%c0_80, %c0_81, %c0_82] : memref<4x8x1xf32, #tpu.memory_space<vmem>>, vector<4x8x1xf32>
    tpu.vector_store %arg22[%c0_80, %c0_81, %c0_82], %136 {strides = array<i32>} : memref<4x8x1xf32, #tpu.memory_space<vmem>>, vector<4x8x1xf32>,
    %c0_83 = arith.constant 0 : index
    %c0_84 = arith.constant 0 : index
    %c0_85 = arith.constant 0 : index
    %138 = vector.load %arg23[%c0_83, %c0_84, %c0_85] : memref<4x8x8xf32, #tpu.memory_space<vmem>>, vector<4x8x8xf32>
    %139 = vector.broadcast %126 : vector<4x8x1xf32> to vector<4x8x8xf32>
    %140 = arith.mulf %139, %138 : vector<4x8x8xf32>
    "tpu.trace_start"() <{level = 10 : i32, message = "hqk,hkd->hqd"}> : () -> ()
    %cst_86 = arith.constant dense<0.000000e+00> : vector<4x8x8xf32>
    %141 = tpu.matmul %130, %115, %cst_86 {dimension_numbers = #tpu.dot_dimension_numbers<[2], [1], [1], [2], [0, 0, 0, 1, 1, 2], [0], [0]>} : vector<4x8x8xbf16>, vector<4x8x8xbf16>, vector<4x8x8xf32> -> vector<4x8x8xf32>
    "tpu.trace_stop"() : () -> ()
    %142 = arith.addf %140, %141 : vector<4x8x8xf32>
    %c0_87 = arith.constant 0 : index
    %c0_88 = arith.constant 0 : index
    %c0_89 = arith.constant 0 : index
    %143 = vector.load %arg23[%c0_87, %c0_88, %c0_89] : memref<4x8x8xf32, #tpu.memory_space<vmem>>, vector<4x8x8xf32>
    tpu.vector_store %arg23[%c0_87, %c0_88, %c0_89], %142 {strides = array<i32>} : memref<4x8x8xf32, #tpu.memory_space<vmem>>, vector<4x8x8xf32>,
    %c0_90 = arith.constant 0 : index
    %c0_91 = arith.constant 0 : index
    %c0_92 = arith.constant 0 : index
    %144 = vector.load %arg21[%c0_90, %c0_91, %c0_92] : memref<4x8x1xf32, #tpu.memory_space<vmem>>, vector<4x8x1xf32>
    tpu.vector_store %arg21[%c0_90, %c0_91, %c0_92], %124 {strides = array<i32>} : memref<4x8x1xf32, #tpu.memory_space<vmem>>, vector<4x8x1xf32>,
    %c0_93 = arith.constant 0 : index
    %c0_94 = arith.constant 0 : index
    %c0_95 = arith.constant 0 : index
    %145 = vector.load %arg23[%c0_93, %c0_94, %c0_95] : memref<4x8x8xf32, #tpu.memory_space<vmem>>, vector<4x8x8xf32>
    %c0_96 = arith.constant 0 : index
    %c0_97 = arith.constant 0 : index
    %c0_98 = arith.constant 0 : index
    %146 = vector.load %arg22[%c0_96, %c0_97, %c0_98] : memref<4x8x1xf32, #tpu.memory_space<vmem>>, vector<4x8x1xf32>
    %147 = tpu.reciprocal %146 {approx = true} : vector<4x8x1xf32> -> vector<4x8x1xf32>
    %148 = vector.broadcast %147 : vector<4x8x1xf32> to vector<4x8x8xf32>
    %149 = arith.mulf %145, %148 : vector<4x8x8xf32>
    %150 = vector.extract_strided_slice %149 {offsets = [0, 0, 0], sizes = [1, 8, 8], strides = [1, 1, 1]} : vector<4x8x8xf32> to vector<1x8x8xf32>
    %151 = vector.shape_cast %150 : vector<1x8x8xf32> to vector<8x8xf32>
    %152 = arith.truncf %151 : vector<8x8xf32> to vector<8x8xbf16>
    %c0_99 = arith.constant 0 : index
    %c0_100 = arith.constant 0 : index
    %153 = vector.load %arg20[%c0_99, %c0_100] : memref<8x32xbf16, #tpu.memory_space<vmem>>, vector<8x8xbf16>
    tpu.vector_store %arg20[%c0_99, %c0_100], %152 {strides = array<i32>} : memref<8x32xbf16, #tpu.memory_space<vmem>>, vector<8x8xbf16>,
    %154 = vector.extract_strided_slice %149 {offsets = [1, 0, 0], sizes = [1, 8, 8], strides = [1, 1, 1]} : vector<4x8x8xf32> to vector<1x8x8xf32>
    %155 = vector.shape_cast %154 : vector<1x8x8xf32> to vector<8x8xf32>
    %156 = arith.truncf %155 : vector<8x8xf32> to vector<8x8xbf16>
    %c0_101 = arith.constant 0 : index
    %c8 = arith.constant 8 : index
    %157 = vector.load %arg20[%c0_101, %c8] : memref<8x32xbf16, #tpu.memory_space<vmem>>, vector<8x8xbf16>
    tpu.vector_store %arg20[%c0_101, %c8], %156 {strides = array<i32>} : memref<8x32xbf16, #tpu.memory_space<vmem>>, vector<8x8xbf16>,
    %158 = vector.extract_strided_slice %149 {offsets = [2, 0, 0], sizes = [1, 8, 8], strides = [1, 1, 1]} : vector<4x8x8xf32> to vector<1x8x8xf32>
    %159 = vector.shape_cast %158 : vector<1x8x8xf32> to vector<8x8xf32>
    %160 = arith.truncf %159 : vector<8x8xf32> to vector<8x8xbf16>
    %c0_102 = arith.constant 0 : index
    %c16 = arith.constant 16 : index
    %161 = vector.load %arg20[%c0_102, %c16] : memref<8x32xbf16, #tpu.memory_space<vmem>>, vector<8x8xbf16>
    tpu.vector_store %arg20[%c0_102, %c16], %160 {strides = array<i32>} : memref<8x32xbf16, #tpu.memory_space<vmem>>, vector<8x8xbf16>,
    %162 = vector.extract_strided_slice %149 {offsets = [3, 0, 0], sizes = [1, 8, 8], strides = [1, 1, 1]} : vector<4x8x8xf32> to vector<1x8x8xf32>
    %163 = vector.shape_cast %162 : vector<1x8x8xf32> to vector<8x8xf32>
    %164 = arith.truncf %163 : vector<8x8xf32> to vector<8x8xbf16>
    %c0_103 = arith.constant 0 : index
    %c24 = arith.constant 24 : index
    %165 = vector.load %arg20[%c0_103, %c24] : memref<8x32xbf16, #tpu.memory_space<vmem>>, vector<8x8xbf16>
    tpu.vector_store %arg20[%c0_103, %c24], %164 {strides = array<i32>} : memref<8x32xbf16, #tpu.memory_space<vmem>>, vector<8x8xbf16>,
    %c0_104 = arith.constant 0 : index
    %c0_105 = arith.constant 0 : index
    %166 = vector.load %arg20[%c0_104, %c0_105] : memref<8x32xbf16, #tpu.memory_space<vmem>>, vector<8x32xbf16>
    %c0_106 = arith.constant 0 : index
    %c0_107 = arith.constant 0 : index
    %167 = vector.load %arg8[%c0_106, %c0_107] : memref<32x32xbf16, #tpu.memory_space<vmem>>, vector<32x32xbf16>
    %cst_108 = arith.constant dense<0.000000e+00> : vector<8x32xf32>
    %168 = tpu.matmul %166, %167, %cst_108 {dimension_numbers = #tpu.dot_dimension_numbers<[1], [0], [0], [1], [0, 0, 1, 1], [], []>} : vector<8x32xbf16>, vector<32x32xbf16>, vector<8x32xf32> -> vector<8x32xf32>
    %c0_109 = arith.constant 0 : index
    %c0_110 = arith.constant 0 : index
    %169 = vector.load %arg9[%c0_109, %c0_110] : memref<1x32xf32, #tpu.memory_space<vmem>>, vector<1x32xf32>
    %170 = vector.broadcast %169 : vector<1x32xf32> to vector<8x32xf32>
    %171 = arith.addf %168, %170 : vector<8x32xf32>
    %172 = arith.addf %3, %171 : vector<8x32xf32>
    %c0_111 = arith.constant 0 : index
    %c0_112 = arith.constant 0 : index
    %173 = vector.load %arg10[%c0_111, %c0_112] : memref<1x32xf32, #tpu.memory_space<vmem>>, vector<1x32xf32>
    %c0_113 = arith.constant 0 : index
    %c0_114 = arith.constant 0 : index
    %174 = vector.load %arg11[%c0_113, %c0_114] : memref<1x32xf32, #tpu.memory_space<vmem>>, vector<1x32xf32>
    %cst_115 = arith.constant dense<0.000000e+00> : vector<8xf32>
    %175 = vector.multi_reduction <add>, %172, %cst_115 [1] : vector<8x32xf32> to vector<8xf32>
    %176 = vector.shape_cast %175 : vector<8xf32> to vector<8x1xf32>
    %cst_116 = arith.constant 3.200000e+01 : f32
    %177 = vector.broadcast %cst_116 : f32 to vector<8x1xf32>
    %178 = arith.divf %176, %177 : vector<8x1xf32>
    %179 = vector.broadcast %178 : vector<8x1xf32> to vector<8x32xf32>
    %180 = arith.subf %172, %179 : vector<8x32xf32>
    %181 = arith.mulf %180, %180 : vector<8x32xf32>
    %cst_117 = arith.constant dense<0.000000e+00> : vector<8xf32>
    %182 = vector.multi_reduction <add>, %181, %cst_117 [1] : vector<8x32xf32> to vector<8xf32>
    %183 = vector.shape_cast %182 : vector<8xf32> to vector<8x1xf32>
    %cst_118 = arith.constant 3.200000e+01 : f32
    %184 = vector.broadcast %cst_118 : f32 to vector<8x1xf32>
    %185 = arith.divf %183, %184 : vector<8x1xf32>
    %186 = vector.broadcast %178 : vector<8x1xf32> to vector<8x32xf32>
    %187 = arith.subf %172, %186 : vector<8x32xf32>
    %188 = vector.broadcast %173 : vector<1x32xf32> to vector<8x32xf32>
    %189 = arith.mulf %188, %187 : vector<8x32xf32>
    %cst_119 = arith.constant 9.99999974E-6 : f32
    %190 = vector.broadcast %cst_119 : f32 to vector<8x1xf32>
    %191 = arith.addf %185, %190 : vector<8x1xf32>
    %192 = math.rsqrt %191 : vector<8x1xf32>
    %193 = vector.broadcast %192 : vector<8x1xf32> to vector<8x32xf32>
    %194 = arith.mulf %189, %193 : vector<8x32xf32>
    %195 = vector.broadcast %174 : vector<1x32xf32> to vector<8x32xf32>
    %196 = arith.addf %194, %195 : vector<8x32xf32>
    %197 = arith.truncf %196 : vector<8x32xf32> to vector<8x32xbf16>
    %c0_120 = arith.constant 0 : index
    %c0_121 = arith.constant 0 : index
    %198 = vector.load %arg12[%c0_120, %c0_121] : memref<32x128xbf16, #tpu.memory_space<vmem>>, vector<32x128xbf16>
    %cst_122 = arith.constant dense<0.000000e+00> : vector<8x128xf32>
    %199 = tpu.matmul %197, %198, %cst_122 {dimension_numbers = #tpu.dot_dimension_numbers<[1], [0], [0], [1], [0, 0, 1, 1], [], []>} : vector<8x32xbf16>, vector<32x128xbf16>, vector<8x128xf32> -> vector<8x128xf32>
    %c0_123 = arith.constant 0 : index
    %c0_124 = arith.constant 0 : index
    %200 = vector.load %arg13[%c0_123, %c0_124] : memref<1x128xf32, #tpu.memory_space<vmem>>, vector<1x128xf32>
    %201 = vector.broadcast %200 : vector<1x128xf32> to vector<8x128xf32>
    %202 = arith.addf %199, %201 : vector<8x128xf32>
    %203 = arith.mulf %202, %202 : vector<8x128xf32>
    %204 = arith.mulf %203, %202 : vector<8x128xf32>
    %cst_125 = arith.constant 5.000000e-01 : f32
    %205 = vector.broadcast %cst_125 : f32 to vector<8x128xf32>
    %206 = arith.mulf %205, %202 : vector<8x128xf32>
    %cst_126 = arith.constant 4.471500e-02 : f32
    %207 = vector.broadcast %cst_126 : f32 to vector<8x128xf32>
    %208 = arith.mulf %207, %204 : vector<8x128xf32>
    %209 = arith.addf %202, %208 : vector<8x128xf32>
    %cst_127 = arith.constant 0.797884583 : f32
    %210 = vector.broadcast %cst_127 : f32 to vector<8x128xf32>
    %211 = arith.mulf %210, %209 : vector<8x128xf32>
    %212 = math.tanh %211 : vector<8x128xf32>
    %cst_128 = arith.constant 1.000000e+00 : f32
    %213 = vector.broadcast %cst_128 : f32 to vector<8x128xf32>
    %214 = arith.addf %213, %212 : vector<8x128xf32>
    %215 = arith.mulf %206, %214 : vector<8x128xf32>
    %216 = arith.truncf %215 : vector<8x128xf32> to vector<8x128xbf16>
    %c0_129 = arith.constant 0 : index
    %c0_130 = arith.constant 0 : index
    %217 = vector.load %arg14[%c0_129, %c0_130] : memref<128x32xbf16, #tpu.memory_space<vmem>>, vector<128x32xbf16>
    %cst_131 = arith.constant dense<0.000000e+00> : vector<8x32xf32>
    %218 = tpu.matmul %216, %217, %cst_131 {dimension_numbers = #tpu.dot_dimension_numbers<[1], [0], [0], [1], [0, 0, 1, 1], [], []>} : vector<8x128xbf16>, vector<128x32xbf16>, vector<8x32xf32> -> vector<8x32xf32>
    %c0_132 = arith.constant 0 : index
    %c0_133 = arith.constant 0 : index
    %219 = vector.load %arg15[%c0_132, %c0_133] : memref<1x32xf32, #tpu.memory_space<vmem>>, vector<1x32xf32>
    %220 = vector.broadcast %219 : vector<1x32xf32> to vector<8x32xf32>
    %221 = arith.addf %218, %220 : vector<8x32xf32>
    %222 = arith.addf %172, %221 : vector<8x32xf32>
    %c0_134 = arith.constant 0 : index
    %c0_135 = arith.constant 0 : index
    %c0_136 = arith.constant 0 : index
    %223 = vector.load %arg16[%c0_134, %c0_135, %c0_136] : memref<1x8x32xf32, #tpu.memory_space<vmem>>, vector<1x8x32xf32>
    %224 = vector.shape_cast %223 : vector<1x8x32xf32> to vector<8x32xf32>
    %225 = vector.shape_cast %222 : vector<8x32xf32> to vector<1x8x32xf32>
    tpu.vector_store %arg16[%c0_134, %c0_135, %c0_136], %225 {strides = array<i32>} : memref<1x8x32xf32, #tpu.memory_space<vmem>>, vector<1x8x32xf32>,
    return
  }
  func.func @transform_0(%arg0: i32, %arg1: i32) -> (i32, i32, i32) {
    %c0_i32 = arith.constant 0 : i32
    %c0_i32_0 = arith.constant 0 : i32
    return %arg0, %arg1, %c0_i32 : i32, i32, i32
  }
  func.func @transform_1(%arg0: i32, %arg1: i32) -> (i32, i32) {
    %c0_i32 = arith.constant 0 : i32
    %c0_i32_0 = arith.constant 0 : i32
    %c0_i32_1 = arith.constant 0 : i32
    return %c0_i32, %c0_i32_0 : i32, i32
  }
  func.func @transform_2(%arg0: i32, %arg1: i32) -> (i32, i32) {
    %c0_i32 = arith.constant 0 : i32
    %c0_i32_0 = arith.constant 0 : i32
    %c0_i32_1 = arith.constant 0 : i32
    return %c0_i32, %c0_i32_0 : i32, i32
  }
  func.func @transform_3(%arg0: i32, %arg1: i32) -> (i32, i32) {
    %c0_i32 = arith.constant 0 : i32
    %c0_i32_0 = arith.constant 0 : i32
    %c0_i32_1 = arith.constant 0 : i32
    return %c0_i32, %c0_i32_0 : i32, i32
  }
  func.func @transform_4(%arg0: i32, %arg1: i32) -> (i32, i32) {
    %c0_i32 = arith.constant 0 : i32
    %c0_i32_0 = arith.constant 0 : i32
    %c0_i32_1 = arith.constant 0 : i32
    return %c0_i32, %c0_i32_0 : i32, i32
  }
  func.func @transform_5(%arg0: i32, %arg1: i32) -> (i32, i32) {
    %c0_i32 = arith.constant 0 : i32
    %c0_i32_0 = arith.constant 0 : i32
    %c0_i32_1 = arith.constant 0 : i32
    return %c0_i32, %c0_i32_0 : i32, i32
  }
  func.func @transform_6(%arg0: i32, %arg1: i32) -> (i32, i32) {
    %c0_i32 = arith.constant 0 : i32
    %c0_i32_0 = arith.constant 0 : i32
    %c0_i32_1 = arith.constant 0 : i32
    return %c0_i32, %c0_i32_0 : i32, i32
  }
  func.func @transform_7(%arg0: i32, %arg1: i32) -> (i32, i32) {
    %c0_i32 = arith.constant 0 : i32
    %c0_i32_0 = arith.constant 0 : i32
    %c0_i32_1 = arith.constant 0 : i32
    return %c0_i32, %c0_i32_0 : i32, i32
  }
  func.func @transform_8(%arg0: i32, %arg1: i32) -> (i32, i32) {
    %c0_i32 = arith.constant 0 : i32
    %c0_i32_0 = arith.constant 0 : i32
    %c0_i32_1 = arith.constant 0 : i32
    return %c0_i32, %c0_i32_0 : i32, i32
  }
  func.func @transform_9(%arg0: i32, %arg1: i32) -> (i32, i32) {
    %c0_i32 = arith.constant 0 : i32
    %c0_i32_0 = arith.constant 0 : i32
    %c0_i32_1 = arith.constant 0 : i32
    return %c0_i32, %c0_i32_0 : i32, i32
  }
  func.func @transform_10(%arg0: i32, %arg1: i32) -> (i32, i32) {
    %c0_i32 = arith.constant 0 : i32
    %c0_i32_0 = arith.constant 0 : i32
    %c0_i32_1 = arith.constant 0 : i32
    return %c0_i32, %c0_i32_0 : i32, i32
  }
  func.func @transform_11(%arg0: i32, %arg1: i32) -> (i32, i32) {
    %c0_i32 = arith.constant 0 : i32
    %c0_i32_0 = arith.constant 0 : i32
    %c0_i32_1 = arith.constant 0 : i32
    return %c0_i32, %c0_i32_0 : i32, i32
  }
  func.func @transform_12(%arg0: i32, %arg1: i32) -> (i32, i32) {
    %c0_i32 = arith.constant 0 : i32
    %c0_i32_0 = arith.constant 0 : i32
    %c0_i32_1 = arith.constant 0 : i32
    return %c0_i32, %c0_i32_0 : i32, i32
  }
  func.func @transform_13(%arg0: i32, %arg1: i32) -> (i32, i32) {
    %c0_i32 = arith.constant 0 : i32
    %c0_i32_0 = arith.constant 0 : i32
    %c0_i32_1 = arith.constant 0 : i32
    return %c0_i32, %c0_i32_0 : i32, i32
  }
  func.func @transform_14(%arg0: i32, %arg1: i32) -> (i32, i32, i32) {
    %c0_i32 = arith.constant 0 : i32
    %c0_i32_0 = arith.constant 0 : i32
    return %arg0, %arg1, %c0_i32 : i32, i32, i32
  }
}

</mosaic_0001>

<bundles_post_ra>
// kernel: tpu_custom_call.1
= control target key start
LH: loop header
LB: loop body
LE: loop exit
PB: predicated region body
PF: predicated region fallthrough
CT: control target
= control target key end

     0   :  { %s3506_s0 = inlined_call_operand.vmem [shape: f32[2,8,32], index: 0, kind: input, shape index: {}]   ;;  %s3507_s1 = inlined_call_operand.vmem [shape: f32[1,32], index: 1, kind: input, shape index: {}]   ;;  %s3508_s2 = inlined_call_operand.vmem [shape: f32[1,32], index: 2, kind: input, shape index: {}]   ;;  %s3509_s3 = inlined_call_operand.vmem [shape: bf16[32,32], index: 3, kind: input, shape index: {}]   ;;  %s3510_s4 = inlined_call_operand.vmem [shape: bf16[32,32], index: 4, kind: input, shape index: {}]   ;;  %s3511_s5 = inlined_call_operand.vmem [shape: bf16[32,32], index: 5, kind: input, shape index: {}]   ;;  %s3512_s6 = inlined_call_operand.vmem [shape: bf16[32,32], index: 6, kind: input, shape index: {}]   ;;  %s3513_s7 = inlined_call_operand.hbm [shape: f32[1,32], index: 7, kind: input, shape index: {}]   ;;  %s3514_s8 = inlined_call_operand.hbm [shape: f32[1,32], index: 8, kind: input, shape index: {}]   ;;  %s3515_s9 = inlined_call_operand.hbm [shape: f32[1,32], index: 9, kind: input, shape index: {}]   ;;  %s3516_s10 = inlined_call_operand.vmem [shape: bf16[32,128], index: 10, kind: input, shape index: {}]   ;;  %s3517_s11 = inlined_call_operand.vmem [shape: f32[1,128], index: 11, kind: input, shape index: {}]   ;;  %s3518_s12 = inlined_call_operand.vmem [shape: bf16[128,32], index: 12, kind: input, shape index: {}]   ;;  %s3519_s13 = inlined_call_operand.vmem [shape: f32[1,32], index: 13, kind: input, shape index: {}]   ;;  %s3520_s14 = inlined_call_operand.hbm [shape: f32[2,8,32], index: 14, kind: output, shape index: {}]  }
   0x1   :  { %3535 = sst [smem:[#allocation27_spill]] %s3514_s8 }
   0x2   :  { %3536 = sst [smem:[#allocation28_spill]] %s3520_s14 }
   0x3   :  { %19 = vsyncpa [#allocation10], 0 }
   0x4   :  { %20 = vsyncpa [#allocation13], 0 }
   0x5   :  { %21 = vsyncpa [#allocation11], 0 }
   0x6   :  { %23 = vsyncpa [#allocation11 + $0x1], 0  ;;  %s3024_s29 = smov 0   ;;  %s3026_s30 = smov 0  }
   0x7   :  { %s3028_s15 = smov 0   ;;  %s3030_s16 = smov 0  }
   0x8   :  { %s3032_s17 = smov 0   ;;  %s3034_s18 = smov 0  }
   0x9 LB: > { %3537 = sst [smem:[#allocation19_spill]] %s2913_s29  ;;  %s2385_s19 = sadd.s32 4294967295, %s2933_s18   ;;  %s2933_s18 = sphi %s3034_s18, %s29_s18   ;;  %s2929_s17 = sphi %s3032_s17, %s3564_s17   ;;  %s2925_s16 = sphi %s3030_s16, %s3563_s16   ;;  %s2921_s15 = sphi %s3028_s15, %s3567_s15   ;;  %s2917_s30 = sphi %s3026_s30, %s3566_s30   ;;  %s2913_s29 = sphi %s3024_s29, %s3565_s29  }
   0xa   : > { %3538 = sst [smem:[#allocation20_spill]] %s2921_s15  ;;  %s2386_s20 = sadd.s32 4294967294, %s2933_s18  }
   0xb   : > { %3539 = sst [smem:[#allocation21_spill]] %s2929_s17  ;;  %s41_s21 = sadd.s32 1, %s2929_s17 }
   0xc   : > { %3540 = sst [smem:[#allocation22_spill]] %s2933_s18  ;;  %s351_s22 = sadd.s32 1, %s2921_s15 }
   0xd   : > { %p43_p0 = scmp.ge.s32.totalorder %s41_s21, 2  ;;  %p361_p1 = scmp.ne.s32.totalorder %s2921_s15, %s2917_s30 }
   0xe   : > { %p362_p2 = scmp.eq.s32.totalorder %s2385_s19, 1  ;;  %p367_p3 = scmp.ne.s32.totalorder %s2917_s30, %s2913_s29 }
   0xf   : > { %s3569_s21 = smov (%p43_p0, %s41_s21), 0  ;;  %p368_p5 = scmp.eq.s32.totalorder %s2386_s20, 1 }
  0x10   : > { %3541 = sst [smem:[#allocation23_spill]] %s3569_s21  ;;  %p3064_p4 = por %p362_p2, %p361_p1 }
  0x11   : > { %s346_s24 = ssub.s32 %s2929_s17, %s3569_s21  ;;  %p2387_p6 = scmp.ge.s32.totalorder %s2933_s18, 1 }
  0x12   : > { %s3542_s23 = scalar_select %p3064_p4, 1, 0 }
  0x13   : > { %p349_p7 = scmp.eq.s32.totalorder %s346_s24, 0  ;;  %p3071_p8 = por %p368_p5, %p367_p3 }
  0x14   : > { %3543 = sst [smem:[#allocation24_spill]] %s3542_s23  ;;  %p375_p9 = scmp.lt.s32.totalorder %s2933_s18, 3 }
  0x15   : > { %s3544_s25 = scalar_select %p3071_p8, 1, 0 }
  0x16   : > { %s3077_s26 = scalar_select %p349_p7, %s2921_s15, %s351_s22  }
  0x17   : > { %3545 = sst [smem:[#allocation25_spill]] %s3544_s25  ;;  %p3079_p10 = pnand %p2387_p6, %p375_p9 }
  0x18   : > { %3546 = sst [smem:[#allocation26_spill]] %s3077_s26  ;;  %p3083_p11 = scmp.eq.s32.totalorder %s2385_s19, 0 }
  0x19   : > { %s3547_s27 = scalar_select %p3079_p10, 1, 0 }
  0x1a   : > { %s3548_s28 = scalar_select %p3083_p11, 1, 0 }
  0x1b   : > { %p2631_p12 = pneg %p3079_p10  ;;  %s2935_s20 = smov [#allocation12]  }
  0x1c   : > { %s417_s24 = sshll.u32 %s2935_s20, 4  ;;  %s2936_s22 = smov [#allocation9]   ;;  %s418_s24 = int_to_ptr.vmem [resolvable:$true] %s417_s24 }
  0x1d   : > { %p3091_p13 = pnand %p3083_p11, %p2631_p12  ;;  %s406_s17 = sshll.u32 %s2936_s22, 4  ;;  %s3095_s17 = int_to_ptr.vmem [resolvable:$true] %s406_s17 }
  0x1e   : > { %s3550_s8 = sld [smem:[#allocation27_spill]] }
  0x1f   : > { %p3105_p1 = pneg %p3091_p13 }
  0x24   : > { %s2763_s15 = scalar_lea.hbm %s3550_s8, 16 }
  0x25   : > { %p2764_p0 = scmp.ne.s32.totalorder %s3550_s8, %s2763_s15  ;;  %p2770_p5 = scmp.lt.u32.totalorder %s2763_s15, %s3550_s8 }
  0x27   : > { %p2766_p2 = pnand %p3105_p1, %p2764_p0 }
  0x29   : > { %p2767_p3 = pneg %p2766_p2 }
  0x2b   : > { %p2772_p6 = pnand %p2770_p5, %p2767_p3 }
  0x2d   : > { %2775 = shalt.err (!%p2772_p6)
}
  0x2e   : > { %s2776_s26 = scalar_lea.vmem %s418_s24, 16  ;;  %s2783_s29 = scalar_lea.vmem %s418_s24, 32 }
  0x2f   : > { %p2777_p7 = scmp.ne.s32.totalorder %s418_s24, %s2776_s26  ;;  %p2784_p8 = scmp.lt.s32.totalorder %s418_s24, %s418_s24 }
  0x30   : > { %p2785_p4 = scmp.lt.s32.totalorder %s2783_s29, %s2776_s26 }
  0x31   : > { %p2779_p9 = pnand %p2777_p7, %p3105_p1 }
  0x32   : > { %p2786_p11 = por %p2785_p4, %p2784_p8 }
  0x33   : > { %p2780_p12 = pneg %p2779_p9 }
  0x35   : > { %p2787_p10 = pnand %p2786_p11, %p2780_p12 }
  0x37   : > { %2790 = shalt.err (!%p2787_p10)
}
  0x38   : > { %2637 = dma.hbm_to_vmem [thread:$0]  (!%p3091_p13), %s3550_s8, 16, %s418_s24, [#allocation13]  }
  0x39   : > { %s2791_s22 = scalar_lea.hbm %s3513_s7, 16 }
  0x3a   : > { %p2792_p0 = scmp.ne.s32.totalorder %s3513_s7, %s2791_s22  ;;  %p2798_p8 = scmp.lt.u32.totalorder %s2791_s22, %s3513_s7 }
  0x3c   : > { %p2794_p2 = pnand %p2792_p0, %p3105_p1 }
  0x3e   : > { %p2795_p4 = pneg %p2794_p2 }
  0x40   : > { %p2800_p10 = pnand %p2798_p8, %p2795_p4 }
  0x42   : > { %2803 = shalt.err (!%p2800_p10)
}
  0x43   : > { %s2804_s24 = scalar_lea.vmem %s3095_s17, 16  ;;  %s2811_s14 = scalar_lea.vmem %s3095_s17, 32 }
  0x44   : > { %p2805_p11 = scmp.ne.s32.totalorder %s3095_s17, %s2804_s24  ;;  %p2812_p6 = scmp.lt.s32.totalorder %s3095_s17, %s3095_s17 }
  0x45   : > { %p2813_p7 = scmp.lt.s32.totalorder %s2811_s14, %s2804_s24 }
  0x46   : > { %p2807_p3 = pnand %p2805_p11, %p3105_p1 }
  0x47   : > { %p2814_p9 = por %p2813_p7, %p2812_p6 }
  0x48   : > { %p2808_p5 = pneg %p2807_p3 }
  0x4a   : > { %p2815_p12 = pnand %p2814_p9, %p2808_p5 }
  0x4c   : > { %2818 = shalt.err (!%p2815_p12)
}
  0x4d   : > { %2634 = dma.hbm_to_vmem [thread:$0]  (!%p3091_p13), %s3513_s7, 16, %s3095_s17, [#allocation10]  }
  0x4e   : > { %s2937_s19 = smov [#allocation14]   ;;  %s2819_s26 = scalar_lea.hbm %s3515_s9, 16 }
  0x4f   : > { %s428_s15 = sshll.u32 %s2937_s19, 4  ;;  %p2820_p0 = scmp.ne.s32.totalorder %s3515_s9, %s2819_s26  ;;  %s429_s15 = int_to_ptr.vmem [resolvable:$true] %s428_s15 }
  0x50   : > { %p2826_p8 = scmp.lt.u32.totalorder %s2819_s26, %s3515_s9 }
  0x51   : > { %p2822_p2 = pnand %p2820_p0, %p3105_p1 }
  0x53   : > { %p2823_p4 = pneg %p2822_p2 }
  0x55   : > { %p2828_p10 = pnand %p2826_p8, %p2823_p4 }
  0x57   : > { %2831 = shalt.err (!%p2828_p10)
}
  0x58   : > { %s2832_s17 = scalar_lea.vmem %s429_s15, 16  ;;  %s2839_s23 = scalar_lea.vmem %s429_s15, 32 }
  0x59   : > { %p2833_p11 = scmp.ne.s32.totalorder %s429_s15, %s2832_s17  ;;  %p2840_p6 = scmp.lt.s32.totalorder %s429_s15, %s429_s15 }
  0x5a   : > { %p2841_p7 = scmp.lt.s32.totalorder %s2839_s23, %s2832_s17 }
  0x5b   : > { %p2835_p3 = pnand %p2833_p11, %p3105_p1 }
  0x5c   : > { %p2842_p9 = por %p2841_p7, %p2840_p6 }
  0x5d   : > { %p2836_p5 = pneg %p2835_p3 }
  0x5f   : > { %p2843_p12 = pnand %p2842_p9, %p2836_p5 }
  0x61   : > { %2846 = shalt.err (!%p2843_p12)
}
  0x62   : > { %2640 = dma.hbm_to_vmem [thread:$0]  (!%p3091_p13), %s3515_s9, 16, %s429_s15, [#allocation13]  }
  0x63   : > { %p3552_p0 = scmp.ne.s32.totalorder %s3547_s27, 0 }
  0x64   : > { %p3553_p2 = scmp.ne.s32.totalorder (!%p3552_p0), %s3548_s28, 0 }
  0x65   : > { %463 = sbr.rel (%p3552_p0) target bundleno = 2716 (0xa9c), region = 76 }
  0x6c   : > { %2900 = dma.done.wait (%p3553_p2), [#allocation10], 16  }
  0x6d   : > { %2902 = vsyncadd (%p3553_p2), [#allocation10], 4294967280 }
  0x6e   : > { %2904 = dma.done.wait (%p3553_p2), [#allocation13], 32  }
  0x6f   : > { %2906 = vsyncadd (%p3553_p2), [#allocation13], 4294967264  ;;  %p519_p1 = scmp.lt.s32.totalorder %s2925_s16, 1  ;;  %vm531_vm0 = vcmask 261120   ;;  %v2715_v7 = vld [vmem:[%s3509_s3] sm:$0xff]   ;;  %v2938_v8 = vmov 0.0   ;;  %v809_v60 = vlaneseq }
  0x70   : > { %2509 = vmatprep.subr.bf16.mxu0 %v2938_v8  ;;  %vm2939_vm1 = vmmov 0   ;;  %v2716_v9 = vld [vmem:[%s3509_s3 + $0x8] sm:$0xff]   ;;  %2533 = vmatprep.subr.bf16.mxu1 %v2938_v8  ;;  %v2398_v13 = vld [vmem:[%s3507_s1] ss:$0 sm:$0xff]  ;;  %vm827_vm2 = vcmask 64512   ;;  %vm736_vm3 = vcmask 60416  }
  0x71   : > { %s520_s8 = scalar_select %p519_p1, %s2925_s16, 1  ;;  %2513 = vmatprep.mubr.msk.bf16.mxu0 %vm2939_vm1, %v2938_v8  ;;  %2510 = vmatpush3.bf16.msra.mxu0 %v2715_v7  ;;  %v2399_v16 = vld [vmem:[%s3508_s2] ss:$0 sm:$0xff]  ;;  %v2718_v21 = vld [vmem:[%s3510_s4 + $0x8] sm:$0xff]   ;;  %828 = vst.msk [vmem:[#allocation8] sm:$0xff] %vm827_vm2, %v2938_v8  ;;  %829 = vst.msk [vmem:[#allocation8 + $0x8] sm:$0xff] %vm827_vm2, %v2938_v8 }
  0x72   : > { %2511 = vmatprep.subr.bf16.mxu0 %v2938_v8  ;;  %2535 = vmatprep.mubr.msk.bf16.mxu1 %vm2939_vm1, %v2938_v8  ;;  %v2717_v19 = vld [vmem:[%s3510_s4] sm:$0xff]   ;;  %v2720_v23 = vld [vmem:[%s3511_s5 + $0x8] sm:$0xff]   ;;  %830 = vst.msk [vmem:[#allocation8 + $0x10] sm:$0xff] %vm827_vm2, %v2938_v8  ;;  %831 = vst.msk [vmem:[#allocation8 + $0x18] sm:$0xff] %vm827_vm2, %v2938_v8  ;;  %s2940_s28 = smov 120   ;;  %s2941_s18 = smov 112  }
  0x73   : > { %s2397_s21 = sshll.u32 %s520_s8, 3  ;;  %v2719_v22 = vld [vmem:[%s3511_s5] sm:$0xff]   ;;  %s2942_s22 = smov 104   ;;  %vm1691_vm4 = vcmask 1043456   ;;  %v810_v61 = vshrl.u32 %v809_v60, 7  ;;  %v812_v62 = vand.u32 127, %v809_v60 }
  0x74   : > { %s525_s15 = scalar_lea.vmem %s3506_s0, %s2397_s21  ;;  %vm818_vm6 = vcmask 7168   ;;  %v2943_v63 = vmov -inf   ;;  %v2944_v7 = vmov 0   ;;  %s2945_s17 = smov 8   ;;  %vm1930_vm7 = vcmask 126016  }
  0x75   : > { %v3178_v0 = vld [vmem:[%s525_s15] sm:$0xff]  ;;  %2512 = vmatpush3.bf16.msra.mxu0 %v2716_v9  ;;  %vm813_vm5 = vcmp.le.s32.totalorder %v812_v62, %v810_v61  ;;  %819 = vst.msk [vmem:[#allocation6] sm:$0xff] %vm818_vm6, %v2943_v63  ;;  %820 = vst.msk [vmem:[#allocation6 + $0x8] sm:$0xff] %vm818_vm6, %v2943_v63  ;;  %2713 = vset.pattern.permute.xlu0 %v2944_v7  ;;  %s2946_s23 = smov 16   ;;  %s2947_s25 = smov 24   ;;  %vm1939_vm8 = vcmask 191616  }
  0x76   : > { %v532_v1 = vsel %vm531_vm0, %v3178_v0, 0.0  ;;  %2517 = vmatprep.subr.bf16.mxu0 %v2938_v8  ;;  %821 = vst.msk [vmem:[#allocation6 + $0x10] sm:$0xff] %vm818_vm6, %v2943_v63  ;;  %822 = vst.msk [vmem:[#allocation6 + $0x18] sm:$0xff] %vm818_vm6, %v2943_v63  ;;  %2714 = vset.pattern.permute.xlu1 %v2944_v7  ;;  %vm1948_vm9 = vcmask 257216   ;;  %s3554_s29 = sld [smem:[#allocation24_spill]]  ;;  %s2460_s24 = sshll.u32 %s2925_s16, 7 }
  0x77   : > { %533 = vadd.xlane.f32.xlu0 %v532_v1  ;;  %823 = vst.msk [vmem:[#allocation7] sm:$0xff] %vm818_vm6, %v2938_v8  ;;  %824 = vst.msk [vmem:[#allocation7 + $0x8] sm:$0xff] %vm818_vm6, %v2938_v8  ;;  %s3555_s19 = sld [smem:[#allocation28_spill]]  ;;  %s2948_s20 = smov [#allocation15]  }
  0x78   : > { %825 = vst.msk [vmem:[#allocation7 + $0x10] sm:$0xff] %vm818_vm6, %v2938_v8  ;;  %826 = vst.msk [vmem:[#allocation7 + $0x18] sm:$0xff] %vm818_vm6, %v2938_v8  ;;  %s2851_s27 = sshll.u32 %s2948_s20, 4  ;;  %s2852_s27 = int_to_ptr.vmem [resolvable:$false] %s2851_s27 }
  0x79   : > { %s2853_s15 = scalar_lea.vmem %s2852_s27, 256 }
  0x7c   : > { %p3556_p4 = scmp.ne.s32.totalorder %s3554_s29, 0 }
  0x7d   : > { %s3458_s8 = scalar_lea.hbm %s3555_s19, %s2460_s24 }
 0x104   : > { %v534_v2 = vpop.xlane.xlu0 %533 }
 0x105   : > { %v536_v3 = vmul.f32 0.03125, %v534_v2 }
 0x107   : > { %v537_v4 = vsub.f32 %v3178_v0, %v536_v3 }
 0x109   : > { %v538_v5 = vmul.f32 %v537_v4, %v537_v4  ;;  %v549_v14 = vmul.f32 %v2398_v13, %v537_v4 }
 0x10b   : > { %v539_v6 = vsel %vm531_vm0, %v538_v5, 0.0 }
 0x10c   : > { %540 = vadd.xlane.f32.xlu0 %v539_v6 }
 0x199   : > { %v541_v10 = vpop.xlane.xlu0 %540 }
 0x19a   : > { %v542_v11 = vmul.f32 0.03125, %v541_v10 }
 0x19c   : > { %v550_v12 = vadd.f32 1e-05, %v542_v11 }
 0x19e   : > { %2733 = vrsqrt.f32 %v550_v12 }
 0x1a8   : > { %v2734_v15 = vpop.eup %2733 }
 0x1a9   : > { %v552_v17 = vmul.f32 %v2734_v15, %v549_v14 }
 0x1ab   : > { %v559_v18 = vadd.f32 %v2399_v16, %v552_v17 }
 0x1ad   : > { %v560_v20 = vpack.c.bf16 %v559_v18, %v559_v18 }
 0x1af   : > { %2514 = vmatmul.mubr.msk.bf16.vlgmr.msra.gmra.mrb[0].mxu0 %vm531_vm0, %v560_v20 }
 0x1b0   : > { %2518 = vmatpush3.bf16.msra.mxu0 %v2717_v19  ;;  %2521 = vmatprep.mubr.msk.bf16.mxu0 %vm2939_vm1, %v2938_v8 }
 0x1b1   : > { %2519 = vmatprep.subr.bf16.mxu0 %v2938_v8 }
 0x1b4   : > { %2520 = vmatpush3.bf16.msra.mxu0 %v2718_v21 }
 0x1b5   : > { %2525 = vmatprep.subr.bf16.mxu0 %v2938_v8 }
 0x1b7   : > { %2522 = vmatmul.mubr.msk.bf16.vlgmr.msra.gmra.mrb[4].mxu0 %vm531_vm0, %v560_v20 }
 0x1b8   : > { %2526 = vmatpush3.bf16.msra.mxu0 %v2719_v22  ;;  %2529 = vmatprep.mubr.msk.bf16.mxu0 %vm2939_vm1, %v2938_v8 }
 0x1b9   : > { %2527 = vmatprep.subr.bf16.mxu0 %v2938_v8 }
 0x1bc   : > { %2528 = vmatpush3.bf16.msra.mxu0 %v2720_v23 }
 0x1bd   : > { %2539 = vmatprep.subr.bf16.mxu0 %v2938_v8 }
 0x1bf   : > { %2530 = vmatmul.mubr.msk.bf16.vlgmr.msra.gmra.mrb[8].mxu0 %vm531_vm0, %v560_v20 }
 0x1c0   : > { %2541 = vmatprep.mubr.msk.bf16.mxu0 %vm2939_vm1, %v2938_v8 }
 0x282   : > { %v614_v24 = vpop.f32.mrb[0].mxu0 }
 0x283   : > { %v620_v25 = vmul.f32 0.35355338, %v614_v24  ;;  %v2515_v26 = vpop.f32.mrb[1].mxu0 }
 0x284   : > { %v617_v27 = vpop.f32.mrb[2].mxu0 }
 0x285   : > { %v621_v28 = vpack.c.bf16 %v620_v25, %v620_v25  ;;  %v2516_v29 = vpop.f32.mrb[3].mxu0  ;;  %v3297_v27 = vld [vmem:[#allocation6] sm:$0xff] }
 0x287   : > { %737 = vst.msk [vmem:[#allocation4] sm:$0xf] %vm736_vm3, %v621_v28  ;;  %749 = vrot.lane.b32.xlu0 %v621_v28, %s2940_s28 }
 0x28a   : > { %v672_v30 = vpop.f32.mrb[4].mxu0 }
 0x28b   : > { %v678_v31 = vpack.c.bf16 %v672_v30, %v672_v30  ;;  %v2523_v32 = vpop.f32.mrb[5].mxu0 }
 0x28c   : > { %v675_v33 = vpop.f32.mrb[6].mxu0 }
 0x28d   : > { %742 = vst.msk [vmem:[#allocation2] sm:$0xf] %vm736_vm3, %v678_v31  ;;  %757 = vrot.lane.b32.xlu1 %v678_v31, %s2940_s28  ;;  %v2524_v34 = vpop.f32.mrb[7].mxu0 }
 0x28e   : > { %v814_v42 = vld [vmem:[#allocation4] sm:$0xf]  ;;  %v3312_v34 = vld [vmem:[#allocation6 + $0x10] sm:$0xff] }
 0x291   : > { %778 = vrot.lane.b32.xlu1 %v678_v31, %s2941_s18 }
 0x292   : > { %v729_v35 = vpop.f32.mrb[8].mxu0 }
 0x293   : > { %v3242_v36 = vpack.c.bf16 %v729_v35, %v729_v35  ;;  %v2531_v37 = vpop.f32.mrb[9].mxu0 }
 0x294   : > { %v732_v38 = vpop.f32.mrb[10].mxu0  ;;  %v1362_v39 = vld [vmem:[#allocation2] sm:$0xf] }
 0x295   : > { %745 = vst.msk [vmem:[#allocation3] sm:$0xf] %vm736_vm3, %v3242_v36  ;;  %796 = vrot.lane.b32.xlu1 %v678_v31, %s2942_s22  ;;  %v2532_v40 = vpop.f32.mrb[11].mxu0  ;;  %v1374_v41 = vsel %vm827_vm2, %v1362_v39, 0  ;;  %v3307_v31 = vld [vmem:[#allocation6 + $0x8] sm:$0xff]  ;;  %v3322_v39 = vld [vmem:[#allocation6 + $0x18] sm:$0xff] }
 0x296   : > { %2534 = vmatpush3.bf16.xpose.msra.mxu1 %v1374_v41 }
 0x297   : > { %2545 = vmatprep.subr.bf16.mxu1 %v2938_v8 }
 0x299   : > { %773 = vrot.lane.b32.xlu1 %v621_v28, %s2941_s18 }
 0x29c   : > { %v1366_v56 = vld [vmem:[#allocation3] sm:$0xf] }
 0x29d   : > { %791 = vrot.lane.b32.xlu1 %v621_v28, %s2942_s22  ;;  %2536 = vmatmul.mubr.msk.bf16.vlgmr.msra.gmra.mrb[0].mxu1 %vm827_vm2, %v814_v42  ;;  %v1693_v58 = vsel %vm1691_vm4, %v1366_v56, 0 }
 0x29e   : > { %2547 = vmatprep.mubr.msk.bf16.mxu1 %vm2939_vm1, %v2938_v8 }
 0x2f9   : > { %v750_v43 = vpop.permute.xlu0 %749 }
 0x2fa   : > { %753 = vst.msk [vmem:[#allocation4 + $0x4] sm:$0xf] %vm736_vm3, %v750_v43 }
 0x2ff   : > { %v758_v44 = vpop.permute.xlu1 %757 }
 0x300   : > { %2411 = vst.msk [vmem:[#allocation2 + $0x4] sm:$0xf] %vm736_vm3, %v758_v44 }
 0x301   : > { %v815_v53 = vld [vmem:[#allocation4 + $0x4] sm:$0xf] }
 0x303   : > { %v779_v45 = vpop.permute.xlu1 %778 }
 0x304   : > { %2414 = vst.msk [vmem:[#allocation2 + $0x8] sm:$0xf] %vm736_vm3, %v779_v45 }
 0x307   : > { %v797_v46 = vpop.permute.xlu1 %796  ;;  %v1363_v47 = vld [vmem:[#allocation2 + $0x4] sm:$0xf] }
 0x308   : > { %2416 = vst.msk [vmem:[#allocation2 + $0xc] sm:$0xf] %vm736_vm3, %v797_v46  ;;  %v1420_v48 = vsel %vm827_vm2, %v1363_v47, 0 }
 0x309   : > { %2540 = vmatpush3.bf16.xpose.msra.mxu0 %v1420_v48 }
 0x30a   : > { %2551 = vmatprep.subr.bf16.mxu0 %v2938_v8 }
 0x30b   : > { %v774_v49 = vpop.permute.xlu1 %773  ;;  %v1364_v50 = vld [vmem:[#allocation2 + $0x8] sm:$0xf] }
 0x30c   : > { %777 = vst.msk [vmem:[#allocation4 + $0x8] sm:$0xf] %vm736_vm3, %v774_v49  ;;  %v1466_v51 = vsel %vm827_vm2, %v1364_v50, 0 }
 0x30d   : > { %2546 = vmatpush3.bf16.xpose.msra.mxu1 %v1466_v51 }
 0x30e   : > { %2557 = vmatprep.subr.bf16.mxu1 %v2938_v8 }
 0x30f   : > { %v792_v52 = vpop.permute.xlu1 %791  ;;  %v1365_v54 = vld [vmem:[#allocation2 + $0xc] sm:$0xf] }
 0x310   : > { %795 = vst.msk [vmem:[#allocation4 + $0xc] sm:$0xf] %vm736_vm3, %v792_v52  ;;  %2542 = vmatmul.mubr.msk.bf16.vlgmr.msra.gmra.mrb[12].mxu0 %vm827_vm2, %v815_v53  ;;  %v1512_v55 = vsel %vm827_vm2, %v1365_v54, 0 }
 0x311   : > { %2552 = vmatpush3.bf16.xpose.msra.mxu0 %v1512_v55  ;;  %2553 = vmatprep.mubr.msk.bf16.mxu0 %vm2939_vm1, %v2938_v8 }
 0x312   : > { %2563 = vmatprep.subr.bf16.mxu0 %v2938_v8 }
 0x313   : > { %v816_v57 = vld [vmem:[#allocation4 + $0x8] sm:$0xf] }
 0x314   : > { %2548 = vmatmul.mubr.msk.bf16.vlgmr.msra.gmra.mrb[4].mxu1 %vm827_vm2, %v816_v57 }
 0x315   : > { %2558 = vmatpush3.bf16.msra.mxu1 %v1693_v58  ;;  %2559 = vmatprep.mubr.msk.bf16.mxu1 %vm2939_vm1, %v2938_v8 }
 0x316   : > { %2569 = vmatprep.subr.bf16.mxu1 %v2938_v8 }
 0x317   : > { %v817_v59 = vld [vmem:[#allocation4 + $0xc] sm:$0xf] }
 0x318   : > { %2554 = vmatmul.mubr.msk.bf16.vlgmr.msra.gmra.mrb[16].mxu0 %vm827_vm2, %v817_v59 }
 0x319   : > { %2565 = vmatprep.mubr.msk.bf16.mxu0 %vm2939_vm1, %v2938_v8 }
 0x370   : > { %v1410_v1 = vpop.f32.mrb[0].mxu1 }
 0x371   : > { %v1556_v2 = vsel %vm813_vm5, %v1410_v1, -inf  ;;  %v2537_v3 = vpop.f32.mrb[1].mxu1 }
 0x372   : > { %v1413_v4 = vpop.f32.mrb[2].mxu1  ;;  %v1564_v5 = vsel %vm827_vm2, %v1556_v2, -inf }
 0x373   : > { %1565 = vmax.xlane.f32.xlu1 %v1564_v5  ;;  %v2538_v6 = vpop.f32.mrb[3].mxu1 }
 0x3e3   : > { %v1456_v9 = vpop.f32.mrb[12].mxu0 }
 0x3e4   : > { %v1557_v10 = vsel %vm813_vm5, %v1456_v9, -inf  ;;  %v2543_v11 = vpop.f32.mrb[13].mxu0 }
 0x3e5   : > { %v1459_v12 = vpop.f32.mrb[14].mxu0  ;;  %v1567_v13 = vsel %vm827_vm2, %v1557_v10, -inf }
 0x3e6   : > { %1568 = vmax.xlane.f32.xlu0 %v1567_v13  ;;  %v2544_v14 = vpop.f32.mrb[15].mxu0 }
 0x3e7   : > { %v1502_v15 = vpop.f32.mrb[4].mxu1 }
 0x3e8   : > { %v1558_v16 = vsel %vm813_vm5, %v1502_v15, -inf  ;;  %v2549_v17 = vpop.f32.mrb[5].mxu1 }
 0x3e9   : > { %v1505_v18 = vpop.f32.mrb[6].mxu1  ;;  %v1570_v19 = vsel %vm827_vm2, %v1558_v16, -inf }
 0x3ea   : > { %1571 = vmax.xlane.f32.xlu1 %v1570_v19  ;;  %v2550_v20 = vpop.f32.mrb[7].mxu1 }
 0x3eb   : > { %v1548_v21 = vpop.f32.mrb[16].mxu0 }
 0x3ec   : > { %v1559_v22 = vsel %vm813_vm5, %v1548_v21, -inf  ;;  %v2555_v23 = vpop.f32.mrb[17].mxu0 }
 0x3ed   : > { %v1551_v24 = vpop.f32.mrb[18].mxu0  ;;  %v1573_v25 = vsel %vm827_vm2, %v1559_v22, -inf }
 0x3ee   : > { %1574 = vmax.xlane.f32.xlu1 %v1573_v25  ;;  %v2556_v26 = vpop.f32.mrb[19].mxu0 }
 0x400   : > { %v1566_v28 = vpop.xlane.xlu1 %1565 }
 0x401   : > { %v3300_v29 = vmax.f32 %v3297_v27, %v1566_v28 }
 0x403   : > { %v1580_v30 = vsub.f32 %v3297_v27, %v3300_v29  ;;  %1881 = vst.msk [vmem:[#allocation6] sm:$0xff] %vm818_vm6, %v3300_v29  ;;  %1594 = vperm.xlu0 %2713, %v3300_v29  }
 0x473   : > { %v1569_v32 = vpop.xlane.xlu0 %1568 }
 0x474   : > { %v3310_v33 = vmax.f32 %v3307_v31, %v1569_v32  ;;  %v1584_v32 = vmul.f32 1.442695, %v1580_v30 }
 0x476   : > { %v1581_v35 = vsub.f32 %v3307_v31, %v3310_v33  ;;  %1882 = vst.msk [vmem:[#allocation6 + $0x8] sm:$0xff] %vm818_vm6, %v3310_v33  ;;  %1599 = vperm.xlu1 %2714, %v3310_v33  }
 0x477   : > { %v1572_v37 = vpop.xlane.xlu1 %1571 }
 0x478   : > { %v3320_v38 = vmax.f32 %v3312_v34, %v1572_v37  ;;  %v1586_v20 = vmul.f32 1.442695, %v1581_v35  ;;  %v1630_v37 = vld [vmem:[#allocation7 + $0x10] sm:$0xff] }
 0x47a   : > { %v1582_v40 = vsub.f32 %v3312_v34, %v3320_v38  ;;  %1883 = vst.msk [vmem:[#allocation6 + $0x10] sm:$0xff] %vm818_vm6, %v3320_v38  ;;  %1604 = vperm.xlu1 %2714, %v3320_v38   ;;  %v1629_v34 = vld [vmem:[#allocation7 + $0x8] sm:$0xff]  ;;  %v1628_v38 = vld [vmem:[#allocation7] sm:$0xff] }
 0x47b   : > { %v1575_v41 = vpop.xlane.xlu1 %1574 }
 0x47c   : > { %v3330_v42 = vmax.f32 %v3322_v39, %v1575_v41  ;;  %v1588_v15 = vmul.f32 1.442695, %v1582_v40 }
 0x47e   : > { %v1583_v43 = vsub.f32 %v3322_v39, %v3330_v42  ;;  %1884 = vst.msk [vmem:[#allocation6 + $0x18] sm:$0xff] %vm818_vm6, %v3330_v42  ;;  %1609 = vperm.xlu1 %2714, %v3330_v42  }
 0x480   : > { %v1590_v19 = vmul.f32 1.442695, %v1583_v43 }
 0x482   : > { %v1595_v44 = vpop.permute.xlu0 %1594  ;;  %767 = vrot.lane.b32.xlu1 %v3242_v36, %s2940_s28  ;;  %s516_s28 = sand.u32 1, %s2917_s30  }
 0x483   : > { %v1612_v45 = vsub.f32 %v1556_v2, %v1595_v44  ;;  %v1631_v44 = vld [vmem:[#allocation7 + $0x18] sm:$0xff]  ;;  %s2238_s16 = scalar_lea.sflag [#allocation11], %s516_s28 }
 0x485   : > { %v1616_v46 = vmul.f32 1.442695, %v1612_v45 }
 0x486   : > { %785 = vrot.lane.b32.xlu1 %v3242_v36, %s2941_s18  ;;  %s2396_s18 = sshll.u32 %s516_s28, 3 }
 0x487   : > { %2735 = vpow2.f32 %v1616_v46  ;;  %s518_s14 = scalar_lea.vmem [#allocation15], %s2396_s18 }
 0x48a   : > { %803 = vrot.lane.b32.xlu1 %v3242_v36, %s2942_s22 }
 0x491   : > { %v2736_v47 = vpop.eup %2735 }
 0x492   : > { %v1624_v48 = vpack.c.bf16 %v2736_v47, %v2736_v47 }
 0x494   : > { %2560 = vmatmul.mubr.msk.bf16.vlgmr.msra.gmra.mrb[8].mxu1 %vm827_vm2, %v1624_v48  ;;  %v1636_v4 = vunpack.c.l.bf16 %v1624_v48 }
 0x495   : > { %2571 = vmatprep.mubr.msk.bf16.mxu1 %vm2939_vm1, %v2938_v8 }
 0x4f5   : > { %v1600_v49 = vpop.permute.xlu1 %1599 }
 0x4f6   : > { %v1613_v50 = vsub.f32 %v1557_v10, %v1600_v49  ;;  %v1640_v10 = vsel %vm827_vm2, %v1636_v4, 0.0 }
 0x4f8   : > { %v1618_v51 = vmul.f32 1.442695, %v1613_v50 }
 0x4f9   : > { %v1605_v52 = vpop.permute.xlu1 %1604 }
 0x4fa   : > { %2737 = vpow2.f32 %v1618_v51  ;;  %v1614_v53 = vsub.f32 %v1558_v16, %v1605_v52 }
 0x4fc   : > { %v1620_v54 = vmul.f32 1.442695, %v1614_v53 }
 0x4fd   : > { %v1610_v55 = vpop.permute.xlu1 %1609 }
 0x4fe   : > { %2739 = vpow2.f32 %v1620_v54  ;;  %v1615_v56 = vsub.f32 %v1559_v22, %v1610_v55  ;;  %v1661_v55 = vld [vmem:[#allocation8 + $0x8] sm:$0xff] }
 0x500   : > { %v1622_v57 = vmul.f32 1.442695, %v1615_v56 }
 0x501   : > { %v768_v58 = vpop.permute.xlu1 %767 }
 0x502   : > { %2741 = vpow2.f32 %v1622_v57  ;;  %2413 = vst.msk [vmem:[#allocation3 + $0x4] sm:$0xf] %vm736_vm3, %v768_v58  ;;  %v1662_v58 = vld [vmem:[#allocation8 + $0x10] sm:$0xff] }
 0x503   : > { %2743 = vpow2.f32 %v1588_v15 }
 0x504   : > { %v2738_v36 = vpop.eup %2737  ;;  %2745 = vpow2.f32 %v1590_v19 }
 0x505   : > { %v1625_v59 = vpack.c.bf16 %v2738_v36, %v2738_v36  ;;  %v786_v60 = vpop.permute.xlu1 %785  ;;  %2747 = vpow2.f32 %v1586_v20  ;;  %v2722_v20 = vld [vmem:[%s3512_s6 + $0x8] sm:$0xff]  }
 0x506   : > { %2415 = vst.msk [vmem:[#allocation3 + $0x8] sm:$0xf] %vm736_vm3, %v786_v60  ;;  %2749 = vpow2.f32 %v1584_v32 }
 0x507   : > { %v1637_v61 = vunpack.c.l.bf16 %v1625_v59 }
 0x508   : > { %v2740_v62 = vpop.eup %2739 }
 0x509   : > { %v1626_v63 = vpack.c.bf16 %v2740_v62, %v2740_v62  ;;  %v804_v1 = vpop.permute.xlu1 %803  ;;  %v1643_v2 = vsel %vm827_vm2, %v1637_v61, 0.0  ;;  %v1367_v3 = vld [vmem:[#allocation3 + $0x4] sm:$0xf] }
 0x50a   : > { %2417 = vst.msk [vmem:[#allocation3 + $0xc] sm:$0xf] %vm736_vm3, %v804_v1  ;;  %1644 = vadd.xlane.f32.xlu1 %v1643_v2  ;;  %v1739_v5 = vsel %vm1691_vm4, %v1367_v3, 0  ;;  %v1663_v3 = vld [vmem:[#allocation8 + $0x18] sm:$0xff] }
 0x50b   : > { %2564 = vmatpush3.bf16.msra.mxu0 %v1739_v5  ;;  %v1638_v6 = vunpack.c.l.bf16 %v1626_v63 }
 0x50c   : > { %v2742_v7 = vpop.eup %2741  ;;  %2575 = vmatprep.subr.bf16.mxu0 %v2938_v8 }
 0x50d   : > { %v1627_v9 = vpack.c.bf16 %v2742_v7, %v2742_v7  ;;  %v1646_v11 = vsel %vm827_vm2, %v1638_v6, 0.0  ;;  %v1368_v12 = vld [vmem:[#allocation3 + $0x8] sm:$0xf]  ;;  %v2744_v21 = vpop.eup %2743 }
 0x50e   : > { %1641 = vadd.xlane.f32.xlu1 %v1640_v10  ;;  %1647 = vadd.xlane.f32.xlu0 %v1646_v11  ;;  %v1785_v13 = vsel %vm1691_vm4, %v1368_v12, 0  ;;  %v2746_v22 = vpop.eup %2745  ;;  %v1634_v40 = vmul.f32 %v2744_v21, %v1630_v37 }
 0x50f   : > { %2566 = vmatmul.mubr.msk.bf16.vlgmr.msra.gmra.mrb[20].mxu0 %vm827_vm2, %v1625_v59  ;;  %2570 = vmatpush3.bf16.msra.mxu1 %v1785_v13  ;;  %v1639_v14 = vunpack.c.l.bf16 %v1627_v9  ;;  %v2748_v23 = vpop.eup %2747  ;;  %v1635_v27 = vmul.f32 %v2746_v22, %v1631_v44 }
 0x510   : > { %2577 = vmatprep.mubr.msk.bf16.mxu0 %vm2939_vm1, %v2938_v8  ;;  %2581 = vmatprep.subr.bf16.mxu1 %v2938_v8  ;;  %v1633_v31 = vmul.f32 %v2748_v23, %v1629_v34  ;;  %v2750_v33 = vpop.eup %2749 }
 0x511   : > { %v1649_v16 = vsel %vm827_vm2, %v1639_v14, 0.0  ;;  %v1369_v17 = vld [vmem:[#allocation3 + $0xc] sm:$0xf]  ;;  %v1632_v41 = vmul.f32 %v2750_v33, %v1628_v38 }
 0x512   : > { %1650 = vadd.xlane.f32.xlu0 %v1649_v16  ;;  %2572 = vmatmul.mubr.msk.bf16.vlgmr.msra.gmra.mrb[12].mxu1 %vm827_vm2, %v1626_v63  ;;  %v1831_v18 = vsel %vm1691_vm4, %v1369_v17, 0 }
 0x513   : > { %2576 = vmatpush3.bf16.msra.mxu0 %v1831_v18  ;;  %2585 = vmatprep.mubr.msk.bf16.mxu1 %vm2939_vm1, %v2938_v8  ;;  %v2721_v18 = vld [vmem:[%s3512_s6] sm:$0xff]  }
 0x514   : > { %2589 = vmatprep.subr.bf16.mxu0 %v2938_v8  ;;  %2582 = vmatpush3.bf16.msra.mxu1 %v2721_v18 }
 0x515   : > { %2583 = vmatprep.subr.bf16.mxu1 %v2938_v8 }
 0x517   : > { %2578 = vmatmul.mubr.msk.bf16.vlgmr.msra.gmra.mrb[24].mxu0 %vm827_vm2, %v1627_v9 }
 0x518   : > { %2593 = vmatprep.mubr.msk.bf16.mxu0 %vm2939_vm1, %v2938_v8  ;;  %2584 = vmatpush3.bf16.msra.mxu1 %v2722_v20 }
 0x519   : > { %2597 = vmatprep.subr.bf16.mxu1 %v2938_v8 }
 0x51f   : > { %1676 = vperm.xlu1 %2714, %v2744_v21  }
 0x523   : > { %1681 = vperm.xlu1 %2714, %v2746_v22  }
 0x528   : > { %1671 = vperm.xlu0 %2713, %v2748_v23  }
 0x567   : > { %v3374_v24 = vpop.f32.mrb[8].mxu1 }
 0x568   : > { %v2561_v25 = vpop.f32.mrb[9].mxu1 }
 0x569   : > { %v1732_v26 = vpop.f32.mrb[10].mxu1 }
 0x56a   : > { %v2562_v28 = vpop.f32.mrb[11].mxu1  ;;  %v1660_v26 = vld [vmem:[#allocation8] sm:$0xff] }
 0x597   : > { %v1645_v35 = vpop.xlane.xlu1 %1644 }
 0x598   : > { %v1653_v39 = vadd.f32 %v1645_v35, %v1633_v31 }
 0x59a   : > { %1657 = vst.msk [vmem:[#allocation7 + $0x8] sm:$0xff] %vm818_vm6, %v1653_v39 }
 0x59b   : > { %v1648_v42 = vpop.xlane.xlu0 %1647  ;;  %v1642_v43 = vpop.xlane.xlu1 %1641 }
 0x59c   : > { %v1654_v45 = vadd.f32 %v1648_v42, %v1634_v40  ;;  %v1652_v46 = vadd.f32 %v1642_v43, %v1632_v41 }
 0x59e   : > { %1658 = vst.msk [vmem:[#allocation7 + $0x10] sm:$0xff] %vm818_vm6, %v1654_v45  ;;  %1656 = vst.msk [vmem:[#allocation7] sm:$0xff] %vm818_vm6, %v1652_v46  ;;  %v2440_v46 = vld [vmem:[#allocation9] ss:$0 sm:$0xff] }
 0x59f   : > { %v1651_v29 = vpop.xlane.xlu0 %1650  ;;  %v1677_v57 = vpop.permute.xlu1 %1676 }
 0x5a0   : > { %v1655_v30 = vadd.f32 %v1651_v29, %v1635_v27  ;;  %v1686_v62 = vmul.f32 %v1677_v57, %v1662_v58  ;;  %v2725_v57 = vld [vmem:[%s3518_s12] sm:$0xff]  }
 0x5a1   : > { %v1890_v47 = vld [vmem:[#allocation7 + $0x8] sm:$0xff] }
 0x5a2   : > { %1659 = vst.msk [vmem:[#allocation7 + $0x18] sm:$0xff] %vm818_vm6, %v1655_v30  ;;  %2751 = vrcp.f32 %v1890_v47 }
 0x5a3   : > { %v1682_v4 = vpop.permute.xlu1 %1681 }
 0x5a4   : > { %v1687_v10 = vmul.f32 %v1682_v4, %v1663_v3  ;;  %v2726_v4 = vld [vmem:[%s3518_s12 + $0x8] sm:$0xff]  }
 0x5a5   : > { %v1891_v48 = vld [vmem:[#allocation7 + $0x10] sm:$0xff]  ;;  %v1889_v50 = vld [vmem:[#allocation7] sm:$0xff] }
 0x5a6   : > { %2753 = vrcp.f32 %v1891_v48 }
 0x5a7   : > { %v1672_v56 = vpop.permute.xlu0 %1671 }
 0x5a8   : > { %v1685_v36 = vmul.f32 %v1672_v56, %v1661_v55  ;;  %v2723_v56 = vld [vmem:[%s3516_s10] sm:$0xff]  }
 0x5a9   : > { %v1892_v49 = vld [vmem:[#allocation7 + $0x18] sm:$0xff]  ;;  %2590 = vmatpush3.bf16.msra.mxu0 %v2723_v56 }
 0x5aa   : > { %2755 = vrcp.f32 %v1892_v49  ;;  %2591 = vmatprep.subr.bf16.mxu0 %v2938_v8 }
 0x5ab   : > { %2757 = vrcp.f32 %v1889_v50 }
 0x5ac   : > { %v2752_v51 = vpop.eup %2751 }
 0x5ad   : > { %1904 = vperm.xlu0 %2713, %v2752_v51  }
 0x5b0   : > { %v2754_v52 = vpop.eup %2753 }
 0x5b1   : > { %1909 = vperm.xlu1 %2714, %v2754_v52  }
 0x5b4   : > { %v2756_v53 = vpop.eup %2755 }
 0x5b5   : > { %1666 = vperm.xlu1 %2714, %v2750_v33   ;;  %1914 = vperm.xlu0 %2713, %v2756_v53   ;;  %v2758_v54 = vpop.eup %2757 }
 0x5b9   : > { %1899 = vperm.xlu0 %2713, %v2758_v54  }
 0x5e2   : > { %v1775_v59 = vpop.f32.mrb[20].mxu0 }
 0x5e3   : > { %v1874_v60 = vadd.f32 %v1775_v59, %v1685_v36  ;;  %v2567_v61 = vpop.f32.mrb[21].mxu0 }
 0x5e4   : > { %v1778_v63 = vpop.f32.mrb[22].mxu0 }
 0x5e5   : > { %1878 = vst.msk [vmem:[#allocation8 + $0x8] sm:$0xff] %vm827_vm2, %v1874_v60  ;;  %v2568_v1 = vpop.f32.mrb[23].mxu0  ;;  %v1821_v2 = vpop.f32.mrb[12].mxu1  ;;  %v2444_v60 = vld [vmem:[#allocation12] ss:$0 sm:$0xff] }
 0x5e6   : > { %v1875_v5 = vadd.f32 %v1821_v2, %v1686_v62  ;;  %v2573_v6 = vpop.f32.mrb[13].mxu1  ;;  %v2445_v63 = vld [vmem:[#allocation14] ss:$0 sm:$0xff] }
 0x5e7   : > { %v1824_v7 = vpop.f32.mrb[14].mxu1  ;;  %v2728_v6 = vld [vmem:[%s3518_s12 + $0x18] sm:$0xff]  }
 0x5e8   : > { %1879 = vst.msk [vmem:[#allocation8 + $0x10] sm:$0xff] %vm827_vm2, %v1875_v5  ;;  %v2574_v9 = vpop.f32.mrb[15].mxu1  ;;  %v2727_v5 = vld [vmem:[%s3518_s12 + $0x10] sm:$0xff]   ;;  %v2729_v7 = vld [vmem:[%s3518_s12 + $0x20] sm:$0xff]  }
 0x5e9   : > { %v2730_v9 = vld [vmem:[%s3518_s12 + $0x28] sm:$0xff]  }
 0x5ea   : > { %v1867_v11 = vpop.f32.mrb[24].mxu0 }
 0x5eb   : > { %v1876_v12 = vadd.f32 %v1867_v11, %v1687_v10  ;;  %v2579_v13 = vpop.f32.mrb[25].mxu0  ;;  %v2731_v10 = vld [vmem:[%s3518_s12 + $0x30] sm:$0xff]   ;;  %v2732_v11 = vld [vmem:[%s3518_s12 + $0x38] sm:$0xff]  }
 0x5ec   : > { %v1870_v14 = vpop.f32.mrb[26].mxu0  ;;  %v1886_v17 = vld [vmem:[#allocation8 + $0x8] sm:$0xff] }
 0x5ed   : > { %1880 = vst.msk [vmem:[#allocation8 + $0x18] sm:$0xff] %vm827_vm2, %v1876_v12  ;;  %v2580_v15 = vpop.f32.mrb[27].mxu0  ;;  %v2446_v12 = vld [vmem:[%s3517_s11] ss:$0 sm:$0xff] }
 0x5ef   : > { %v1887_v22 = vld [vmem:[#allocation8 + $0x10] sm:$0xff] }
 0x5f4   : > { %v1888_v34 = vld [vmem:[#allocation8 + $0x18] sm:$0xff] }
 0x62c   : > { %v1905_v16 = vpop.permute.xlu0 %1904 }
 0x62d   : > { %v1918_v19 = vmul.f32 %v1905_v16, %v1886_v17 }
 0x62f   : > { %v2466_v21 = vpack.c.bf16 %v1918_v19, %v1918_v19 }
 0x630   : > { %v1910_v23 = vpop.permute.xlu1 %1909 }
 0x631   : > { %v1919_v25 = vmul.f32 %v1910_v23, %v1887_v22  ;;  %1927 = vrot.lane.b32.xlu1 %v2466_v21, %s2945_s17  ;;  %s2252_s17 = sshll.u32 %s518_s14, 4  ;;  %s3460_s17 = int_to_ptr.vmem [resolvable:$true] %s2252_s17 }
 0x632   : > { %s2847_s21 = scalar_lea.vmem %s3460_s17, 128  ;;  %p2854_p11 = scmp.lt.s32.totalorder %s3460_s17, %s2852_s27 }
 0x633   : > { %v2467_v28 = vpack.c.bf16 %v1919_v25, %v1919_v25  ;;  %p2848_p13 = scmp.ne.s32.totalorder %s3460_s17, %s2847_s21  ;;  %p2855_p3 = scmp.lt.s32.totalorder %s2853_s15, %s2847_s21 }
 0x634   : > { %v1915_v32 = vpop.permute.xlu0 %1914  ;;  %v1667_v31 = vpop.permute.xlu1 %1666 }
 0x635   : > { %v1920_v33 = vmul.f32 %v1915_v32, %v1888_v34  ;;  %v1684_v35 = vmul.f32 %v1667_v31, %v1660_v26  ;;  %1936 = vrot.lane.b32.xlu0 %v2467_v28, %s2946_s23  ;;  %v2450_v32 = vld [vmem:[%s3519_s13] ss:$0 sm:$0xff]  ;;  %p2849_p8 = pnand %p2848_p13, %p3556_p4  ;;  %p2856_p5 = por %p2855_p3, %p2854_p11 }
 0x637   : > { %v2468_v37 = vpack.c.bf16 %v1920_v33, %v1920_v33  ;;  %v1873_v38 = vadd.f32 %v3374_v24, %v1684_v35  ;;  %p2850_p10 = pneg %p2849_p8 }
 0x638   : > { %v1900_v39 = vpop.permute.xlu0 %1899 }
 0x639   : > { %1877 = vst.msk [vmem:[#allocation8] sm:$0xff] %vm827_vm2, %v1873_v38  ;;  %1945 = vrot.lane.b32.xlu1 %v2468_v37, %s2947_s25  ;;  %p2857_p6 = pnand %p2856_p5, %p2850_p10 }
 0x640   : > { %v1885_v40 = vld [vmem:[#allocation8] sm:$0xff] }
 0x641   : > { %v1917_v41 = vmul.f32 %v1900_v39, %v1885_v40 }
 0x643   : > { %v1921_v42 = vpack.c.bf16 %v1917_v41, %v1917_v41 }
 0x645   : > { %1922 = vst.msk [vmem:[#allocation5] sm:$0xf] %vm736_vm3, %v1921_v42 }
 0x6a3   : > { %v1928_v43 = vpop.permute.xlu1 %1927 }
 0x6a4   : > { %1931 = vst.msk [vmem:[#allocation5] sm:$0xf] %vm1930_vm7, %v1928_v43 }
 0x6a7   : > { %v1937_v44 = vpop.permute.xlu0 %1936 }
 0x6a8   : > { %1940 = vst.msk [vmem:[#allocation5] sm:$0xf] %vm1939_vm8, %v1937_v44 }
 0x6ab   : > { %v1946_v45 = vpop.permute.xlu1 %1945 }
 0x6ac   : > { %1949 = vst.msk [vmem:[#allocation5] sm:$0xf] %vm1948_vm9, %v1946_v45 }
 0x6b3   : > { %v1950_v24 = vld [vmem:[#allocation5] sm:$0xf] }
 0x6b4   : > { %2586 = vmatmul.mubr.msk.bf16.vlgmr.msra.gmra.mrb[16].mxu1 %vm531_vm0, %v1950_v24 }
 0x6b5   : > { %2613 = vmatprep.mubr.msk.bf16.mxu1 %vm2939_vm1, %v2938_v8  ;;  %2598 = vmatpush3.bf16.msra.mxu1 %v2725_v57 }
 0x6b6   : > { %2599 = vmatprep.subr.bf16.mxu1 %v2938_v8 }
 0x6b9   : > { %2600 = vmatpush3.bf16.msra.mxu1 %v2726_v4 }
 0x6ba   : > { %2601 = vmatprep.subr.bf16.mxu1 %v2938_v8 }
 0x6bd   : > { %2602 = vmatpush3.bf16.msra.mxu1 %v2727_v5 }
 0x6be   : > { %2603 = vmatprep.subr.bf16.mxu1 %v2938_v8 }
 0x6c1   : > { %2604 = vmatpush3.bf16.msra.mxu1 %v2728_v6 }
 0x6c2   : > { %2605 = vmatprep.subr.bf16.mxu1 %v2938_v8 }
 0x6c5   : > { %2606 = vmatpush3.bf16.msra.mxu1 %v2729_v7 }
 0x6c6   : > { %2607 = vmatprep.subr.bf16.mxu1 %v2938_v8 }
 0x6c9   : > { %2608 = vmatpush3.bf16.msra.mxu1 %v2730_v9 }
 0x6ca   : > { %2609 = vmatprep.subr.bf16.mxu1 %v2938_v8 }
 0x6cd   : > { %2610 = vmatpush3.bf16.msra.mxu1 %v2731_v10 }
 0x6ce   : > { %2611 = vmatprep.subr.bf16.mxu1 %v2938_v8 }
 0x6d1   : > { %2612 = vmatpush3.bf16.msra.mxu1 %v2732_v11 }
 0x787   : > { %v2011_v27 = vpop.f32.mrb[16].mxu1 }
 0x788   : > { %v2012_v29 = vadd.f32 %v2440_v46, %v2011_v27  ;;  %v2587_v30 = vpop.f32.mrb[17].mxu1 }
 0x789   : > { %v2014_v47 = vpop.f32.mrb[18].mxu1 }
 0x78a   : > { %v3401_v48 = vadd.f32 %v2012_v29, %v3178_v0  ;;  %v2588_v49 = vpop.f32.mrb[19].mxu1  ;;  %v2724_v0 = vld [vmem:[%s3516_s10 + $0x8] sm:$0xff]  }
 0x78b   : > { %2592 = vmatpush3.bf16.msra.mxu0 %v2724_v0 }
 0x78c   : > { %v2020_v50 = vsel %vm531_vm0, %v3401_v48, 0.0 }
 0x78d   : > { %2021 = vadd.xlane.f32.xlu0 %v2020_v50 }
 0x81a   : > { %v2022_v51 = vpop.xlane.xlu0 %2021 }
 0x81b   : > { %v2023_v52 = vmul.f32 0.03125, %v2022_v51 }
 0x81d   : > { %v2024_v53 = vsub.f32 %v3401_v48, %v2023_v52 }
 0x81f   : > { %v2025_v54 = vmul.f32 %v2024_v53, %v2024_v53  ;;  %v2036_v61 = vmul.f32 %v2444_v60, %v2024_v53 }
 0x821   : > { %v2026_v55 = vsel %vm531_vm0, %v2025_v54, 0.0 }
 0x822   : > { %2027 = vadd.xlane.f32.xlu1 %v2026_v55 }
 0x8af   : > { %v2028_v58 = vpop.xlane.xlu1 %2027 }
 0x8b0   : > { %v2029_v36 = vmul.f32 0.03125, %v2028_v58 }
 0x8b2   : > { %v2037_v59 = vadd.f32 1e-05, %v2029_v36 }
 0x8b4   : > { %2759 = vrsqrt.f32 %v2037_v59 }
 0x8be   : > { %v2760_v62 = vpop.eup %2759 }
 0x8bf   : > { %v2039_v1 = vmul.f32 %v2760_v62, %v2036_v61 }
 0x8c1   : > { %v2046_v2 = vadd.f32 %v2445_v63, %v2039_v1 }
 0x8c3   : > { %v2047_v3 = vpack.c.bf16 %v2046_v2, %v2046_v2 }
 0x8c5   : > { %2594 = vmatmul.mubr.msk.bf16.vlgmr.msra.gmra.mrb[28].mxu0 %vm531_vm0, %v2047_v3 }
 0x998   : > { %v2108_v13 = vpop.f32.mrb[28].mxu0 }
 0x999   : > { %v2109_v14 = vadd.f32 %v2446_v12, %v2108_v13  ;;  %v2595_v15 = vpop.f32.mrb[29].mxu0 }
 0x99a   : > { %v2111_v16 = vpop.f32.mrb[30].mxu0 }
 0x99b   : > { %v2114_v17 = vmul.f32 %v2109_v14, %v2109_v14  ;;  %v2596_v18 = vpop.f32.mrb[31].mxu0  ;;  %v2116_v8 = vmul.f32 0.5, %v2109_v14 }
 0x99d   : > { %v2115_v19 = vmul.f32 %v2114_v17, %v2109_v14 }
 0x99f   : > { %v2117_v20 = vmul.f32 0.044715, %v2115_v19 }
 0x9a1   : > { %v2118_v21 = vadd.f32 %v2117_v20, %v2109_v14 }
 0x9a3   : > { %v2119_v22 = vmul.f32 0.7978846, %v2118_v21 }
 0x9a5   : > { %2761 = vtanh.f32 %v2119_v22 }
 0x9af   : > { %v2762_v23 = vpop.eup %2761 }
 0x9b0   : > { %v2121_v25 = vadd.f32 1.0, %v2762_v23 }
 0x9b2   : > { %v2122_v26 = vmul.f32 %v2121_v25, %v2116_v8 }
 0x9b4   : > { %v2123_v28 = vpack.c.bf16 %v2122_v26, %v2122_v26 }
 0x9b6   : > { %2614 = vmatmul.mubr.bf16.vlgmr.msra.gmra.mrb[20].mxu1 %v2123_v28 }
 0xa89   : > { %v2229_v34 = vpop.f32.mrb[20].mxu1 }
 0xa8a   : > { %v2230_v31 = vadd.f32 %v2450_v32, %v2229_v34  ;;  %v2615_v33 = vpop.f32.mrb[21].mxu1 }
 0xa8b   : > { %v2232_v35 = vpop.f32.mrb[22].mxu1 }
 0xa8c   : > { %v2235_v37 = vadd.f32 %v2230_v31, %v3401_v48  ;;  %v2616_v38 = vpop.f32.mrb[23].mxu1 }
 0xa8e   : > { %2236 = vst.msk [vmem:[%s518_s14] sm:$0xff] %vm531_vm0, %v2235_v37 }
 0xa8f   : > { %2860 = shalt.err (!%p2857_p6)
}
 0xa90   : > { %s2861_s28 = scalar_lea.hbm %s3458_s8, 128  ;;  %s2865_s26 = scalar_lea.hbm %s3555_s19, 256 }
 0xa91   : > { %p2862_p7 = scmp.ne.s32.totalorder %s3458_s8, %s2861_s28  ;;  %p2866_p0 = scmp.lt.u32.totalorder %s3458_s8, %s3555_s19 }
 0xa92   : > { %p2867_p2 = scmp.lt.u32.totalorder %s2865_s26, %s2861_s28  ;;  %p2869_p13 = scmp.lt.u32.totalorder %s2861_s28, %s3458_s8 }
 0xa93   : > { %p2863_p9 = pnand %p2862_p7, %p3556_p4 }
 0xa94   : > { %p2868_p1 = por %p2867_p2, %p2866_p0 }
 0xa95   : > { %p2864_p12 = pneg %p2863_p9 }
 0xa96   : > { %p2870_p8 = por %p2869_p13, %p2868_p1 }
 0xa98   : > { %p2871_p10 = pnand %p2870_p8, %p2864_p12 }
 0xa9a   : > { %2874 = shalt.err (!%p2871_p10)
}
 0xa9b   : > { %2629 = dma.vmem_to_hbm [thread:$0]  (%p3556_p4), %s3460_s17, 128, %s3458_s8, %s2238_s16  }
 0xa9c PF: > { %s3557_s23 = sld [smem:[#allocation22_spill]]  ;;  %s3558_s25 = sld [smem:[#allocation19_spill]] }
 0xa9d   : > { %s3559_s21 = sld [smem:[#allocation25_spill]] }
 0xaa2   : > { %p2651_p11 = scmp.ge.s32.totalorder %s3557_s23, 2  ;;  %s2264_s20 = sand.u32 1, %s3558_s25  }
 0xaa3   : > { %p3560_p3 = scmp.ne.s32.totalorder %s3559_s21, 0  ;;  %s2265_s27 = scalar_lea.sflag [#allocation11], %s2264_s20 }
 0xaa5   : > { %p2642_p5 = pnand %p2651_p11, %p3560_p3 }
 0xaa7   : > { %2908 = dma.done.wait (!%p2642_p5), %s2265_s27, 128  }
 0xaa8   : > { %2910 = vsyncadd (!%p2642_p5), %s2265_s27, 4294967168  ;;  %s29_s18 = sadd.s32 1, %s3557_s23   ;;  %s3561_s15 = sld [smem:[#allocation20_spill]] }
 0xaa9   : > { %p26_p6 = scmp.ge.s32.totalorder %s29_s18, 4   ;;  %s3562_s28 = sld [smem:[#allocation26_spill]] }
 0xaaa   : > { %s3563_s16 = sld [smem:[#allocation21_spill]]  ;;  %s3564_s17 = sld [smem:[#allocation23_spill]] }
 0xaab   : > { %s3565_s29 = smov %s2917_s30  ;;  %28 = sbr.rel (!%p26_p6) target bundleno = 9 (0x9), region = 155 }
 0xaae   : > { %s3566_s30 = smov %s3561_s15 }
 0xaaf   : > { %s3567_s15 = smov %s3562_s28 }
 0xab2   :  { %2270 = vsyncpa [#allocation10], 1 }
 0xab3   :  { %2272 = vsyncpa [#allocation10 + $0x1], 1 }
 0xab4   :  { %2273 = vsyncpa [#allocation13], 1 }
 0xab5   :  { %2274 = vsyncpa [#allocation11], 1 }
 0xab6   :  { %2276 = vsyncpa [#allocation11 + $0x1], 1 }

// kernel: tpu_custom_call.1
= control target key start
LH: loop header
LB: loop body
LE: loop exit
PB: predicated region body
PF: predicated region fallthrough
CT: control target
= control target key end

     0   :  { %s3506_s0 = inlined_call_operand.vmem [shape: f32[2,8,32], index: 0, kind: input, shape index: {}]   ;;  %s3507_s1 = inlined_call_operand.vmem [shape: f32[1,32], index: 1, kind: input, shape index: {}]   ;;  %s3508_s2 = inlined_call_operand.vmem [shape: f32[1,32], index: 2, kind: input, shape index: {}]   ;;  %s3509_s3 = inlined_call_operand.vmem [shape: bf16[32,32], index: 3, kind: input, shape index: {}]   ;;  %s3510_s4 = inlined_call_operand.vmem [shape: bf16[32,32], index: 4, kind: input, shape index: {}]   ;;  %s3511_s5 = inlined_call_operand.vmem [shape: bf16[32,32], index: 5, kind: input, shape index: {}]   ;;  %s3512_s6 = inlined_call_operand.vmem [shape: bf16[32,32], index: 6, kind: input, shape index: {}]   ;;  %s3513_s7 = inlined_call_operand.hbm [shape: f32[1,32], index: 7, kind: input, shape index: {}]   ;;  %s3514_s8 = inlined_call_operand.hbm [shape: f32[1,32], index: 8, kind: input, shape index: {}]   ;;  %s3515_s9 = inlined_call_operand.hbm [shape: f32[1,32], index: 9, kind: input, shape index: {}]   ;;  %s3516_s10 = inlined_call_operand.vmem [shape: bf16[32,128], index: 10, kind: input, shape index: {}]   ;;  %s3517_s11 = inlined_call_operand.vmem [shape: f32[1,128], index: 11, kind: input, shape index: {}]   ;;  %s3518_s12 = inlined_call_operand.vmem [shape: bf16[128,32], index: 12, kind: input, shape index: {}]   ;;  %s3519_s13 = inlined_call_operand.vmem [shape: f32[1,32], index: 13, kind: input, shape index: {}]   ;;  %s3520_s14 = inlined_call_operand.hbm [shape: f32[2,8,32], index: 14, kind: output, shape index: {}]  }
   0x1   :  { %3535 = sst [smem:[#allocation27_spill]] %s3514_s8 }
   0x2   :  { %3536 = sst [smem:[#allocation28_spill]] %s3520_s14 }
   0x3   :  { %19 = vsyncpa [#allocation10], 0 }
   0x4   :  { %20 = vsyncpa [#allocation13], 0 }
   0x5   :  { %21 = vsyncpa [#allocation11], 0 }
   0x6   :  { %23 = vsyncpa [#allocation11 + $0x1], 0  ;;  %s3024_s29 = smov 0   ;;  %s3026_s30 = smov 0  }
   0x7   :  { %s3028_s15 = smov 0   ;;  %s3030_s16 = smov 0  }
   0x8   :  { %s3032_s17 = smov 0   ;;  %s3034_s18 = smov 0  }
   0x9 LB: > { %3537 = sst [smem:[#allocation19_spill]] %s2913_s29  ;;  %s2385_s19 = sadd.s32 4294967295, %s2933_s18   ;;  %s2933_s18 = sphi %s3034_s18, %s29_s18   ;;  %s2929_s17 = sphi %s3032_s17, %s3564_s17   ;;  %s2925_s16 = sphi %s3030_s16, %s3563_s16   ;;  %s2921_s15 = sphi %s3028_s15, %s3567_s15   ;;  %s2917_s30 = sphi %s3026_s30, %s3566_s30   ;;  %s2913_s29 = sphi %s3024_s29, %s3565_s29  }
   0xa   : > { %3538 = sst [smem:[#allocation20_spill]] %s2921_s15  ;;  %s2386_s20 = sadd.s32 4294967294, %s2933_s18  }
   0xb   : > { %3539 = sst [smem:[#allocation21_spill]] %s2929_s17  ;;  %s41_s21 = sadd.s32 1, %s2929_s17 }
   0xc   : > { %3540 = sst [smem:[#allocation22_spill]] %s2933_s18  ;;  %s351_s22 = sadd.s32 1, %s2921_s15 }
   0xd   : > { %p43_p0 = scmp.ge.s32.totalorder %s41_s21, 2  ;;  %p361_p1 = scmp.ne.s32.totalorder %s2921_s15, %s2917_s30 }
   0xe   : > { %p362_p2 = scmp.eq.s32.totalorder %s2385_s19, 1  ;;  %p367_p3 = scmp.ne.s32.totalorder %s2917_s30, %s2913_s29 }
   0xf   : > { %s3569_s21 = smov (%p43_p0, %s41_s21), 0  ;;  %p368_p5 = scmp.eq.s32.totalorder %s2386_s20, 1 }
  0x10   : > { %3541 = sst [smem:[#allocation23_spill]] %s3569_s21  ;;  %p3064_p4 = por %p362_p2, %p361_p1 }
  0x11   : > { %s346_s24 = ssub.s32 %s2929_s17, %s3569_s21  ;;  %p2387_p6 = scmp.ge.s32.totalorder %s2933_s18, 1 }
  0x12   : > { %s3542_s23 = scalar_select %p3064_p4, 1, 0 }
  0x13   : > { %p349_p7 = scmp.eq.s32.totalorder %s346_s24, 0  ;;  %p3071_p8 = por %p368_p5, %p367_p3 }
  0x14   : > { %3543 = sst [smem:[#allocation24_spill]] %s3542_s23  ;;  %p375_p9 = scmp.lt.s32.totalorder %s2933_s18, 3 }
  0x15   : > { %s3544_s25 = scalar_select %p3071_p8, 1, 0 }
  0x16   : > { %s3077_s26 = scalar_select %p349_p7, %s2921_s15, %s351_s22  }
  0x17   : > { %3545 = sst [smem:[#allocation25_spill]] %s3544_s25  ;;  %p3079_p10 = pnand %p2387_p6, %p375_p9 }
  0x18   : > { %3546 = sst [smem:[#allocation26_spill]] %s3077_s26  ;;  %p3083_p11 = scmp.eq.s32.totalorder %s2385_s19, 0 }
  0x19   : > { %s3547_s27 = scalar_select %p3079_p10, 1, 0 }
  0x1a   : > { %s3548_s28 = scalar_select %p3083_p11, 1, 0 }
  0x1b   : > { %p2631_p12 = pneg %p3079_p10  ;;  %s2935_s20 = smov [#allocation12]  }
  0x1c   : > { %s417_s24 = sshll.u32 %s2935_s20, 4  ;;  %s2936_s22 = smov [#allocation9]   ;;  %s418_s24 = int_to_ptr.vmem [resolvable:$true] %s417_s24 }
  0x1d   : > { %p3091_p13 = pnand %p3083_p11, %p2631_p12  ;;  %s406_s17 = sshll.u32 %s2936_s22, 4  ;;  %s3095_s17 = int_to_ptr.vmem [resolvable:$true] %s406_s17 }
  0x1e   : > { %s3550_s8 = sld [smem:[#allocation27_spill]] }
  0x1f   : > { %p3105_p1 = pneg %p3091_p13 }
  0x24   : > { %s2763_s15 = scalar_lea.hbm %s3550_s8, 16 }
  0x25   : > { %p2764_p0 = scmp.ne.s32.totalorder %s3550_s8, %s2763_s15  ;;  %p2770_p5 = scmp.lt.u32.totalorder %s2763_s15, %s3550_s8 }
  0x27   : > { %p2766_p2 = pnand %p3105_p1, %p2764_p0 }
  0x29   : > { %p2767_p3 = pneg %p2766_p2 }
  0x2b   : > { %p2772_p6 = pnand %p2770_p5, %p2767_p3 }
  0x2d   : > { %2775 = shalt.err (!%p2772_p6)
}
  0x2e   : > { %s2776_s26 = scalar_lea.vmem %s418_s24, 16  ;;  %s2783_s29 = scalar_lea.vmem %s418_s24, 32 }
  0x2f   : > { %p2777_p7 = scmp.ne.s32.totalorder %s418_s24, %s2776_s26  ;;  %p2784_p8 = scmp.lt.s32.totalorder %s418_s24, %s418_s24 }
  0x30   : > { %p2785_p4 = scmp.lt.s32.totalorder %s2783_s29, %s2776_s26 }
  0x31   : > { %p2779_p9 = pnand %p2777_p7, %p3105_p1 }
  0x32   : > { %p2786_p11 = por %p2785_p4, %p2784_p8 }
  0x33   : > { %p2780_p12 = pneg %p2779_p9 }
  0x35   : > { %p2787_p10 = pnand %p2786_p11, %p2780_p12 }
  0x37   : > { %2790 = shalt.err (!%p2787_p10)
}
  0x38   : > { %2637 = dma.hbm_to_vmem [thread:$0]  (!%p3091_p13), %s3550_s8, 16, %s418_s24, [#allocation13]  }
  0x39   : > { %s2791_s22 = scalar_lea.hbm %s3513_s7, 16 }
  0x3a   : > { %p2792_p0 = scmp.ne.s32.totalorder %s3513_s7, %s2791_s22  ;;  %p2798_p8 = scmp.lt.u32.totalorder %s2791_s22, %s3513_s7 }
  0x3c   : > { %p2794_p2 = pnand %p2792_p0, %p3105_p1 }
  0x3e   : > { %p2795_p4 = pneg %p2794_p2 }
  0x40   : > { %p2800_p10 = pnand %p2798_p8, %p2795_p4 }
  0x42   : > { %2803 = shalt.err (!%p2800_p10)
}
  0x43   : > { %s2804_s24 = scalar_lea.vmem %s3095_s17, 16  ;;  %s2811_s14 = scalar_lea.vmem %s3095_s17, 32 }
  0x44   : > { %p2805_p11 = scmp.ne.s32.totalorder %s3095_s17, %s2804_s24  ;;  %p2812_p6 = scmp.lt.s32.totalorder %s3095_s17, %s3095_s17 }
  0x45   : > { %p2813_p7 = scmp.lt.s32.totalorder %s2811_s14, %s2804_s24 }
  0x46   : > { %p2807_p3 = pnand %p2805_p11, %p3105_p1 }
  0x47   : > { %p2814_p9 = por %p2813_p7, %p2812_p6 }
  0x48   : > { %p2808_p5 = pneg %p2807_p3 }
  0x4a   : > { %p2815_p12 = pnand %p2814_p9, %p2808_p5 }
  0x4c   : > { %2818 = shalt.err (!%p2815_p12)
}
  0x4d   : > { %2634 = dma.hbm_to_vmem [thread:$0]  (!%p3091_p13), %s3513_s7, 16, %s3095_s17, [#allocation10]  }
  0x4e   : > { %s2937_s19 = smov [#allocation14]   ;;  %s2819_s26 = scalar_lea.hbm %s3515_s9, 16 }
  0x4f   : > { %s428_s15 = sshll.u32 %s2937_s19, 4  ;;  %p2820_p0 = scmp.ne.s32.totalorder %s3515_s9, %s2819_s26  ;;  %s429_s15 = int_to_ptr.vmem [resolvable:$true] %s428_s15 }
  0x50   : > { %p2826_p8 = scmp.lt.u32.totalorder %s2819_s26, %s3515_s9 }
  0x51   : > { %p2822_p2 = pnand %p2820_p0, %p3105_p1 }
  0x53   : > { %p2823_p4 = pneg %p2822_p2 }
  0x55   : > { %p2828_p10 = pnand %p2826_p8, %p2823_p4 }
  0x57   : > { %2831 = shalt.err (!%p2828_p10)
}
  0x58   : > { %s2832_s17 = scalar_lea.vmem %s429_s15, 16  ;;  %s2839_s23 = scalar_lea.vmem %s429_s15, 32 }
  0x59   : > { %p2833_p11 = scmp.ne.s32.totalorder %s429_s15, %s2832_s17  ;;  %p2840_p6 = scmp.lt.s32.totalorder %s429_s15, %s429_s15 }
  0x5a   : > { %p2841_p7 = scmp.lt.s32.totalorder %s2839_s23, %s2832_s17 }
  0x5b   : > { %p2835_p3 = pnand %p2833_p11, %p3105_p1 }
  0x5c   : > { %p2842_p9 = por %p2841_p7, %p2840_p6 }
  0x5d   : > { %p2836_p5 = pneg %p2835_p3 }
  0x5f   : > { %p2843_p12 = pnand %p2842_p9, %p2836_p5 }
  0x61   : > { %2846 = shalt.err (!%p2843_p12)
}
  0x62   : > { %2640 = dma.hbm_to_vmem [thread:$0]  (!%p3091_p13), %s3515_s9, 16, %s429_s15, [#allocation13]  }
  0x63   : > { %p3552_p0 = scmp.ne.s32.totalorder %s3547_s27, 0 }
  0x64   : > { %p3553_p2 = scmp.ne.s32.totalorder (!%p3552_p0), %s3548_s28, 0 }
  0x65   : > { %463 = sbr.rel (%p3552_p0) target bundleno = 2716 (0xa9c), region = 76 }
  0x6c   : > { %2900 = dma.done.wait (%p3553_p2), [#allocation10], 16  }
  0x6d   : > { %2902 = vsyncadd (%p3553_p2), [#allocation10], 4294967280 }
  0x6e   : > { %2904 = dma.done.wait (%p3553_p2), [#allocation13], 32  }
  0x6f   : > { %2906 = vsyncadd (%p3553_p2), [#allocation13], 4294967264  ;;  %p519_p1 = scmp.lt.s32.totalorder %s2925_s16, 1  ;;  %vm531_vm0 = vcmask 261120   ;;  %v2715_v7 = vld [vmem:[%s3509_s3] sm:$0xff]   ;;  %v2938_v8 = vmov 0.0   ;;  %v809_v60 = vlaneseq }
  0x70   : > { %2509 = vmatprep.subr.bf16.mxu0 %v2938_v8  ;;  %vm2939_vm1 = vmmov 0   ;;  %v2716_v9 = vld [vmem:[%s3509_s3 + $0x8] sm:$0xff]   ;;  %2533 = vmatprep.subr.bf16.mxu1 %v2938_v8  ;;  %v2398_v13 = vld [vmem:[%s3507_s1] ss:$0 sm:$0xff]  ;;  %vm827_vm2 = vcmask 64512   ;;  %vm736_vm3 = vcmask 60416  }
  0x71   : > { %s520_s8 = scalar_select %p519_p1, %s2925_s16, 1  ;;  %2513 = vmatprep.mubr.msk.bf16.mxu0 %vm2939_vm1, %v2938_v8  ;;  %2510 = vmatpush3.bf16.msra.mxu0 %v2715_v7  ;;  %v2399_v16 = vld [vmem:[%s3508_s2] ss:$0 sm:$0xff]  ;;  %v2718_v21 = vld [vmem:[%s3510_s4 + $0x8] sm:$0xff]   ;;  %828 = vst.msk [vmem:[#allocation8] sm:$0xff] %vm827_vm2, %v2938_v8  ;;  %829 = vst.msk [vmem:[#allocation8 + $0x8] sm:$0xff] %vm827_vm2, %v2938_v8 }
  0x72   : > { %2511 = vmatprep.subr.bf16.mxu0 %v2938_v8  ;;  %2535 = vmatprep.mubr.msk.bf16.mxu1 %vm2939_vm1, %v2938_v8  ;;  %v2717_v19 = vld [vmem:[%s3510_s4] sm:$0xff]   ;;  %v2720_v23 = vld [vmem:[%s3511_s5 + $0x8] sm:$0xff]   ;;  %830 = vst.msk [vmem:[#allocation8 + $0x10] sm:$0xff] %vm827_vm2, %v2938_v8  ;;  %831 = vst.msk [vmem:[#allocation8 + $0x18] sm:$0xff] %vm827_vm2, %v2938_v8  ;;  %s2940_s28 = smov 120   ;;  %s2941_s18 = smov 112  }
  0x73   : > { %s2397_s21 = sshll.u32 %s520_s8, 3  ;;  %v2719_v22 = vld [vmem:[%s3511_s5] sm:$0xff]   ;;  %s2942_s22 = smov 104   ;;  %vm1691_vm4 = vcmask 1043456   ;;  %v810_v61 = vshrl.u32 %v809_v60, 7  ;;  %v812_v62 = vand.u32 127, %v809_v60 }
  0x74   : > { %s525_s15 = scalar_lea.vmem %s3506_s0, %s2397_s21  ;;  %vm818_vm6 = vcmask 7168   ;;  %v2943_v63 = vmov -inf   ;;  %v2944_v7 = vmov 0   ;;  %s2945_s17 = smov 8   ;;  %vm1930_vm7 = vcmask 126016  }
  0x75   : > { %v3178_v0 = vld [vmem:[%s525_s15] sm:$0xff]  ;;  %2512 = vmatpush3.bf16.msra.mxu0 %v2716_v9  ;;  %vm813_vm5 = vcmp.le.s32.totalorder %v812_v62, %v810_v61  ;;  %819 = vst.msk [vmem:[#allocation6] sm:$0xff] %vm818_vm6, %v2943_v63  ;;  %820 = vst.msk [vmem:[#allocation6 + $0x8] sm:$0xff] %vm818_vm6, %v2943_v63  ;;  %2713 = vset.pattern.permute.xlu0 %v2944_v7  ;;  %s2946_s23 = smov 16   ;;  %s2947_s25 = smov 24   ;;  %vm1939_vm8 = vcmask 191616  }
  0x76   : > { %v532_v1 = vsel %vm531_vm0, %v3178_v0, 0.0  ;;  %2517 = vmatprep.subr.bf16.mxu0 %v2938_v8  ;;  %821 = vst.msk [vmem:[#allocation6 + $0x10] sm:$0xff] %vm818_vm6, %v2943_v63  ;;  %822 = vst.msk [vmem:[#allocation6 + $0x18] sm:$0xff] %vm818_vm6, %v2943_v63  ;;  %2714 = vset.pattern.permute.xlu1 %v2944_v7  ;;  %vm1948_vm9 = vcmask 257216   ;;  %s3554_s29 = sld [smem:[#allocation24_spill]]  ;;  %s2460_s24 = sshll.u32 %s2925_s16, 7 }
  0x77   : > { %533 = vadd.xlane.f32.xlu0 %v532_v1  ;;  %823 = vst.msk [vmem:[#allocation7] sm:$0xff] %vm818_vm6, %v2938_v8  ;;  %824 = vst.msk [vmem:[#allocation7 + $0x8] sm:$0xff] %vm818_vm6, %v2938_v8  ;;  %s3555_s19 = sld [smem:[#allocation28_spill]]  ;;  %s2948_s20 = smov [#allocation15]  }
  0x78   : > { %825 = vst.msk [vmem:[#allocation7 + $0x10] sm:$0xff] %vm818_vm6, %v2938_v8  ;;  %826 = vst.msk [vmem:[#allocation7 + $0x18] sm:$0xff] %vm818_vm6, %v2938_v8  ;;  %s2851_s27 = sshll.u32 %s2948_s20, 4  ;;  %s2852_s27 = int_to_ptr.vmem [resolvable:$false] %s2851_s27 }
  0x79   : > { %s2853_s15 = scalar_lea.vmem %s2852_s27, 256 }
  0x7c   : > { %p3556_p4 = scmp.ne.s32.totalorder %s3554_s29, 0 }
  0x7d   : > { %s3458_s8 = scalar_lea.hbm %s3555_s19, %s2460_s24 }
 0x104   : > { %v534_v2 = vpop.xlane.xlu0 %533 }
 0x105   : > { %v536_v3 = vmul.f32 0.03125, %v534_v2 }
 0x107   : > { %v537_v4 = vsub.f32 %v3178_v0, %v536_v3 }
 0x109   : > { %v538_v5 = vmul.f32 %v537_v4, %v537_v4  ;;  %v549_v14 = vmul.f32 %v2398_v13, %v537_v4 }
 0x10b   : > { %v539_v6 = vsel %vm531_vm0, %v538_v5, 0.0 }
 0x10c   : > { %540 = vadd.xlane.f32.xlu0 %v539_v6 }
 0x199   : > { %v541_v10 = vpop.xlane.xlu0 %540 }
 0x19a   : > { %v542_v11 = vmul.f32 0.03125, %v541_v10 }
 0x19c   : > { %v550_v12 = vadd.f32 1e-05, %v542_v11 }
 0x19e   : > { %2733 = vrsqrt.f32 %v550_v12 }
 0x1a8   : > { %v2734_v15 = vpop.eup %2733 }
 0x1a9   : > { %v552_v17 = vmul.f32 %v2734_v15, %v549_v14 }
 0x1ab   : > { %v559_v18 = vadd.f32 %v2399_v16, %v552_v17 }
 0x1ad   : > { %v560_v20 = vpack.c.bf16 %v559_v18, %v559_v18 }
 0x1af   : > { %2514 = vmatmul.mubr.msk.bf16.vlgmr.msra.gmra.mrb[0].mxu0 %vm531_vm0, %v560_v20 }
 0x1b0   : > { %2518 = vmatpush3.bf16.msra.mxu0 %v2717_v19  ;;  %2521 = vmatprep.mubr.msk.bf16.mxu0 %vm2939_vm1, %v2938_v8 }
 0x1b1   : > { %2519 = vmatprep.subr.bf16.mxu0 %v2938_v8 }
 0x1b4   : > { %2520 = vmatpush3.bf16.msra.mxu0 %v2718_v21 }
 0x1b5   : > { %2525 = vmatprep.subr.bf16.mxu0 %v2938_v8 }
 0x1b7   : > { %2522 = vmatmul.mubr.msk.bf16.vlgmr.msra.gmra.mrb[4].mxu0 %vm531_vm0, %v560_v20 }
 0x1b8   : > { %2526 = vmatpush3.bf16.msra.mxu0 %v2719_v22  ;;  %2529 = vmatprep.mubr.msk.bf16.mxu0 %vm2939_vm1, %v2938_v8 }
 0x1b9   : > { %2527 = vmatprep.subr.bf16.mxu0 %v2938_v8 }
 0x1bc   : > { %2528 = vmatpush3.bf16.msra.mxu0 %v2720_v23 }
 0x1bd   : > { %2539 = vmatprep.subr.bf16.mxu0 %v2938_v8 }
 0x1bf   : > { %2530 = vmatmul.mubr.msk.bf16.vlgmr.msra.gmra.mrb[8].mxu0 %vm531_vm0, %v560_v20 }
 0x1c0   : > { %2541 = vmatprep.mubr.msk.bf16.mxu0 %vm2939_vm1, %v2938_v8 }
 0x282   : > { %v614_v24 = vpop.f32.mrb[0].mxu0 }
 0x283   : > { %v620_v25 = vmul.f32 0.35355338, %v614_v24  ;;  %v2515_v26 = vpop.f32.mrb[1].mxu0 }
 0x284   : > { %v617_v27 = vpop.f32.mrb[2].mxu0 }
 0x285   : > { %v621_v28 = vpack.c.bf16 %v620_v25, %v620_v25  ;;  %v2516_v29 = vpop.f32.mrb[3].mxu0  ;;  %v3297_v27 = vld [vmem:[#allocation6] sm:$0xff] }
 0x287   : > { %737 = vst.msk [vmem:[#allocation4] sm:$0xf] %vm736_vm3, %v621_v28  ;;  %749 = vrot.lane.b32.xlu0 %v621_v28, %s2940_s28 }
 0x28a   : > { %v672_v30 = vpop.f32.mrb[4].mxu0 }
 0x28b   : > { %v678_v31 = vpack.c.bf16 %v672_v30, %v672_v30  ;;  %v2523_v32 = vpop.f32.mrb[5].mxu0 }
 0x28c   : > { %v675_v33 = vpop.f32.mrb[6].mxu0 }
 0x28d   : > { %742 = vst.msk [vmem:[#allocation2] sm:$0xf] %vm736_vm3, %v678_v31  ;;  %757 = vrot.lane.b32.xlu1 %v678_v31, %s2940_s28  ;;  %v2524_v34 = vpop.f32.mrb[7].mxu0 }
 0x28e   : > { %v814_v42 = vld [vmem:[#allocation4] sm:$0xf]  ;;  %v3312_v34 = vld [vmem:[#allocation6 + $0x10] sm:$0xff] }
 0x291   : > { %778 = vrot.lane.b32.xlu1 %v678_v31, %s2941_s18 }
 0x292   : > { %v729_v35 = vpop.f32.mrb[8].mxu0 }
 0x293   : > { %v3242_v36 = vpack.c.bf16 %v729_v35, %v729_v35  ;;  %v2531_v37 = vpop.f32.mrb[9].mxu0 }
 0x294   : > { %v732_v38 = vpop.f32.mrb[10].mxu0  ;;  %v1362_v39 = vld [vmem:[#allocation2] sm:$0xf] }
 0x295   : > { %745 = vst.msk [vmem:[#allocation3] sm:$0xf] %vm736_vm3, %v3242_v36  ;;  %796 = vrot.lane.b32.xlu1 %v678_v31, %s2942_s22  ;;  %v2532_v40 = vpop.f32.mrb[11].mxu0  ;;  %v1374_v41 = vsel %vm827_vm2, %v1362_v39, 0  ;;  %v3307_v31 = vld [vmem:[#allocation6 + $0x8] sm:$0xff]  ;;  %v3322_v39 = vld [vmem:[#allocation6 + $0x18] sm:$0xff] }
 0x296   : > { %2534 = vmatpush3.bf16.xpose.msra.mxu1 %v1374_v41 }
 0x297   : > { %2545 = vmatprep.subr.bf16.mxu1 %v2938_v8 }
 0x299   : > { %773 = vrot.lane.b32.xlu1 %v621_v28, %s2941_s18 }
 0x29c   : > { %v1366_v56 = vld [vmem:[#allocation3] sm:$0xf] }
 0x29d   : > { %791 = vrot.lane.b32.xlu1 %v621_v28, %s2942_s22  ;;  %2536 = vmatmul.mubr.msk.bf16.vlgmr.msra.gmra.mrb[0].mxu1 %vm827_vm2, %v814_v42  ;;  %v1693_v58 = vsel %vm1691_vm4, %v1366_v56, 0 }
 0x29e   : > { %2547 = vmatprep.mubr.msk.bf16.mxu1 %vm2939_vm1, %v2938_v8 }
 0x2f9   : > { %v750_v43 = vpop.permute.xlu0 %749 }
 0x2fa   : > { %753 = vst.msk [vmem:[#allocation4 + $0x4] sm:$0xf] %vm736_vm3, %v750_v43 }
 0x2ff   : > { %v758_v44 = vpop.permute.xlu1 %757 }
 0x300   : > { %2411 = vst.msk [vmem:[#allocation2 + $0x4] sm:$0xf] %vm736_vm3, %v758_v44 }
 0x301   : > { %v815_v53 = vld [vmem:[#allocation4 + $0x4] sm:$0xf] }
 0x303   : > { %v779_v45 = vpop.permute.xlu1 %778 }
 0x304   : > { %2414 = vst.msk [vmem:[#allocation2 + $0x8] sm:$0xf] %vm736_vm3, %v779_v45 }
 0x307   : > { %v797_v46 = vpop.permute.xlu1 %796  ;;  %v1363_v47 = vld [vmem:[#allocation2 + $0x4] sm:$0xf] }
 0x308   : > { %2416 = vst.msk [vmem:[#allocation2 + $0xc] sm:$0xf] %vm736_vm3, %v797_v46  ;;  %v1420_v48 = vsel %vm827_vm2, %v1363_v47, 0 }
 0x309   : > { %2540 = vmatpush3.bf16.xpose.msra.mxu0 %v1420_v48 }
 0x30a   : > { %2551 = vmatprep.subr.bf16.mxu0 %v2938_v8 }
 0x30b   : > { %v774_v49 = vpop.permute.xlu1 %773  ;;  %v1364_v50 = vld [vmem:[#allocation2 + $0x8] sm:$0xf] }
 0x30c   : > { %777 = vst.msk [vmem:[#allocation4 + $0x8] sm:$0xf] %vm736_vm3, %v774_v49  ;;  %v1466_v51 = vsel %vm827_vm2, %v1364_v50, 0 }
 0x30d   : > { %2546 = vmatpush3.bf16.xpose.msra.mxu1 %v1466_v51 }
 0x30e   : > { %2557 = vmatprep.subr.bf16.mxu1 %v2938_v8 }
 0x30f   : > { %v792_v52 = vpop.permute.xlu1 %791  ;;  %v1365_v54 = vld [vmem:[#allocation2 + $0xc] sm:$0xf] }
 0x310   : > { %795 = vst.msk [vmem:[#allocation4 + $0xc] sm:$0xf] %vm736_vm3, %v792_v52  ;;  %2542 = vmatmul.mubr.msk.bf16.vlgmr.msra.gmra.mrb[12].mxu0 %vm827_vm2, %v815_v53  ;;  %v1512_v55 = vsel %vm827_vm2, %v1365_v54, 0 }
 0x311   : > { %2552 = vmatpush3.bf16.xpose.msra.mxu0 %v1512_v55  ;;  %2553 = vmatprep.mubr.msk.bf16.mxu0 %vm2939_vm1, %v2938_v8 }
 0x312   : > { %2563 = vmatprep.subr.bf16.mxu0 %v2938_v8 }
 0x313   : > { %v816_v57 = vld [vmem:[#allocation4 + $0x8] sm:$0xf] }
 0x314   : > { %2548 = vmatmul.mubr.msk.bf16.vlgmr.msra.gmra.mrb[4].mxu1 %vm827_vm2, %v816_v57 }
 0x315   : > { %2558 = vmatpush3.bf16.msra.mxu1 %v1693_v58  ;;  %2559 = vmatprep.mubr.msk.bf16.mxu1 %vm2939_vm1, %v2938_v8 }
 0x316   : > { %2569 = vmatprep.subr.bf16.mxu1 %v2938_v8 }
 0x317   : > { %v817_v59 = vld [vmem:[#allocation4 + $0xc] sm:$0xf] }
 0x318   : > { %2554 = vmatmul.mubr.msk.bf16.vlgmr.msra.gmra.mrb[16].mxu0 %vm827_vm2, %v817_v59 }
 0x319   : > { %2565 = vmatprep.mubr.msk.bf16.mxu0 %vm2939_vm1, %v2938_v8 }
 0x370   : > { %v1410_v1 = vpop.f32.mrb[0].mxu1 }
 0x371   : > { %v1556_v2 = vsel %vm813_vm5, %v1410_v1, -inf  ;;  %v2537_v3 = vpop.f32.mrb[1].mxu1 }
 0x372   : > { %v1413_v4 = vpop.f32.mrb[2].mxu1  ;;  %v1564_v5 = vsel %vm827_vm2, %v1556_v2, -inf }
 0x373   : > { %1565 = vmax.xlane.f32.xlu1 %v1564_v5  ;;  %v2538_v6 = vpop.f32.mrb[3].mxu1 }
 0x3e3   : > { %v1456_v9 = vpop.f32.mrb[12].mxu0 }
 0x3e4   : > { %v1557_v10 = vsel %vm813_vm5, %v1456_v9, -inf  ;;  %v2543_v11 = vpop.f32.mrb[13].mxu0 }
 0x3e5   : > { %v1459_v12 = vpop.f32.mrb[14].mxu0  ;;  %v1567_v13 = vsel %vm827_vm2, %v1557_v10, -inf }
 0x3e6   : > { %1568 = vmax.xlane.f32.xlu0 %v1567_v13  ;;  %v2544_v14 = vpop.f32.mrb[15].mxu0 }
 0x3e7   : > { %v1502_v15 = vpop.f32.mrb[4].mxu1 }
 0x3e8   : > { %v1558_v16 = vsel %vm813_vm5, %v1502_v15, -inf  ;;  %v2549_v17 = vpop.f32.mrb[5].mxu1 }
 0x3e9   : > { %v1505_v18 = vpop.f32.mrb[6].mxu1  ;;  %v1570_v19 = vsel %vm827_vm2, %v1558_v16, -inf }
 0x3ea   : > { %1571 = vmax.xlane.f32.xlu1 %v1570_v19  ;;  %v2550_v20 = vpop.f32.mrb[7].mxu1 }
 0x3eb   : > { %v1548_v21 = vpop.f32.mrb[16].mxu0 }
 0x3ec   : > { %v1559_v22 = vsel %vm813_vm5, %v1548_v21, -inf  ;;  %v2555_v23 = vpop.f32.mrb[17].mxu0 }
 0x3ed   : > { %v1551_v24 = vpop.f32.mrb[18].mxu0  ;;  %v1573_v25 = vsel %vm827_vm2, %v1559_v22, -inf }
 0x3ee   : > { %1574 = vmax.xlane.f32.xlu1 %v1573_v25  ;;  %v2556_v26 = vpop.f32.mrb[19].mxu0 }
 0x400   : > { %v1566_v28 = vpop.xlane.xlu1 %1565 }
 0x401   : > { %v3300_v29 = vmax.f32 %v3297_v27, %v1566_v28 }
 0x403   : > { %v1580_v30 = vsub.f32 %v3297_v27, %v3300_v29  ;;  %1881 = vst.msk [vmem:[#allocation6] sm:$0xff] %vm818_vm6, %v3300_v29  ;;  %1594 = vperm.xlu0 %2713, %v3300_v29  }
 0x473   : > { %v1569_v32 = vpop.xlane.xlu0 %1568 }
 0x474   : > { %v3310_v33 = vmax.f32 %v3307_v31, %v1569_v32  ;;  %v1584_v32 = vmul.f32 1.442695, %v1580_v30 }
 0x476   : > { %v1581_v35 = vsub.f32 %v3307_v31, %v3310_v33  ;;  %1882 = vst.msk [vmem:[#allocation6 + $0x8] sm:$0xff] %vm818_vm6, %v3310_v33  ;;  %1599 = vperm.xlu1 %2714, %v3310_v33  }
 0x477   : > { %v1572_v37 = vpop.xlane.xlu1 %1571 }
 0x478   : > { %v3320_v38 = vmax.f32 %v3312_v34, %v1572_v37  ;;  %v1586_v20 = vmul.f32 1.442695, %v1581_v35  ;;  %v1630_v37 = vld [vmem:[#allocation7 + $0x10] sm:$0xff] }
 0x47a   : > { %v1582_v40 = vsub.f32 %v3312_v34, %v3320_v38  ;;  %1883 = vst.msk [vmem:[#allocation6 + $0x10] sm:$0xff] %vm818_vm6, %v3320_v38  ;;  %1604 = vperm.xlu1 %2714, %v3320_v38   ;;  %v1629_v34 = vld [vmem:[#allocation7 + $0x8] sm:$0xff]  ;;  %v1628_v38 = vld [vmem:[#allocation7] sm:$0xff] }
 0x47b   : > { %v1575_v41 = vpop.xlane.xlu1 %1574 }
 0x47c   : > { %v3330_v42 = vmax.f32 %v3322_v39, %v1575_v41  ;;  %v1588_v15 = vmul.f32 1.442695, %v1582_v40 }
 0x47e   : > { %v1583_v43 = vsub.f32 %v3322_v39, %v3330_v42  ;;  %1884 = vst.msk [vmem:[#allocation6 + $0x18] sm:$0xff] %vm818_vm6, %v3330_v42  ;;  %1609 = vperm.xlu1 %2714, %v3330_v42  }
 0x480   : > { %v1590_v19 = vmul.f32 1.442695, %v1583_v43 }
 0x482   : > { %v1595_v44 = vpop.permute.xlu0 %1594  ;;  %767 = vrot.lane.b32.xlu1 %v3242_v36, %s2940_s28  ;;  %s516_s28 = sand.u32 1, %s2917_s30  }
 0x483   : > { %v1612_v45 = vsub.f32 %v1556_v2, %v1595_v44  ;;  %v1631_v44 = vld [vmem:[#allocation7 + $0x18] sm:$0xff]  ;;  %s2238_s16 = scalar_lea.sflag [#allocation11], %s516_s28 }
 0x485   : > { %v1616_v46 = vmul.f32 1.442695, %v1612_v45 }
 0x486   : > { %785 = vrot.lane.b32.xlu1 %v3242_v36, %s2941_s18  ;;  %s2396_s18 = sshll.u32 %s516_s28, 3 }
 0x487   : > { %2735 = vpow2.f32 %v1616_v46  ;;  %s518_s14 = scalar_lea.vmem [#allocation15], %s2396_s18 }
 0x48a   : > { %803 = vrot.lane.b32.xlu1 %v3242_v36, %s2942_s22 }
 0x491   : > { %v2736_v47 = vpop.eup %2735 }
 0x492   : > { %v1624_v48 = vpack.c.bf16 %v2736_v47, %v2736_v47 }
 0x494   : > { %2560 = vmatmul.mubr.msk.bf16.vlgmr.msra.gmra.mrb[8].mxu1 %vm827_vm2, %v1624_v48  ;;  %v1636_v4 = vunpack.c.l.bf16 %v1624_v48 }
 0x495   : > { %2571 = vmatprep.mubr.msk.bf16.mxu1 %vm2939_vm1, %v2938_v8 }
 0x4f5   : > { %v1600_v49 = vpop.permute.xlu1 %1599 }
 0x4f6   : > { %v1613_v50 = vsub.f32 %v1557_v10, %v1600_v49  ;;  %v1640_v10 = vsel %vm827_vm2, %v1636_v4, 0.0 }
 0x4f8   : > { %v1618_v51 = vmul.f32 1.442695, %v1613_v50 }
 0x4f9   : > { %v1605_v52 = vpop.permute.xlu1 %1604 }
 0x4fa   : > { %2737 = vpow2.f32 %v1618_v51  ;;  %v1614_v53 = vsub.f32 %v1558_v16, %v1605_v52 }
 0x4fc   : > { %v1620_v54 = vmul.f32 1.442695, %v1614_v53 }
 0x4fd   : > { %v1610_v55 = vpop.permute.xlu1 %1609 }
 0x4fe   : > { %2739 = vpow2.f32 %v1620_v54  ;;  %v1615_v56 = vsub.f32 %v1559_v22, %v1610_v55  ;;  %v1661_v55 = vld [vmem:[#allocation8 + $0x8] sm:$0xff] }
 0x500   : > { %v1622_v57 = vmul.f32 1.442695, %v1615_v56 }
 0x501   : > { %v768_v58 = vpop.permute.xlu1 %767 }
 0x502   : > { %2741 = vpow2.f32 %v1622_v57  ;;  %2413 = vst.msk [vmem:[#allocation3 + $0x4] sm:$0xf] %vm736_vm3, %v768_v58  ;;  %v1662_v58 = vld [vmem:[#allocation8 + $0x10] sm:$0xff] }
 0x503   : > { %2743 = vpow2.f32 %v1588_v15 }
 0x504   : > { %v2738_v36 = vpop.eup %2737  ;;  %2745 = vpow2.f32 %v1590_v19 }
 0x505   : > { %v1625_v59 = vpack.c.bf16 %v2738_v36, %v2738_v36  ;;  %v786_v60 = vpop.permute.xlu1 %785  ;;  %2747 = vpow2.f32 %v1586_v20  ;;  %v2722_v20 = vld [vmem:[%s3512_s6 + $0x8] sm:$0xff]  }
 0x506   : > { %2415 = vst.msk [vmem:[#allocation3 + $0x8] sm:$0xf] %vm736_vm3, %v786_v60  ;;  %2749 = vpow2.f32 %v1584_v32 }
 0x507   : > { %v1637_v61 = vunpack.c.l.bf16 %v1625_v59 }
 0x508   : > { %v2740_v62 = vpop.eup %2739 }
 0x509   : > { %v1626_v63 = vpack.c.bf16 %v2740_v62, %v2740_v62  ;;  %v804_v1 = vpop.permute.xlu1 %803  ;;  %v1643_v2 = vsel %vm827_vm2, %v1637_v61, 0.0  ;;  %v1367_v3 = vld [vmem:[#allocation3 + $0x4] sm:$0xf] }
 0x50a   : > { %2417 = vst.msk [vmem:[#allocation3 + $0xc] sm:$0xf] %vm736_vm3, %v804_v1  ;;  %1644 = vadd.xlane.f32.xlu1 %v1643_v2  ;;  %v1739_v5 = vsel %vm1691_vm4, %v1367_v3, 0  ;;  %v1663_v3 = vld [vmem:[#allocation8 + $0x18] sm:$0xff] }
 0x50b   : > { %2564 = vmatpush3.bf16.msra.mxu0 %v1739_v5  ;;  %v1638_v6 = vunpack.c.l.bf16 %v1626_v63 }
 0x50c   : > { %v2742_v7 = vpop.eup %2741  ;;  %2575 = vmatprep.subr.bf16.mxu0 %v2938_v8 }
 0x50d   : > { %v1627_v9 = vpack.c.bf16 %v2742_v7, %v2742_v7  ;;  %v1646_v11 = vsel %vm827_vm2, %v1638_v6, 0.0  ;;  %v1368_v12 = vld [vmem:[#allocation3 + $0x8] sm:$0xf]  ;;  %v2744_v21 = vpop.eup %2743 }
 0x50e   : > { %1641 = vadd.xlane.f32.xlu1 %v1640_v10  ;;  %1647 = vadd.xlane.f32.xlu0 %v1646_v11  ;;  %v1785_v13 = vsel %vm1691_vm4, %v1368_v12, 0  ;;  %v2746_v22 = vpop.eup %2745  ;;  %v1634_v40 = vmul.f32 %v2744_v21, %v1630_v37 }
 0x50f   : > { %2566 = vmatmul.mubr.msk.bf16.vlgmr.msra.gmra.mrb[20].mxu0 %vm827_vm2, %v1625_v59  ;;  %2570 = vmatpush3.bf16.msra.mxu1 %v1785_v13  ;;  %v1639_v14 = vunpack.c.l.bf16 %v1627_v9  ;;  %v2748_v23 = vpop.eup %2747  ;;  %v1635_v27 = vmul.f32 %v2746_v22, %v1631_v44 }
 0x510   : > { %2577 = vmatprep.mubr.msk.bf16.mxu0 %vm2939_vm1, %v2938_v8  ;;  %2581 = vmatprep.subr.bf16.mxu1 %v2938_v8  ;;  %v1633_v31 = vmul.f32 %v2748_v23, %v1629_v34  ;;  %v2750_v33 = vpop.eup %2749 }
 0x511   : > { %v1649_v16 = vsel %vm827_vm2, %v1639_v14, 0.0  ;;  %v1369_v17 = vld [vmem:[#allocation3 + $0xc] sm:$0xf]  ;;  %v1632_v41 = vmul.f32 %v2750_v33, %v1628_v38 }
 0x512   : > { %1650 = vadd.xlane.f32.xlu0 %v1649_v16  ;;  %2572 = vmatmul.mubr.msk.bf16.vlgmr.msra.gmra.mrb[12].mxu1 %vm827_vm2, %v1626_v63  ;;  %v1831_v18 = vsel %vm1691_vm4, %v1369_v17, 0 }
 0x513   : > { %2576 = vmatpush3.bf16.msra.mxu0 %v1831_v18  ;;  %2585 = vmatprep.mubr.msk.bf16.mxu1 %vm2939_vm1, %v2938_v8  ;;  %v2721_v18 = vld [vmem:[%s3512_s6] sm:$0xff]  }
 0x514   : > { %2589 = vmatprep.subr.bf16.mxu0 %v2938_v8  ;;  %2582 = vmatpush3.bf16.msra.mxu1 %v2721_v18 }
 0x515   : > { %2583 = vmatprep.subr.bf16.mxu1 %v2938_v8 }
 0x517   : > { %2578 = vmatmul.mubr.msk.bf16.vlgmr.msra.gmra.mrb[24].mxu0 %vm827_vm2, %v1627_v9 }
 0x518   : > { %2593 = vmatprep.mubr.msk.bf16.mxu0 %vm2939_vm1, %v2938_v8  ;;  %2584 = vmatpush3.bf16.msra.mxu1 %v2722_v20 }
 0x519   : > { %2597 = vmatprep.subr.bf16.mxu1 %v2938_v8 }
 0x51f   : > { %1676 = vperm.xlu1 %2714, %v2744_v21  }
 0x523   : > { %1681 = vperm.xlu1 %2714, %v2746_v22  }
 0x528   : > { %1671 = vperm.xlu0 %2713, %v2748_v23  }
 0x567   : > { %v3374_v24 = vpop.f32.mrb[8].mxu1 }
 0x568   : > { %v2561_v25 = vpop.f32.mrb[9].mxu1 }
 0x569   : > { %v1732_v26 = vpop.f32.mrb[10].mxu1 }
 0x56a   : > { %v2562_v28 = vpop.f32.mrb[11].mxu1  ;;  %v1660_v26 = vld [vmem:[#allocation8] sm:$0xff] }
 0x597   : > { %v1645_v35 = vpop.xlane.xlu1 %1644 }
 0x598   : > { %v1653_v39 = vadd.f32 %v1645_v35, %v1633_v31 }
 0x59a   : > { %1657 = vst.msk [vmem:[#allocation7 + $0x8] sm:$0xff] %vm818_vm6, %v1653_v39 }
 0x59b   : > { %v1648_v42 = vpop.xlane.xlu0 %1647  ;;  %v1642_v43 = vpop.xlane.xlu1 %1641 }
 0x59c   : > { %v1654_v45 = vadd.f32 %v1648_v42, %v1634_v40  ;;  %v1652_v46 = vadd.f32 %v1642_v43, %v1632_v41 }
 0x59e   : > { %1658 = vst.msk [vmem:[#allocation7 + $0x10] sm:$0xff] %vm818_vm6, %v1654_v45  ;;  %1656 = vst.msk [vmem:[#allocation7] sm:$0xff] %vm818_vm6, %v1652_v46  ;;  %v2440_v46 = vld [vmem:[#allocation9] ss:$0 sm:$0xff] }
 0x59f   : > { %v1651_v29 = vpop.xlane.xlu0 %1650  ;;  %v1677_v57 = vpop.permute.xlu1 %1676 }
 0x5a0   : > { %v1655_v30 = vadd.f32 %v1651_v29, %v1635_v27  ;;  %v1686_v62 = vmul.f32 %v1677_v57, %v1662_v58  ;;  %v2725_v57 = vld [vmem:[%s3518_s12] sm:$0xff]  }
 0x5a1   : > { %v1890_v47 = vld [vmem:[#allocation7 + $0x8] sm:$0xff] }
 0x5a2   : > { %1659 = vst.msk [vmem:[#allocation7 + $0x18] sm:$0xff] %vm818_vm6, %v1655_v30  ;;  %2751 = vrcp.f32 %v1890_v47 }
 0x5a3   : > { %v1682_v4 = vpop.permute.xlu1 %1681 }
 0x5a4   : > { %v1687_v10 = vmul.f32 %v1682_v4, %v1663_v3  ;;  %v2726_v4 = vld [vmem:[%s3518_s12 + $0x8] sm:$0xff]  }
 0x5a5   : > { %v1891_v48 = vld [vmem:[#allocation7 + $0x10] sm:$0xff]  ;;  %v1889_v50 = vld [vmem:[#allocation7] sm:$0xff] }
 0x5a6   : > { %2753 = vrcp.f32 %v1891_v48 }
 0x5a7   : > { %v1672_v56 = vpop.permute.xlu0 %1671 }
 0x5a8   : > { %v1685_v36 = vmul.f32 %v1672_v56, %v1661_v55  ;;  %v2723_v56 = vld [vmem:[%s3516_s10] sm:$0xff]  }
 0x5a9   : > { %v1892_v49 = vld [vmem:[#allocation7 + $0x18] sm:$0xff]  ;;  %2590 = vmatpush3.bf16.msra.mxu0 %v2723_v56 }
 0x5aa   : > { %2755 = vrcp.f32 %v1892_v49  ;;  %2591 = vmatprep.subr.bf16.mxu0 %v2938_v8 }
 0x5ab   : > { %2757 = vrcp.f32 %v1889_v50 }
 0x5ac   : > { %v2752_v51 = vpop.eup %2751 }
 0x5ad   : > { %1904 = vperm.xlu0 %2713, %v2752_v51  }
 0x5b0   : > { %v2754_v52 = vpop.eup %2753 }
 0x5b1   : > { %1909 = vperm.xlu1 %2714, %v2754_v52  }
 0x5b4   : > { %v2756_v53 = vpop.eup %2755 }
 0x5b5   : > { %1666 = vperm.xlu1 %2714, %v2750_v33   ;;  %1914 = vperm.xlu0 %2713, %v2756_v53   ;;  %v2758_v54 = vpop.eup %2757 }
 0x5b9   : > { %1899 = vperm.xlu0 %2713, %v2758_v54  }
 0x5e2   : > { %v1775_v59 = vpop.f32.mrb[20].mxu0 }
 0x5e3   : > { %v1874_v60 = vadd.f32 %v1775_v59, %v1685_v36  ;;  %v2567_v61 = vpop.f32.mrb[21].mxu0 }
 0x5e4   : > { %v1778_v63 = vpop.f32.mrb[22].mxu0 }
 0x5e5   : > { %1878 = vst.msk [vmem:[#allocation8 + $0x8] sm:$0xff] %vm827_vm2, %v1874_v60  ;;  %v2568_v1 = vpop.f32.mrb[23].mxu0  ;;  %v1821_v2 = vpop.f32.mrb[12].mxu1  ;;  %v2444_v60 = vld [vmem:[#allocation12] ss:$0 sm:$0xff] }
 0x5e6   : > { %v1875_v5 = vadd.f32 %v1821_v2, %v1686_v62  ;;  %v2573_v6 = vpop.f32.mrb[13].mxu1  ;;  %v2445_v63 = vld [vmem:[#allocation14] ss:$0 sm:$0xff] }
 0x5e7   : > { %v1824_v7 = vpop.f32.mrb[14].mxu1  ;;  %v2728_v6 = vld [vmem:[%s3518_s12 + $0x18] sm:$0xff]  }
 0x5e8   : > { %1879 = vst.msk [vmem:[#allocation8 + $0x10] sm:$0xff] %vm827_vm2, %v1875_v5  ;;  %v2574_v9 = vpop.f32.mrb[15].mxu1  ;;  %v2727_v5 = vld [vmem:[%s3518_s12 + $0x10] sm:$0xff]   ;;  %v2729_v7 = vld [vmem:[%s3518_s12 + $0x20] sm:$0xff]  }
 0x5e9   : > { %v2730_v9 = vld [vmem:[%s3518_s12 + $0x28] sm:$0xff]  }
 0x5ea   : > { %v1867_v11 = vpop.f32.mrb[24].mxu0 }
 0x5eb   : > { %v1876_v12 = vadd.f32 %v1867_v11, %v1687_v10  ;;  %v2579_v13 = vpop.f32.mrb[25].mxu0  ;;  %v2731_v10 = vld [vmem:[%s3518_s12 + $0x30] sm:$0xff]   ;;  %v2732_v11 = vld [vmem:[%s3518_s12 + $0x38] sm:$0xff]  }
 0x5ec   : > { %v1870_v14 = vpop.f32.mrb[26].mxu0  ;;  %v1886_v17 = vld [vmem:[#allocation8 + $0x8] sm:$0xff] }
 0x5ed   : > { %1880 = vst.msk [vmem:[#allocation8 + $0x18] sm:$0xff] %vm827_vm2, %v1876_v12  ;;  %v2580_v15 = vpop.f32.mrb[27].mxu0  ;;  %v2446_v12 = vld [vmem:[%s3517_s11] ss:$0 sm:$0xff] }
 0x5ef   : > { %v1887_v22 = vld [vmem:[#allocation8 + $0x10] sm:$0xff] }
 0x5f4   : > { %v1888_v34 = vld [vmem:[#allocation8 + $0x18] sm:$0xff] }
 0x62c   : > { %v1905_v16 = vpop.permute.xlu0 %1904 }
 0x62d   : > { %v1918_v19 = vmul.f32 %v1905_v16, %v1886_v17 }
 0x62f   : > { %v2466_v21 = vpack.c.bf16 %v1918_v19, %v1918_v19 }
 0x630   : > { %v1910_v23 = vpop.permute.xlu1 %1909 }
 0x631   : > { %v1919_v25 = vmul.f32 %v1910_v23, %v1887_v22  ;;  %1927 = vrot.lane.b32.xlu1 %v2466_v21, %s2945_s17  ;;  %s2252_s17 = sshll.u32 %s518_s14, 4  ;;  %s3460_s17 = int_to_ptr.vmem [resolvable:$true] %s2252_s17 }
 0x632   : > { %s2847_s21 = scalar_lea.vmem %s3460_s17, 128  ;;  %p2854_p11 = scmp.lt.s32.totalorder %s3460_s17, %s2852_s27 }
 0x633   : > { %v2467_v28 = vpack.c.bf16 %v1919_v25, %v1919_v25  ;;  %p2848_p13 = scmp.ne.s32.totalorder %s3460_s17, %s2847_s21  ;;  %p2855_p3 = scmp.lt.s32.totalorder %s2853_s15, %s2847_s21 }
 0x634   : > { %v1915_v32 = vpop.permute.xlu0 %1914  ;;  %v1667_v31 = vpop.permute.xlu1 %1666 }
 0x635   : > { %v1920_v33 = vmul.f32 %v1915_v32, %v1888_v34  ;;  %v1684_v35 = vmul.f32 %v1667_v31, %v1660_v26  ;;  %1936 = vrot.lane.b32.xlu0 %v2467_v28, %s2946_s23  ;;  %v2450_v32 = vld [vmem:[%s3519_s13] ss:$0 sm:$0xff]  ;;  %p2849_p8 = pnand %p2848_p13, %p3556_p4  ;;  %p2856_p5 = por %p2855_p3, %p2854_p11 }
 0x637   : > { %v2468_v37 = vpack.c.bf16 %v1920_v33, %v1920_v33  ;;  %v1873_v38 = vadd.f32 %v3374_v24, %v1684_v35  ;;  %p2850_p10 = pneg %p2849_p8 }
 0x638   : > { %v1900_v39 = vpop.permute.xlu0 %1899 }
 0x639   : > { %1877 = vst.msk [vmem:[#allocation8] sm:$0xff] %vm827_vm2, %v1873_v38  ;;  %1945 = vrot.lane.b32.xlu1 %v2468_v37, %s2947_s25  ;;  %p2857_p6 = pnand %p2856_p5, %p2850_p10 }
 0x640   : > { %v1885_v40 = vld [vmem:[#allocation8] sm:$0xff] }
 0x641   : > { %v1917_v41 = vmul.f32 %v1900_v39, %v1885_v40 }
 0x643   : > { %v1921_v42 = vpack.c.bf16 %v1917_v41, %v1917_v41 }
 0x645   : > { %1922 = vst.msk [vmem:[#allocation5] sm:$0xf] %vm736_vm3, %v1921_v42 }
 0x6a3   : > { %v1928_v43 = vpop.permute.xlu1 %1927 }
 0x6a4   : > { %1931 = vst.msk [vmem:[#allocation5] sm:$0xf] %vm1930_vm7, %v1928_v43 }
 0x6a7   : > { %v1937_v44 = vpop.permute.xlu0 %1936 }
 0x6a8   : > { %1940 = vst.msk [vmem:[#allocation5] sm:$0xf] %vm1939_vm8, %v1937_v44 }
 0x6ab   : > { %v1946_v45 = vpop.permute.xlu1 %1945 }
 0x6ac   : > { %1949 = vst.msk [vmem:[#allocation5] sm:$0xf] %vm1948_vm9, %v1946_v45 }
 0x6b3   : > { %v1950_v24 = vld [vmem:[#allocation5] sm:$0xf] }
 0x6b4   : > { %2586 = vmatmul.mubr.msk.bf16.vlgmr.msra.gmra.mrb[16].mxu1 %vm531_vm0, %v1950_v24 }
 0x6b5   : > { %2613 = vmatprep.mubr.msk.bf16.mxu1 %vm2939_vm1, %v2938_v8  ;;  %2598 = vmatpush3.bf16.msra.mxu1 %v2725_v57 }
 0x6b6   : > { %2599 = vmatprep.subr.bf16.mxu1 %v2938_v8 }
 0x6b9   : > { %2600 = vmatpush3.bf16.msra.mxu1 %v2726_v4 }
 0x6ba   : > { %2601 = vmatprep.subr.bf16.mxu1 %v2938_v8 }
 0x6bd   : > { %2602 = vmatpush3.bf16.msra.mxu1 %v2727_v5 }
 0x6be   : > { %2603 = vmatprep.subr.bf16.mxu1 %v2938_v8 }
 0x6c1   : > { %2604 = vmatpush3.bf16.msra.mxu1 %v2728_v6 }
 0x6c2   : > { %2605 = vmatprep.subr.bf16.mxu1 %v2938_v8 }
 0x6c5   : > { %2606 = vmatpush3.bf16.msra.mxu1 %v2729_v7 }
 0x6c6   : > { %2607 = vmatprep.subr.bf16.mxu1 %v2938_v8 }
 0x6c9   : > { %2608 = vmatpush3.bf16.msra.mxu1 %v2730_v9 }
 0x6ca   : > { %2609 = vmatprep.subr.bf16.mxu1 %v2938_v8 }
 0x6cd   : > { %2610 = vmatpush3.bf16.msra.mxu1 %v2731_v10 }
 0x6ce   : > { %2611 = vmatprep.subr.bf16.mxu1 %v2938_v8 }
 0x6d1   : > { %2612 = vmatpush3.bf16.msra.mxu1 %v2732_v11 }
 0x787   : > { %v2011_v27 = vpop.f32.mrb[16].mxu1 }
 0x788   : > { %v2012_v29 = vadd.f32 %v2440_v46, %v2011_v27  ;;  %v2587_v30 = vpop.f32.mrb[17].mxu1 }
 0x789   : > { %v2014_v47 = vpop.f32.mrb[18].mxu1 }
 0x78a   : > { %v3401_v48 = vadd.f32 %v2012_v29, %v3178_v0  ;;  %v2588_v49 = vpop.f32.mrb[19].mxu1  ;;  %v2724_v0 = vld [vmem:[%s3516_s10 + $0x8] sm:$0xff]  }
 0x78b   : > { %2592 = vmatpush3.bf16.msra.mxu0 %v2724_v0 }
 0x78c   : > { %v2020_v50 = vsel %vm531_vm0, %v3401_v48, 0.0 }
 0x78d   : > { %2021 = vadd.xlane.f32.xlu0 %v2020_v50 }
 0x81a   : > { %v2022_v51 = vpop.xlane.xlu0 %2021 }
 0x81b   : > { %v2023_v52 = vmul.f32 0.03125, %v2022_v51 }
 0x81d   : > { %v2024_v53 = vsub.f32 %v3401_v48, %v2023_v52 }
 0x81f   : > { %v2025_v54 = vmul.f32 %v2024_v53, %v2024_v53  ;;  %v2036_v61 = vmul.f32 %v2444_v60, %v2024_v53 }
 0x821   : > { %v2026_v55 = vsel %vm531_vm0, %v2025_v54, 0.0 }
 0x822   : > { %2027 = vadd.xlane.f32.xlu1 %v2026_v55 }
 0x8af   : > { %v2028_v58 = vpop.xlane.xlu1 %2027 }
 0x8b0   : > { %v2029_v36 = vmul.f32 0.03125, %v2028_v58 }
 0x8b2   : > { %v2037_v59 = vadd.f32 1e-05, %v2029_v36 }
 0x8b4   : > { %2759 = vrsqrt.f32 %v2037_v59 }
 0x8be   : > { %v2760_v62 = vpop.eup %2759 }
 0x8bf   : > { %v2039_v1 = vmul.f32 %v2760_v62, %v2036_v61 }
 0x8c1   : > { %v2046_v2 = vadd.f32 %v2445_v63, %v2039_v1 }
 0x8c3   : > { %v2047_v3 = vpack.c.bf16 %v2046_v2, %v2046_v2 }
 0x8c5   : > { %2594 = vmatmul.mubr.msk.bf16.vlgmr.msra.gmra.mrb[28].mxu0 %vm531_vm0, %v2047_v3 }
 0x998   : > { %v2108_v13 = vpop.f32.mrb[28].mxu0 }
 0x999   : > { %v2109_v14 = vadd.f32 %v2446_v12, %v2108_v13  ;;  %v2595_v15 = vpop.f32.mrb[29].mxu0 }
 0x99a   : > { %v2111_v16 = vpop.f32.mrb[30].mxu0 }
 0x99b   : > { %v2114_v17 = vmul.f32 %v2109_v14, %v2109_v14  ;;  %v2596_v18 = vpop.f32.mrb[31].mxu0  ;;  %v2116_v8 = vmul.f32 0.5, %v2109_v14 }
 0x99d   : > { %v2115_v19 = vmul.f32 %v2114_v17, %v2109_v14 }
 0x99f   : > { %v2117_v20 = vmul.f32 0.044715, %v2115_v19 }
 0x9a1   : > { %v2118_v21 = vadd.f32 %v2117_v20, %v2109_v14 }
 0x9a3   : > { %v2119_v22 = vmul.f32 0.7978846, %v2118_v21 }
 0x9a5   : > { %2761 = vtanh.f32 %v2119_v22 }
 0x9af   : > { %v2762_v23 = vpop.eup %2761 }
 0x9b0   : > { %v2121_v25 = vadd.f32 1.0, %v2762_v23 }
 0x9b2   : > { %v2122_v26 = vmul.f32 %v2121_v25, %v2116_v8 }
 0x9b4   : > { %v2123_v28 = vpack.c.bf16 %v2122_v26, %v2122_v26 }
 0x9b6   : > { %2614 = vmatmul.mubr.bf16.vlgmr.msra.gmra.mrb[20].mxu1 %v2123_v28 }
 0xa89   : > { %v2229_v34 = vpop.f32.mrb[20].mxu1 }
 0xa8a   : > { %v2230_v31 = vadd.f32 %v2450_v32, %v2229_v34  ;;  %v2615_v33 = vpop.f32.mrb[21].mxu1 }
 0xa8b   : > { %v2232_v35 = vpop.f32.mrb[22].mxu1 }
 0xa8c   : > { %v2235_v37 = vadd.f32 %v2230_v31, %v3401_v48  ;;  %v2616_v38 = vpop.f32.mrb[23].mxu1 }
 0xa8e   : > { %2236 = vst.msk [vmem:[%s518_s14] sm:$0xff] %vm531_vm0, %v2235_v37 }
 0xa8f   : > { %2860 = shalt.err (!%p2857_p6)
}
 0xa90   : > { %s2861_s28 = scalar_lea.hbm %s3458_s8, 128  ;;  %s2865_s26 = scalar_lea.hbm %s3555_s19, 256 }
 0xa91   : > { %p2862_p7 = scmp.ne.s32.totalorder %s3458_s8, %s2861_s28  ;;  %p2866_p0 = scmp.lt.u32.totalorder %s3458_s8, %s3555_s19 }
 0xa92   : > { %p2867_p2 = scmp.lt.u32.totalorder %s2865_s26, %s2861_s28  ;;  %p2869_p13 = scmp.lt.u32.totalorder %s2861_s28, %s3458_s8 }
 0xa93   : > { %p2863_p9 = pnand %p2862_p7, %p3556_p4 }
 0xa94   : > { %p2868_p1 = por %p2867_p2, %p2866_p0 }
 0xa95   : > { %p2864_p12 = pneg %p2863_p9 }
 0xa96   : > { %p2870_p8 = por %p2869_p13, %p2868_p1 }
 0xa98   : > { %p2871_p10 = pnand %p2870_p8, %p2864_p12 }
 0xa9a   : > { %2874 = shalt.err (!%p2871_p10)
}
 0xa9b   : > { %2629 = dma.vmem_to_hbm [thread:$0]  (%p3556_p4), %s3460_s17, 128, %s3458_s8, %s2238_s16  }
 0xa9c PF: > { %s3557_s23 = sld [smem:[#allocation22_spill]]  ;;  %s3558_s25 = sld [smem:[#allocation19_spill]] }
 0xa9d   : > { %s3559_s21 = sld [smem:[#allocation25_spill]] }
 0xaa2   : > { %p2651_p11 = scmp.ge.s32.totalorder %s3557_s23, 2  ;;  %s2264_s20 = sand.u32 1, %s3558_s25  }
 0xaa3   : > { %p3560_p3 = scmp.ne.s32.totalorder %s3559_s21, 0  ;;  %s2265_s27 = scalar_lea.sflag [#allocation11], %s2264_s20 }
 0xaa5   : > { %p2642_p5 = pnand %p2651_p11, %p3560_p3 }
 0xaa7   : > { %2908 = dma.done.wait (!%p2642_p5), %s2265_s27, 128  }
 0xaa8   : > { %2910 = vsyncadd (!%p2642_p5), %s2265_s27, 4294967168  ;;  %s29_s18 = sadd.s32 1, %s3557_s23   ;;  %s3561_s15 = sld [smem:[#allocation20_spill]] }
 0xaa9   : > { %p26_p6 = scmp.ge.s32.totalorder %s29_s18, 4   ;;  %s3562_s28 = sld [smem:[#allocation26_spill]] }
 0xaaa   : > { %s3563_s16 = sld [smem:[#allocation21_spill]]  ;;  %s3564_s17 = sld [smem:[#allocation23_spill]] }
 0xaab   : > { %s3565_s29 = smov %s2917_s30  ;;  %28 = sbr.rel (!%p26_p6) target bundleno = 9 (0x9), region = 155 }
 0xaae   : > { %s3566_s30 = smov %s3561_s15 }
 0xaaf   : > { %s3567_s15 = smov %s3562_s28 }
 0xab2   :  { %2270 = vsyncpa [#allocation10], 1 }
 0xab3   :  { %2272 = vsyncpa [#allocation10 + $0x1], 1 }
 0xab4   :  { %2273 = vsyncpa [#allocation13], 1 }
 0xab5   :  { %2274 = vsyncpa [#allocation11], 1 }
 0xab6   :  { %2276 = vsyncpa [#allocation11 + $0x1], 1 }

</bundles_post_ra>
